<compile_context>
chip_gen: v5e
topology: v5e:2x2
jax: 0.10.0
libtpu: 0.0.40
codegen_flags: <defaults>
</compile_context>

<pallas_src>
import jax
import jax.numpy as jnp
from jax.experimental import pallas as pl
from jax.experimental.pallas import tpu as pltpu


# ----------------------------- configuration ------------------------------ #
B = 2          # batch
T = 8          # video frames / encoder sequence length
V = 16         # skeleton joints
C_SK = 4       # skeleton input channels
D_RGB = 32     # rgb feature dim
EMB = 16       # CARL EMBEDDER_MODEL.EMBEDDING_SIZE
C_OUT = 24     # stagcn[-1].out_channels
IN_CH = EMB + C_OUT            # Transformation in_channel
D_MODEL = 32   # T5 hidden
N_HEADS = 4
D_HEAD = D_MODEL // N_HEADS
D_FF = 64
VOCAB = 64
L_DEC = 8      # decoder length
SCALE = 1.0 / (D_HEAD ** 0.5)  # TODO(synk): real T5 applies no 1/sqrt(d_head) scaling.
NEG = -1e9

_WEIGHT_ORDER = (
    "carl_w", "carl_b",
    "gcn_A", "gcn_Ab", "gcn_Wt", "gcn_Wb", "gcn_pool",
    "tr_w_rgb", "tr_w_skel", "tr_b",
    "ln_all",
    "enc_sa_wqkv", "enc_sa_bqkv", "enc_sa_wo", "enc_sa_bo",
    "enc_ff_wi", "enc_ff_bi", "enc_ff_wo", "enc_ff_bo",
    "tok_emb",
    "dec_sa_wqkv", "dec_sa_bqkv", "dec_sa_wo", "dec_sa_bo",
    "dec_ca_wqkv", "dec_ca_bqkv", "dec_ca_wo", "dec_ca_bo",
    "dec_ff_wi", "dec_ff_bi", "dec_ff_wo", "dec_ff_bo",
    "lm_w", "lm_b",
)


# ------------------------------ in-kernel math ----------------------------- #
def _rms(x, eps=1e-6):
    return x * jax.lax.rsqrt(jnp.mean(jnp.square(x), axis=-1, keepdims=True) + eps)


def _attention(x_res, q_in, kv_in, bias, wqkv_ref, bqkv_ref, wo_ref, bo_ref):
    """Multi-head attention; weights pre-split per head at init:
         wqkv_ref: (3, H, D, Dh), bqkv_ref: (3, H, 1, Dh), wo_ref: (H, Dh, D), bo_ref: (1, D)
       Heads are a static unroll of tiny 2-D dots on per-head weight slabs: no lane
       slicing of activations and no head concat (output projection is accumulated)."""
    out = bo_ref[...]                                             # (1, D)
    for h in range(N_HEADS):
        q = jnp.dot(q_in, wqkv_ref[0, h], preferred_element_type=jnp.float32) + bqkv_ref[0, h]
        k = jnp.dot(kv_in, wqkv_ref[1, h], preferred_element_type=jnp.float32) + bqkv_ref[1, h]
        v = jnp.dot(kv_in, wqkv_ref[2, h], preferred_element_type=jnp.float32) + bqkv_ref[2, h]
        s = jnp.dot(q, k.T, preferred_element_type=jnp.float32) * SCALE + bias   # (Sq, Sk)
        m = jnp.max(s, axis=-1, keepdims=True)
        p = jnp.exp(s - m)
        p = p / jnp.sum(p, axis=-1, keepdims=True)                # exact divide (review note)
        ctx = jnp.dot(p, v, preferred_element_type=jnp.float32)   # (Sq, Dh)
        out = out + jnp.dot(ctx, wo_ref[h], preferred_element_type=jnp.float32)
    return x_res + out


def _ffn(x, ln, wi_ref, bi_ref, wo_ref, bo_ref):
    xn = _rms(x) * ln
    h = jnp.dot(xn, wi_ref[...], preferred_element_type=jnp.float32) + bi_ref[...]
    h = jnp.maximum(h, 0.0)
    return x + jnp.dot(h, wo_ref[...], preferred_element_type=jnp.float32) + bo_ref[...]


# ------------------------------- fused kernel ------------------------------ #
def _aligned_t5_kernel(skel_ref, rgb_ref, mask_ref, ids_ref, lab_ref, *refs):
    (carl_w, carl_b,
     gcn_A, gcn_Ab, gcn_Wt, gcn_Wb, gcn_pool,
     tr_w_rgb, tr_w_skel, tr_b,
     ln_all,
     esa_wqkv, esa_bqkv, esa_wo, esa_bo,
     eff_wi, eff_bi, eff_wo, eff_bo,
     tok_emb,
     dsa_wqkv, dsa_bqkv, dsa_wo, dsa_bo,
     dca_wqkv, dca_bqkv, dca_wo, dca_bo,
     dff_wi, dff_bi, dff_wo, dff_bo,
     lm_w, lm_b,
     logits_ref, nll_ref) = refs

    f32 = jnp.float32

    # ---------- frozen CARL aligner (simplified to a frozen linear embedder) ----------
    # TODO(synk): CARL is a full transformer video-alignment embedder; reduced to a frozen linear map.
    rgb = rgb_ref[0]                                                         # (T, D_RGB)
    aligned = jnp.dot(rgb, carl_w[...], preferred_element_type=f32) + carl_b[...]   # (T, EMB)

    # ---------- STA-GCN: graph conv (block-diag kron(I_T, A)) + 1x1 conv + joint mean-pool ----------
    x_sk = skel_ref[0]                                                       # (C_SK, T*V)
    xg = jnp.dot(x_sk, gcn_A[...], preferred_element_type=f32) + gcn_Ab[...]         # (C_SK, T*V)
    xc = jnp.maximum(
        jnp.dot(gcn_Wt[...], xg, preferred_element_type=f32) + gcn_Wb[...], 0.0)     # (C_OUT, T*V)
    skel_ct = jnp.dot(xc, gcn_pool[...], preferred_element_type=f32)                 # (C_OUT, T)

    # ---------- feature fusion + Transformation (concat eliminated: split weight) ----------
    transformed = (jnp.dot(aligned, tr_w_rgb[...], preferred_element_type=f32)
                   + jnp.dot(skel_ct.T, tr_w_skel[...], preferred_element_type=f32)
                   + tr_b[...])                                              # (T, D_MODEL)

    # ---------- attention biases built in-kernel from the int mask / iota ----------
    enc_bias = jnp.where(mask_ref[0] > 0, 0.0, NEG).astype(f32)              # (1, T)
    row = jax.lax.broadcasted_iota(jnp.int32, (L_DEC, L_DEC), 0)
    col = jax.lax.broadcasted_iota(jnp.int32, (L_DEC, L_DEC), 1)
    causal_bias = jnp.where(col <= row, 0.0, NEG).astype(f32)                # (L, L)

    # ---------- T5 encoder layer (self-attn + FFN + final RMSNorm) ----------
    # TODO(synk): real T5 is a pretrained multi-layer model with relative position biases.
    h = transformed
    hn = _rms(h) * ln_all[0]
    h = _attention(h, hn, hn, enc_bias, esa_wqkv, esa_bqkv, esa_wo, esa_bo)
    h = _ffn(h, ln_all[1], eff_wi, eff_bi, eff_wo, eff_bo)
    enc_kv = _rms(h) * ln_all[2]                                             # encoder final RMSNorm

    # ---------- T5 decoder layer (embed + self-attn + cross-attn + FFN) ----------
    vocab_iota = jax.lax.broadcasted_iota(jnp.int32, (L_DEC, VOCAB), 1)
    dec_onehot = (vocab_iota == ids_ref[0]).astype(f32)                      # (L, VOCAB)
    g = jnp.dot(dec_onehot, tok_emb[...], preferred_element_type=f32)        # (L, D_MODEL)

    gn = _rms(g) * ln_all[3]
    g = _attention(g, gn, gn, causal_bias, dsa_wqkv, dsa_bqkv, dsa_wo, dsa_bo)
    gn = _rms(g) * ln_all[4]
    g = _attention(g, gn, enc_kv, enc_bias, dca_wqkv, dca_bqkv, dca_wo, dca_bo)
    g = _ffn(g, ln_all[5], dff_wi, dff_bi, dff_wo, dff_bo)

    # ---------- final RMSNorm + LM head + fused per-token NLL ----------
    gn = _rms(g) * ln_all[6]
    logits = jnp.dot(gn, lm_w[...], preferred_element_type=f32) + lm_b[...]  # (L, VOCAB)
    logits_ref[0] = logits

    m = jnp.max(logits, axis=-1, keepdims=True)
    lse = m + jnp.log(jnp.sum(jnp.exp(logits - m), axis=-1, keepdims=True))  # (L, 1)
    picked = jnp.sum(jnp.where(vocab_iota == lab_ref[0], logits, 0.0),
                     axis=-1, keepdims=True)                                 # (L, 1)
    nll_ref[0] = lse - picked


# ------------------------------ pallas wrapper ----------------------------- #
def _batched_spec(shape):
    nrest = len(shape) - 1
    return pl.BlockSpec((1,) + tuple(shape[1:]), lambda b: (b,) + (0,) * nrest)


def _replicated_spec(shape):
    n = len(shape)
    return pl.BlockSpec(tuple(shape), lambda b: (0,) * n)


@jax.jit
def aligned_t5_forward(params, skeleton_feature, rgb_feature, video_mask,
                       decoder_input_ids, labels):
    # Only no-op HBM reshapes here; all compute happens in the single fused kernel.
    skel = skeleton_feature.astype(jnp.float32).reshape(B, C_SK, T * V)
    rgb = rgb_feature.astype(jnp.float32)
    mask3 = video_mask.astype(jnp.int32).reshape(B, 1, T)
    ids3 = decoder_input_ids.astype(jnp.int32).reshape(B, L_DEC, 1)
    lab3 = labels.astype(jnp.int32).reshape(B, L_DEC, 1)

    data = [skel, rgb, mask3, ids3, lab3]
    weights = [params[name] for name in _WEIGHT_ORDER]

    in_specs = ([_batched_spec(a.shape) for a in data]
                + [_replicated_spec(w.shape) for w in weights])
    out_shape = (jax.ShapeDtypeStruct((B, L_DEC, VOCAB), jnp.float32),
                 jax.ShapeDtypeStruct((B, L_DEC, 1), jnp.float32))
    out_specs = (_batched_spec((B, L_DEC, VOCAB)),
                 _batched_spec((B, L_DEC, 1)))

    logits, nll = pl.pallas_call(
        _aligned_t5_kernel,
        out_shape=out_shape,
        grid=(B,),
        in_specs=in_specs,
        out_specs=out_specs,
        compiler_params=pltpu.CompilerParams(
            dimension_semantics=("parallel",)),   # v7x: one batch element per TensorCore
    )(*data, *weights)

    loss = jnp.mean(nll)        # tiny (B*L) reduction; heavy loss math is in-kernel
    return loss, logits


# -------------------------------- parameters ------------------------------- #
def init_params():
    key = jax.random.PRNGKey(42)

    def nxt():
        nonlocal key
        key, sub = jax.random.split(key)
        return sub

    def w(shape, scale=0.05):
        return (scale * jax.random.normal(nxt(), shape)).astype(jnp.float32)

    def zeros(shape):
        return jnp.zeros(shape, jnp.float32)

    # deterministic normalized ring-graph adjacency for the joints, lifted to a
    # block-diagonal (T*V, T*V) operator so the kernel's graph conv is one matmul.
    eye = jnp.eye(V, dtype=jnp.float32)
    A = eye + jnp.roll(eye, 1, axis=1) + jnp.roll(eye, -1, axis=1)
    A = A / jnp.sum(A, axis=1, keepdims=True)
    A_big = jnp.kron(jnp.eye(T, dtype=jnp.float32), A)                        # (T*V, T*V)
    pool = jnp.kron(jnp.eye(T, dtype=jnp.float32),
                    jnp.full((V, 1), 1.0 / V, jnp.float32))                   # (T*V, T)

    gcn_W = w((C_SK, C_OUT))
    tr_w = w((IN_CH, D_MODEL))

    p = {
        "carl_w": w((D_RGB, EMB)), "carl_b": zeros((1, EMB)),
        "gcn_A": A_big, "gcn_Ab": zeros((1, T * V)),
        "gcn_Wt": gcn_W.T, "gcn_Wb": zeros((C_OUT, 1)),
        "gcn_pool": pool,
        "tr_w_rgb": tr_w[:EMB], "tr_w_skel": tr_w[EMB:], "tr_b": zeros((1, D_MODEL)),
        # [enc_ln1, enc_ln2, enc_lnf, dec_ln1, dec_ln2, dec_ln3, dec_lnf]
        "ln_all": jnp.ones((7, 1, D_MODEL), jnp.float32),
        "tok_emb": w((VOCAB, D_MODEL)),
        "lm_w": w((D_MODEL, VOCAB)), "lm_b": zeros((1, VOCAB)),
    }
    # attention weights packed ONCE into per-head slabs (no per-forward concats).
    for prefix in ("enc_sa", "dec_sa", "dec_ca"):
        wq, wk, wv, wo = (w((D_MODEL, D_MODEL)) for _ in range(4))
        p[prefix + "_wqkv"] = jnp.stack(
            [m.reshape(D_MODEL, N_HEADS, D_HEAD).transpose(1, 0, 2) for m in (wq, wk, wv)])
        p[prefix + "_bqkv"] = zeros((3, N_HEADS, 1, D_HEAD))
        p[prefix + "_wo"] = wo.reshape(N_HEADS, D_HEAD, D_MODEL)
        p[prefix + "_bo"] = zeros((1, D_MODEL))
    for prefix in ("enc_ff", "dec_ff"):
        p[prefix + "_wi"] = w((D_MODEL, D_FF))
        p[prefix + "_bi"] = zeros((1, D_FF))
        p[prefix + "_wo"] = w((D_FF, D_MODEL))
        p[prefix + "_bo"] = zeros((1, D_MODEL))
    return p


# ----------------------------------- main ---------------------------------- #
if __name__ == "__main__":
    params = init_params()

    key = jax.random.PRNGKey(0)
    k1, k2, k3, k4 = jax.random.split(key, 4)
    skeleton_feature = jax.random.normal(k1, (B, C_SK, T, V), jnp.float32)
    rgb_feature = jax.random.normal(k2, (B, T, D_RGB), jnp.float32)
    video_mask = jnp.ones((B, T), jnp.int32).at[:, -2:].set(0)   # last 2 frames padded
    decoder_input_ids = jax.random.randint(k3, (B, L_DEC), 0, VOCAB, dtype=jnp.int32)
    labels = jax.random.randint(k4, (B, L_DEC), 0, VOCAB, dtype=jnp.int32)

    loss, logits = aligned_t5_forward(params, skeleton_feature, rgb_feature,
                                      video_mask, decoder_input_ids, labels)
    jax.block_until_ready((loss, logits))
    assert logits.shape == (B, L_DEC, VOCAB)
    assert bool(jnp.isfinite(loss))
    print("KERNEL_OK")
</pallas_src>

<mosaic_0001>
module attributes {stable_mosaic.version = 11 : i64} {
  func.func @_aligned_t5_kernel(%arg0: i32, %arg1: memref<1x4x128xf32, #tpu.memory_space<vmem>>, %arg2: memref<1x8x32xf32, #tpu.memory_space<vmem>>, %arg3: memref<1x1x8xi32, #tpu.memory_space<vmem>>, %arg4: memref<1x8x1xi32, #tpu.memory_space<vmem>>, %arg5: memref<1x8x1xi32, #tpu.memory_space<vmem>>, %arg6: memref<32x16xf32, #tpu.memory_space<vmem>>, %arg7: memref<1x16xf32, #tpu.memory_space<vmem>>, %arg8: memref<128x128xf32, #tpu.memory_space<vmem>>, %arg9: memref<1x128xf32, #tpu.memory_space<vmem>>, %arg10: memref<24x4xf32, #tpu.memory_space<vmem>>, %arg11: memref<24x1xf32, #tpu.memory_space<vmem>>, %arg12: memref<128x8xf32, #tpu.memory_space<vmem>>, %arg13: memref<16x32xf32, #tpu.memory_space<vmem>>, %arg14: memref<24x32xf32, #tpu.memory_space<vmem>>, %arg15: memref<1x32xf32, #tpu.memory_space<vmem>>, %arg16: memref<7x1x32xf32, #tpu.memory_space<vmem>>, %arg17: memref<3x4x32x8xf32, #tpu.memory_space<vmem>>, %arg18: memref<3x4x1x8xf32, #tpu.memory_space<vmem>>, %arg19: memref<4x8x32xf32, #tpu.memory_space<vmem>>, %arg20: memref<1x32xf32, #tpu.memory_space<vmem>>, %arg21: memref<32x64xf32, #tpu.memory_space<vmem>>, %arg22: memref<1x64xf32, #tpu.memory_space<vmem>>, %arg23: memref<64x32xf32, #tpu.memory_space<vmem>>, %arg24: memref<1x32xf32, #tpu.memory_space<vmem>>, %arg25: memref<64x32xf32, #tpu.memory_space<vmem>>, %arg26: memref<3x4x32x8xf32, #tpu.memory_space<vmem>>, %arg27: memref<3x4x1x8xf32, #tpu.memory_space<vmem>>, %arg28: memref<4x8x32xf32, #tpu.memory_space<vmem>>, %arg29: memref<1x32xf32, #tpu.memory_space<vmem>>, %arg30: memref<3x4x32x8xf32, #tpu.memory_space<vmem>>, %arg31: memref<3x4x1x8xf32, #tpu.memory_space<vmem>>, %arg32: memref<4x8x32xf32, #tpu.memory_space<vmem>>, %arg33: memref<1x32xf32, #tpu.memory_space<vmem>>, %arg34: memref<32x64xf32, #tpu.memory_space<vmem>>, %arg35: memref<1x64xf32, #tpu.memory_space<vmem>>, %arg36: memref<64x32xf32, #tpu.memory_space<vmem>>, %arg37: memref<1x32xf32, #tpu.memory_space<vmem>>, %arg38: memref<32x64xf32, #tpu.memory_space<vmem>>, %arg39: memref<1x64xf32, #tpu.memory_space<vmem>>, %arg40: memref<1x8x64xf32, #tpu.memory_space<vmem>>, %arg41: memref<1x8x1xf32, #tpu.memory_space<vmem>>) attributes {dimension_semantics = [#tpu.dimension_semantics<parallel>], iteration_bounds = array<i64: 2>, scalar_prefetch = 0 : i64, scratch_operands = 0 : i64, tpu.core_type = #tpu.core_type<tc>, window_params = [{transform_indices = @transform_0, window_bounds = array<i64: 1, 4, 128>}, {transform_indices = @transform_1, window_bounds = array<i64: 1, 8, 32>}, {transform_indices = @transform_2, window_bounds = array<i64: 1, 1, 8>}, {transform_indices = @transform_3, window_bounds = array<i64: 1, 8, 1>}, {transform_indices = @transform_4, window_bounds = array<i64: 1, 8, 1>}, {pipeline_mode = #tpu.pipeline_mode<synchronous>, transform_indices = @transform_5, window_bounds = array<i64: 32, 16>}, {pipeline_mode = #tpu.pipeline_mode<synchronous>, transform_indices = @transform_6, window_bounds = array<i64: 1, 16>}, {pipeline_mode = #tpu.pipeline_mode<synchronous>, transform_indices = @transform_7, window_bounds = array<i64: 128, 128>}, {pipeline_mode = #tpu.pipeline_mode<synchronous>, transform_indices = @transform_8, window_bounds = array<i64: 1, 128>}, {pipeline_mode = #tpu.pipeline_mode<synchronous>, transform_indices = @transform_9, window_bounds = array<i64: 24, 4>}, {pipeline_mode = #tpu.pipeline_mode<synchronous>, transform_indices = @transform_10, window_bounds = array<i64: 24, 1>}, {pipeline_mode = #tpu.pipeline_mode<synchronous>, transform_indices = @transform_11, window_bounds = array<i64: 128, 8>}, {pipeline_mode = #tpu.pipeline_mode<synchronous>, transform_indices = @transform_12, window_bounds = array<i64: 16, 32>}, {pipeline_mode = #tpu.pipeline_mode<synchronous>, transform_indices = @transform_13, window_bounds = array<i64: 24, 32>}, {pipeline_mode = #tpu.pipeline_mode<synchronous>, transform_indices = @transform_14, window_bounds = array<i64: 1, 32>}, {pipeline_mode = #tpu.pipeline_mode<synchronous>, transform_indices = @transform_15, window_bounds = array<i64: 7, 1, 32>}, {pipeline_mode = #tpu.pipeline_mode<synchronous>, transform_indices = @transform_16, window_bounds = array<i64: 3, 4, 32, 8>}, {pipeline_mode = #tpu.pipeline_mode<synchronous>, transform_indices = @transform_17, window_bounds = array<i64: 3, 4, 1, 8>}, {pipeline_mode = #tpu.pipeline_mode<synchronous>, transform_indices = @transform_18, window_bounds = array<i64: 4, 8, 32>}, {pipeline_mode = #tpu.pipeline_mode<synchronous>, transform_indices = @transform_19, window_bounds = array<i64: 1, 32>}, {pipeline_mode = #tpu.pipeline_mode<synchronous>, transform_indices = @transform_20, window_bounds = array<i64: 32, 64>}, {pipeline_mode = #tpu.pipeline_mode<synchronous>, transform_indices = @transform_21, window_bounds = array<i64: 1, 64>}, {pipeline_mode = #tpu.pipeline_mode<synchronous>, transform_indices = @transform_22, window_bounds = array<i64: 64, 32>}, {pipeline_mode = #tpu.pipeline_mode<synchronous>, transform_indices = @transform_23, window_bounds = array<i64: 1, 32>}, {pipeline_mode = #tpu.pipeline_mode<synchronous>, transform_indices = @transform_24, window_bounds = array<i64: 64, 32>}, {pipeline_mode = #tpu.pipeline_mode<synchronous>, transform_indices = @transform_25, window_bounds = array<i64: 3, 4, 32, 8>}, {pipeline_mode = #tpu.pipeline_mode<synchronous>, transform_indices = @transform_26, window_bounds = array<i64: 3, 4, 1, 8>}, {pipeline_mode = #tpu.pipeline_mode<synchronous>, transform_indices = @transform_27, window_bounds = array<i64: 4, 8, 32>}, {pipeline_mode = #tpu.pipeline_mode<synchronous>, transform_indices = @transform_28, window_bounds = array<i64: 1, 32>}, {pipeline_mode = #tpu.pipeline_mode<synchronous>, transform_indices = @transform_29, window_bounds = array<i64: 3, 4, 32, 8>}, {pipeline_mode = #tpu.pipeline_mode<synchronous>, transform_indices = @transform_30, window_bounds = array<i64: 3, 4, 1, 8>}, {pipeline_mode = #tpu.pipeline_mode<synchronous>, transform_indices = @transform_31, window_bounds = array<i64: 4, 8, 32>}, {pipeline_mode = #tpu.pipeline_mode<synchronous>, transform_indices = @transform_32, window_bounds = array<i64: 1, 32>}, {pipeline_mode = #tpu.pipeline_mode<synchronous>, transform_indices = @transform_33, window_bounds = array<i64: 32, 64>}, {pipeline_mode = #tpu.pipeline_mode<synchronous>, transform_indices = @transform_34, window_bounds = array<i64: 1, 64>}, {pipeline_mode = #tpu.pipeline_mode<synchronous>, transform_indices = @transform_35, window_bounds = array<i64: 64, 32>}, {pipeline_mode = #tpu.pipeline_mode<synchronous>, transform_indices = @transform_36, window_bounds = array<i64: 1, 32>}, {pipeline_mode = #tpu.pipeline_mode<synchronous>, transform_indices = @transform_37, window_bounds = array<i64: 32, 64>}, {pipeline_mode = #tpu.pipeline_mode<synchronous>, transform_indices = @transform_38, window_bounds = array<i64: 1, 64>}, {transform_indices = @transform_39, window_bounds = array<i64: 1, 8, 64>}, {transform_indices = @transform_40, window_bounds = array<i64: 1, 8, 1>}]} {
    %c0 = arith.constant 0 : index
    %c0_0 = arith.constant 0 : index
    %c0_1 = arith.constant 0 : index
    %0 = vector.load %arg2[%c0, %c0_0, %c0_1] : memref<1x8x32xf32, #tpu.memory_space<vmem>>, vector<1x8x32xf32>
    %1 = vector.shape_cast %0 : vector<1x8x32xf32> to vector<8x32xf32>
    %c0_2 = arith.constant 0 : index
    %c0_3 = arith.constant 0 : index
    %2 = vector.load %arg6[%c0_2, %c0_3] : memref<32x16xf32, #tpu.memory_space<vmem>>, vector<32x16xf32>
    %cst = arith.constant dense<0.000000e+00> : vector<8x16xf32>
    %3 = tpu.matmul %1, %2, %cst {dimension_numbers = #tpu.dot_dimension_numbers<[1], [0], [0], [1], [0, 0, 1, 1], [], []>} : vector<8x32xf32>, vector<32x16xf32>, vector<8x16xf32> -> vector<8x16xf32>
    %c0_4 = arith.constant 0 : index
    %c0_5 = arith.constant 0 : index
    %4 = vector.load %arg7[%c0_4, %c0_5] : memref<1x16xf32, #tpu.memory_space<vmem>>, vector<1x16xf32>
    %5 = vector.broadcast %4 : vector<1x16xf32> to vector<8x16xf32>
    %6 = arith.addf %3, %5 : vector<8x16xf32>
    %c0_6 = arith.constant 0 : index
    %c0_7 = arith.constant 0 : index
    %c0_8 = arith.constant 0 : index
    %7 = vector.load %arg1[%c0_6, %c0_7, %c0_8] : memref<1x4x128xf32, #tpu.memory_space<vmem>>, vector<1x4x128xf32>
    %8 = vector.shape_cast %7 : vector<1x4x128xf32> to vector<4x128xf32>
    %c0_9 = arith.constant 0 : index
    %c0_10 = arith.constant 0 : index
    %9 = vector.load %arg8[%c0_9, %c0_10] : memref<128x128xf32, #tpu.memory_space<vmem>>, vector<128x128xf32>
    %cst_11 = arith.constant dense<0.000000e+00> : vector<4x128xf32>
    %10 = tpu.matmul %8, %9, %cst_11 {dimension_numbers = #tpu.dot_dimension_numbers<[1], [0], [0], [1], [0, 0, 1, 1], [], []>} : vector<4x128xf32>, vector<128x128xf32>, vector<4x128xf32> -> vector<4x128xf32>
    %c0_12 = arith.constant 0 : index
    %c0_13 = arith.constant 0 : index
    %11 = vector.load %arg9[%c0_12, %c0_13] : memref<1x128xf32, #tpu.memory_space<vmem>>, vector<1x128xf32>
    %12 = vector.broadcast %11 : vector<1x128xf32> to vector<4x128xf32>
    %13 = arith.addf %10, %12 : vector<4x128xf32>
    %c0_14 = arith.constant 0 : index
    %c0_15 = arith.constant 0 : index
    %14 = vector.load %arg10[%c0_14, %c0_15] : memref<24x4xf32, #tpu.memory_space<vmem>>, vector<24x4xf32>
    %cst_16 = arith.constant dense<0.000000e+00> : vector<24x128xf32>
    %15 = tpu.matmul %14, %13, %cst_16 {dimension_numbers = #tpu.dot_dimension_numbers<[1], [0], [0], [1], [0, 0, 1, 1], [], []>} : vector<24x4xf32>, vector<4x128xf32>, vector<24x128xf32> -> vector<24x128xf32>
    %c0_17 = arith.constant 0 : index
    %c0_18 = arith.constant 0 : index
    %16 = vector.load %arg11[%c0_17, %c0_18] : memref<24x1xf32, #tpu.memory_space<vmem>>, vector<24x1xf32>
    %17 = vector.broadcast %16 : vector<24x1xf32> to vector<24x128xf32>
    %18 = arith.addf %15, %17 : vector<24x128xf32>
    %cst_19 = arith.constant 0.000000e+00 : f32
    %19 = vector.broadcast %cst_19 : f32 to vector<24x128xf32>
    %20 = arith.maximumf %18, %19 : vector<24x128xf32>
    %c0_20 = arith.constant 0 : index
    %c0_21 = arith.constant 0 : index
    %21 = vector.load %arg12[%c0_20, %c0_21] : memref<128x8xf32, #tpu.memory_space<vmem>>, vector<128x8xf32>
    %cst_22 = arith.constant dense<0.000000e+00> : vector<24x8xf32>
    %22 = tpu.matmul %20, %21, %cst_22 {dimension_numbers = #tpu.dot_dimension_numbers<[1], [0], [0], [1], [0, 0, 1, 1], [], []>} : vector<24x128xf32>, vector<128x8xf32>, vector<24x8xf32> -> vector<24x8xf32>
    %c0_23 = arith.constant 0 : index
    %c0_24 = arith.constant 0 : index
    %23 = vector.load %arg13[%c0_23, %c0_24] : memref<16x32xf32, #tpu.memory_space<vmem>>, vector<16x32xf32>
    %cst_25 = arith.constant dense<0.000000e+00> : vector<8x32xf32>
    %24 = tpu.matmul %6, %23, %cst_25 {dimension_numbers = #tpu.dot_dimension_numbers<[1], [0], [0], [1], [0, 0, 1, 1], [], []>} : vector<8x16xf32>, vector<16x32xf32>, vector<8x32xf32> -> vector<8x32xf32>
    %25 = tpu.transpose %22, [1, 0] : vector<24x8xf32> -> vector<8x24xf32>
    %c0_26 = arith.constant 0 : index
    %c0_27 = arith.constant 0 : index
    %26 = vector.load %arg14[%c0_26, %c0_27] : memref<24x32xf32, #tpu.memory_space<vmem>>, vector<24x32xf32>
    %cst_28 = arith.constant dense<0.000000e+00> : vector<8x32xf32>
    %27 = tpu.matmul %25, %26, %cst_28 {dimension_numbers = #tpu.dot_dimension_numbers<[1], [0], [0], [1], [0, 0, 1, 1], [], []>} : vector<8x24xf32>, vector<24x32xf32>, vector<8x32xf32> -> vector<8x32xf32>
    %28 = arith.addf %24, %27 : vector<8x32xf32>
    %c0_29 = arith.constant 0 : index
    %c0_30 = arith.constant 0 : index
    %29 = vector.load %arg15[%c0_29, %c0_30] : memref<1x32xf32, #tpu.memory_space<vmem>>, vector<1x32xf32>
    %30 = vector.broadcast %29 : vector<1x32xf32> to vector<8x32xf32>
    %31 = arith.addf %28, %30 : vector<8x32xf32>
    %c0_31 = arith.constant 0 : index
    %c0_32 = arith.constant 0 : index
    %c0_33 = arith.constant 0 : index
    %32 = vector.load %arg3[%c0_31, %c0_32, %c0_33] : memref<1x1x8xi32, #tpu.memory_space<vmem>>, vector<1x1x8xi32>
    %33 = vector.shape_cast %32 : vector<1x1x8xi32> to vector<1x8xi32>
    %c0_i32 = arith.constant 0 : i32
    %34 = vector.broadcast %c0_i32 : i32 to vector<1x8xi32>
    %35 = arith.cmpi sgt, %33, %34 : vector<1x8xi32>
    %cst_34 = arith.constant 0.000000e+00 : f32
    %cst_35 = arith.constant -1.000000e+09 : f32
    %36 = vector.broadcast %cst_34 : f32 to vector<1x8xf32>
    %37 = vector.broadcast %cst_35 : f32 to vector<1x8xf32>
    %38 = arith.select %35, %36, %37 : vector<1x8xi1>, vector<1x8xf32>
    %39 = tpu.iota {dimensions = array<i32: 0>} : vector<8x8xi32>
    %40 = tpu.iota {dimensions = array<i32: 1>} : vector<8x8xi32>
    %41 = arith.cmpi sle, %40, %39 : vector<8x8xi32>
    %cst_36 = arith.constant 0.000000e+00 : f32
    %cst_37 = arith.constant -1.000000e+09 : f32
    %42 = vector.broadcast %cst_36 : f32 to vector<8x8xf32>
    %43 = vector.broadcast %cst_37 : f32 to vector<8x8xf32>
    %44 = arith.select %41, %42, %43 : vector<8x8xi1>, vector<8x8xf32>
    %45 = arith.mulf %31, %31 : vector<8x32xf32>
    %cst_38 = arith.constant dense<0.000000e+00> : vector<8xf32>
    %46 = vector.multi_reduction <add>, %45, %cst_38 [1] : vector<8x32xf32> to vector<8xf32>
    %47 = vector.shape_cast %46 : vector<8xf32> to vector<8x1xf32>
    %cst_39 = arith.constant 3.200000e+01 : f32
    %48 = vector.broadcast %cst_39 : f32 to vector<8x1xf32>
    %49 = arith.divf %47, %48 : vector<8x1xf32>
    %cst_40 = arith.constant 9.99999997E-7 : f32
    %50 = vector.broadcast %cst_40 : f32 to vector<8x1xf32>
    %51 = arith.addf %49, %50 : vector<8x1xf32>
    %52 = math.rsqrt %51 : vector<8x1xf32>
    %53 = vector.broadcast %52 : vector<8x1xf32> to vector<8x32xf32>
    %54 = arith.mulf %31, %53 : vector<8x32xf32>
    %c0_41 = arith.constant 0 : index
    %c0_42 = arith.constant 0 : index
    %c0_43 = arith.constant 0 : index
    %55 = vector.load %arg16[%c0_41, %c0_42, %c0_43] : memref<7x1x32xf32, #tpu.memory_space<vmem>>, vector<1x1x32xf32>
    %56 = vector.shape_cast %55 : vector<1x1x32xf32> to vector<1x32xf32>
    %57 = vector.broadcast %56 : vector<1x32xf32> to vector<8x32xf32>
    %58 = arith.mulf %54, %57 : vector<8x32xf32>
    %c0_44 = arith.constant 0 : index
    %c0_45 = arith.constant 0 : index
    %59 = vector.load %arg20[%c0_44, %c0_45] : memref<1x32xf32, #tpu.memory_space<vmem>>, vector<1x32xf32>
    %c0_46 = arith.constant 0 : index
    %c0_47 = arith.constant 0 : index
    %c0_48 = arith.constant 0 : index
    %c0_49 = arith.constant 0 : index
    %60 = vector.load %arg17[%c0_46, %c0_47, %c0_48, %c0_49] : memref<3x4x32x8xf32, #tpu.memory_space<vmem>>, vector<1x1x32x8xf32>
    %61 = vector.shape_cast %60 : vector<1x1x32x8xf32> to vector<32x8xf32>
    %cst_50 = arith.constant dense<0.000000e+00> : vector<8x8xf32>
    %62 = tpu.matmul %58, %61, %cst_50 {dimension_numbers = #tpu.dot_dimension_numbers<[1], [0], [0], [1], [0, 0, 1, 1], [], []>} : vector<8x32xf32>, vector<32x8xf32>, vector<8x8xf32> -> vector<8x8xf32>
    %c0_51 = arith.constant 0 : index
    %c0_52 = arith.constant 0 : index
    %c0_53 = arith.constant 0 : index
    %c0_54 = arith.constant 0 : index
    %63 = vector.load %arg18[%c0_51, %c0_52, %c0_53, %c0_54] : memref<3x4x1x8xf32, #tpu.memory_space<vmem>>, vector<1x1x1x8xf32>
    %64 = vector.shape_cast %63 : vector<1x1x1x8xf32> to vector<1x8xf32>
    %65 = vector.broadcast %64 : vector<1x8xf32> to vector<8x8xf32>
    %66 = arith.addf %62, %65 : vector<8x8xf32>
    %c1 = arith.constant 1 : index
    %c0_55 = arith.constant 0 : index
    %c0_56 = arith.constant 0 : index
    %c0_57 = arith.constant 0 : index
    %67 = vector.load %arg17[%c1, %c0_55, %c0_56, %c0_57] : memref<3x4x32x8xf32, #tpu.memory_space<vmem>>, vector<1x1x32x8xf32>
    %68 = vector.shape_cast %67 : vector<1x1x32x8xf32> to vector<32x8xf32>
    %cst_58 = arith.constant dense<0.000000e+00> : vector<8x8xf32>
    %69 = tpu.matmul %58, %68, %cst_58 {dimension_numbers = #tpu.dot_dimension_numbers<[1], [0], [0], [1], [0, 0, 1, 1], [], []>} : vector<8x32xf32>, vector<32x8xf32>, vector<8x8xf32> -> vector<8x8xf32>
    %c1_59 = arith.constant 1 : index
    %c0_60 = arith.constant 0 : index
    %c0_61 = arith.constant 0 : index
    %c0_62 = arith.constant 0 : index
    %70 = vector.load %arg18[%c1_59, %c0_60, %c0_61, %c0_62] : memref<3x4x1x8xf32, #tpu.memory_space<vmem>>, vector<1x1x1x8xf32>
    %71 = vector.shape_cast %70 : vector<1x1x1x8xf32> to vector<1x8xf32>
    %72 = vector.broadcast %71 : vector<1x8xf32> to vector<8x8xf32>
    %73 = arith.addf %69, %72 : vector<8x8xf32>
    %c2 = arith.constant 2 : index
    %c0_63 = arith.constant 0 : index
    %c0_64 = arith.constant 0 : index
    %c0_65 = arith.constant 0 : index
    %74 = vector.load %arg17[%c2, %c0_63, %c0_64, %c0_65] : memref<3x4x32x8xf32, #tpu.memory_space<vmem>>, vector<1x1x32x8xf32>
    %75 = vector.shape_cast %74 : vector<1x1x32x8xf32> to vector<32x8xf32>
    %cst_66 = arith.constant dense<0.000000e+00> : vector<8x8xf32>
    %76 = tpu.matmul %58, %75, %cst_66 {dimension_numbers = #tpu.dot_dimension_numbers<[1], [0], [0], [1], [0, 0, 1, 1], [], []>} : vector<8x32xf32>, vector<32x8xf32>, vector<8x8xf32> -> vector<8x8xf32>
    %c2_67 = arith.constant 2 : index
    %c0_68 = arith.constant 0 : index
    %c0_69 = arith.constant 0 : index
    %c0_70 = arith.constant 0 : index
    %77 = vector.load %arg18[%c2_67, %c0_68, %c0_69, %c0_70] : memref<3x4x1x8xf32, #tpu.memory_space<vmem>>, vector<1x1x1x8xf32>
    %78 = vector.shape_cast %77 : vector<1x1x1x8xf32> to vector<1x8xf32>
    %79 = vector.broadcast %78 : vector<1x8xf32> to vector<8x8xf32>
    %80 = arith.addf %76, %79 : vector<8x8xf32>
    %81 = tpu.transpose %73, [1, 0] : vector<8x8xf32> -> vector<8x8xf32>
    %cst_71 = arith.constant dense<0.000000e+00> : vector<8x8xf32>
    %82 = tpu.matmul %66, %81, %cst_71 {dimension_numbers = #tpu.dot_dimension_numbers<[1], [0], [0], [1], [0, 0, 1, 1], [], []>} : vector<8x8xf32>, vector<8x8xf32>, vector<8x8xf32> -> vector<8x8xf32>
    %cst_72 = arith.constant 0.353553385 : f32
    %83 = vector.broadcast %cst_72 : f32 to vector<8x8xf32>
    %84 = arith.mulf %82, %83 : vector<8x8xf32>
    %85 = vector.broadcast %38 : vector<1x8xf32> to vector<8x8xf32>
    %86 = arith.addf %84, %85 : vector<8x8xf32>
    %cst_73 = arith.constant dense<0xFF800000> : vector<8xf32>
    %87 = vector.multi_reduction <maximumf>, %86, %cst_73 [1] : vector<8x8xf32> to vector<8xf32>
    %88 = vector.shape_cast %87 : vector<8xf32> to vector<8x1xf32>
    %89 = vector.broadcast %88 : vector<8x1xf32> to vector<8x8xf32>
    %90 = arith.subf %86, %89 : vector<8x8xf32>
    %91 = math.exp %90 : vector<8x8xf32>
    %cst_74 = arith.constant dense<0.000000e+00> : vector<8xf32>
    %92 = vector.multi_reduction <add>, %91, %cst_74 [1] : vector<8x8xf32> to vector<8xf32>
    %93 = vector.shape_cast %92 : vector<8xf32> to vector<8x1xf32>
    %94 = vector.broadcast %93 : vector<8x1xf32> to vector<8x8xf32>
    %95 = arith.divf %91, %94 : vector<8x8xf32>
    %cst_75 = arith.constant dense<0.000000e+00> : vector<8x8xf32>
    %96 = tpu.matmul %95, %80, %cst_75 {dimension_numbers = #tpu.dot_dimension_numbers<[1], [0], [0], [1], [0, 0, 1, 1], [], []>} : vector<8x8xf32>, vector<8x8xf32>, vector<8x8xf32> -> vector<8x8xf32>
    %c0_76 = arith.constant 0 : index
    %c0_77 = arith.constant 0 : index
    %c0_78 = arith.constant 0 : index
    %97 = vector.load %arg19[%c0_76, %c0_77, %c0_78] : memref<4x8x32xf32, #tpu.memory_space<vmem>>, vector<1x8x32xf32>
    %98 = vector.shape_cast %97 : vector<1x8x32xf32> to vector<8x32xf32>
    %cst_79 = arith.constant dense<0.000000e+00> : vector<8x32xf32>
    %99 = tpu.matmul %96, %98, %cst_79 {dimension_numbers = #tpu.dot_dimension_numbers<[1], [0], [0], [1], [0, 0, 1, 1], [], []>} : vector<8x8xf32>, vector<8x32xf32>, vector<8x32xf32> -> vector<8x32xf32>
    %100 = vector.broadcast %59 : vector<1x32xf32> to vector<8x32xf32>
    %101 = arith.addf %100, %99 : vector<8x32xf32>
    %c0_80 = arith.constant 0 : index
    %c1_81 = arith.constant 1 : index
    %c0_82 = arith.constant 0 : index
    %c0_83 = arith.constant 0 : index
    %102 = vector.load %arg17[%c0_80, %c1_81, %c0_82, %c0_83] : memref<3x4x32x8xf32, #tpu.memory_space<vmem>>, vector<1x1x32x8xf32>
    %103 = vector.shape_cast %102 : vector<1x1x32x8xf32> to vector<32x8xf32>
    %cst_84 = arith.constant dense<0.000000e+00> : vector<8x8xf32>
    %104 = tpu.matmul %58, %103, %cst_84 {dimension_numbers = #tpu.dot_dimension_numbers<[1], [0], [0], [1], [0, 0, 1, 1], [], []>} : vector<8x32xf32>, vector<32x8xf32>, vector<8x8xf32> -> vector<8x8xf32>
    %c0_85 = arith.constant 0 : index
    %c1_86 = arith.constant 1 : index
    %c0_87 = arith.constant 0 : index
    %c0_88 = arith.constant 0 : index
    %105 = vector.load %arg18[%c0_85, %c1_86, %c0_87, %c0_88] : memref<3x4x1x8xf32, #tpu.memory_space<vmem>>, vector<1x1x1x8xf32>
    %106 = vector.shape_cast %105 : vector<1x1x1x8xf32> to vector<1x8xf32>
    %107 = vector.broadcast %106 : vector<1x8xf32> to vector<8x8xf32>
    %108 = arith.addf %104, %107 : vector<8x8xf32>
    %c1_89 = arith.constant 1 : index
    %c1_90 = arith.constant 1 : index
    %c0_91 = arith.constant 0 : index
    %c0_92 = arith.constant 0 : index
    %109 = vector.load %arg17[%c1_89, %c1_90, %c0_91, %c0_92] : memref<3x4x32x8xf32, #tpu.memory_space<vmem>>, vector<1x1x32x8xf32>
    %110 = vector.shape_cast %109 : vector<1x1x32x8xf32> to vector<32x8xf32>
    %cst_93 = arith.constant dense<0.000000e+00> : vector<8x8xf32>
    %111 = tpu.matmul %58, %110, %cst_93 {dimension_numbers = #tpu.dot_dimension_numbers<[1], [0], [0], [1], [0, 0, 1, 1], [], []>} : vector<8x32xf32>, vector<32x8xf32>, vector<8x8xf32> -> vector<8x8xf32>
    %c1_94 = arith.constant 1 : index
    %c1_95 = arith.constant 1 : index
    %c0_96 = arith.constant 0 : index
    %c0_97 = arith.constant 0 : index
    %112 = vector.load %arg18[%c1_94, %c1_95, %c0_96, %c0_97] : memref<3x4x1x8xf32, #tpu.memory_space<vmem>>, vector<1x1x1x8xf32>
    %113 = vector.shape_cast %112 : vector<1x1x1x8xf32> to vector<1x8xf32>
    %114 = vector.broadcast %113 : vector<1x8xf32> to vector<8x8xf32>
    %115 = arith.addf %111, %114 : vector<8x8xf32>
    %c2_98 = arith.constant 2 : index
    %c1_99 = arith.constant 1 : index
    %c0_100 = arith.constant 0 : index
    %c0_101 = arith.constant 0 : index
    %116 = vector.load %arg17[%c2_98, %c1_99, %c0_100, %c0_101] : memref<3x4x32x8xf32, #tpu.memory_space<vmem>>, vector<1x1x32x8xf32>
    %117 = vector.shape_cast %116 : vector<1x1x32x8xf32> to vector<32x8xf32>
    %cst_102 = arith.constant dense<0.000000e+00> : vector<8x8xf32>
    %118 = tpu.matmul %58, %117, %cst_102 {dimension_numbers = #tpu.dot_dimension_numbers<[1], [0], [0], [1], [0, 0, 1, 1], [], []>} : vector<8x32xf32>, vector<32x8xf32>, vector<8x8xf32> -> vector<8x8xf32>
    %c2_103 = arith.constant 2 : index
    %c1_104 = arith.constant 1 : index
    %c0_105 = arith.constant 0 : index
    %c0_106 = arith.constant 0 : index
    %119 = vector.load %arg18[%c2_103, %c1_104, %c0_105, %c0_106] : memref<3x4x1x8xf32, #tpu.memory_space<vmem>>, vector<1x1x1x8xf32>
    %120 = vector.shape_cast %119 : vector<1x1x1x8xf32> to vector<1x8xf32>
    %121 = vector.broadcast %120 : vector<1x8xf32> to vector<8x8xf32>
    %122 = arith.addf %118, %121 : vector<8x8xf32>
    %123 = tpu.transpose %115, [1, 0] : vector<8x8xf32> -> vector<8x8xf32>
    %cst_107 = arith.constant dense<0.000000e+00> : vector<8x8xf32>
    %124 = tpu.matmul %108, %123, %cst_107 {dimension_numbers = #tpu.dot_dimension_numbers<[1], [0], [0], [1], [0, 0, 1, 1], [], []>} : vector<8x8xf32>, vector<8x8xf32>, vector<8x8xf32> -> vector<8x8xf32>
    %cst_108 = arith.constant 0.353553385 : f32
    %125 = vector.broadcast %cst_108 : f32 to vector<8x8xf32>
    %126 = arith.mulf %124, %125 : vector<8x8xf32>
    %127 = vector.broadcast %38 : vector<1x8xf32> to vector<8x8xf32>
    %128 = arith.addf %126, %127 : vector<8x8xf32>
    %cst_109 = arith.constant dense<0xFF800000> : vector<8xf32>
    %129 = vector.multi_reduction <maximumf>, %128, %cst_109 [1] : vector<8x8xf32> to vector<8xf32>
    %130 = vector.shape_cast %129 : vector<8xf32> to vector<8x1xf32>
    %131 = vector.broadcast %130 : vector<8x1xf32> to vector<8x8xf32>
    %132 = arith.subf %128, %131 : vector<8x8xf32>
    %133 = math.exp %132 : vector<8x8xf32>
    %cst_110 = arith.constant dense<0.000000e+00> : vector<8xf32>
    %134 = vector.multi_reduction <add>, %133, %cst_110 [1] : vector<8x8xf32> to vector<8xf32>
    %135 = vector.shape_cast %134 : vector<8xf32> to vector<8x1xf32>
    %136 = vector.broadcast %135 : vector<8x1xf32> to vector<8x8xf32>
    %137 = arith.divf %133, %136 : vector<8x8xf32>
    %cst_111 = arith.constant dense<0.000000e+00> : vector<8x8xf32>
    %138 = tpu.matmul %137, %122, %cst_111 {dimension_numbers = #tpu.dot_dimension_numbers<[1], [0], [0], [1], [0, 0, 1, 1], [], []>} : vector<8x8xf32>, vector<8x8xf32>, vector<8x8xf32> -> vector<8x8xf32>
    %c1_112 = arith.constant 1 : index
    %c0_113 = arith.constant 0 : index
    %c0_114 = arith.constant 0 : index
    %139 = vector.load %arg19[%c1_112, %c0_113, %c0_114] : memref<4x8x32xf32, #tpu.memory_space<vmem>>, vector<1x8x32xf32>
    %140 = vector.shape_cast %139 : vector<1x8x32xf32> to vector<8x32xf32>
    %cst_115 = arith.constant dense<0.000000e+00> : vector<8x32xf32>
    %141 = tpu.matmul %138, %140, %cst_115 {dimension_numbers = #tpu.dot_dimension_numbers<[1], [0], [0], [1], [0, 0, 1, 1], [], []>} : vector<8x8xf32>, vector<8x32xf32>, vector<8x32xf32> -> vector<8x32xf32>
    %142 = arith.addf %101, %141 : vector<8x32xf32>
    %c0_116 = arith.constant 0 : index
    %c2_117 = arith.constant 2 : index
    %c0_118 = arith.constant 0 : index
    %c0_119 = arith.constant 0 : index
    %143 = vector.load %arg17[%c0_116, %c2_117, %c0_118, %c0_119] : memref<3x4x32x8xf32, #tpu.memory_space<vmem>>, vector<1x1x32x8xf32>
    %144 = vector.shape_cast %143 : vector<1x1x32x8xf32> to vector<32x8xf32>
    %cst_120 = arith.constant dense<0.000000e+00> : vector<8x8xf32>
    %145 = tpu.matmul %58, %144, %cst_120 {dimension_numbers = #tpu.dot_dimension_numbers<[1], [0], [0], [1], [0, 0, 1, 1], [], []>} : vector<8x32xf32>, vector<32x8xf32>, vector<8x8xf32> -> vector<8x8xf32>
    %c0_121 = arith.constant 0 : index
    %c2_122 = arith.constant 2 : index
    %c0_123 = arith.constant 0 : index
    %c0_124 = arith.constant 0 : index
    %146 = vector.load %arg18[%c0_121, %c2_122, %c0_123, %c0_124] : memref<3x4x1x8xf32, #tpu.memory_space<vmem>>, vector<1x1x1x8xf32>
    %147 = vector.shape_cast %146 : vector<1x1x1x8xf32> to vector<1x8xf32>
    %148 = vector.broadcast %147 : vector<1x8xf32> to vector<8x8xf32>
    %149 = arith.addf %145, %148 : vector<8x8xf32>
    %c1_125 = arith.constant 1 : index
    %c2_126 = arith.constant 2 : index
    %c0_127 = arith.constant 0 : index
    %c0_128 = arith.constant 0 : index
    %150 = vector.load %arg17[%c1_125, %c2_126, %c0_127, %c0_128] : memref<3x4x32x8xf32, #tpu.memory_space<vmem>>, vector<1x1x32x8xf32>
    %151 = vector.shape_cast %150 : vector<1x1x32x8xf32> to vector<32x8xf32>
    %cst_129 = arith.constant dense<0.000000e+00> : vector<8x8xf32>
    %152 = tpu.matmul %58, %151, %cst_129 {dimension_numbers = #tpu.dot_dimension_numbers<[1], [0], [0], [1], [0, 0, 1, 1], [], []>} : vector<8x32xf32>, vector<32x8xf32>, vector<8x8xf32> -> vector<8x8xf32>
    %c1_130 = arith.constant 1 : index
    %c2_131 = arith.constant 2 : index
    %c0_132 = arith.constant 0 : index
    %c0_133 = arith.constant 0 : index
    %153 = vector.load %arg18[%c1_130, %c2_131, %c0_132, %c0_133] : memref<3x4x1x8xf32, #tpu.memory_space<vmem>>, vector<1x1x1x8xf32>
    %154 = vector.shape_cast %153 : vector<1x1x1x8xf32> to vector<1x8xf32>
    %155 = vector.broadcast %154 : vector<1x8xf32> to vector<8x8xf32>
    %156 = arith.addf %152, %155 : vector<8x8xf32>
    %c2_134 = arith.constant 2 : index
    %c2_135 = arith.constant 2 : index
    %c0_136 = arith.constant 0 : index
    %c0_137 = arith.constant 0 : index
    %157 = vector.load %arg17[%c2_134, %c2_135, %c0_136, %c0_137] : memref<3x4x32x8xf32, #tpu.memory_space<vmem>>, vector<1x1x32x8xf32>
    %158 = vector.shape_cast %157 : vector<1x1x32x8xf32> to vector<32x8xf32>
    %cst_138 = arith.constant dense<0.000000e+00> : vector<8x8xf32>
    %159 = tpu.matmul %58, %158, %cst_138 {dimension_numbers = #tpu.dot_dimension_numbers<[1], [0], [0], [1], [0, 0, 1, 1], [], []>} : vector<8x32xf32>, vector<32x8xf32>, vector<8x8xf32> -> vector<8x8xf32>
    %c2_139 = arith.constant 2 : index
    %c2_140 = arith.constant 2 : index
    %c0_141 = arith.constant 0 : index
    %c0_142 = arith.constant 0 : index
    %160 = vector.load %arg18[%c2_139, %c2_140, %c0_141, %c0_142] : memref<3x4x1x8xf32, #tpu.memory_space<vmem>>, vector<1x1x1x8xf32>
    %161 = vector.shape_cast %160 : vector<1x1x1x8xf32> to vector<1x8xf32>
    %162 = vector.broadcast %161 : vector<1x8xf32> to vector<8x8xf32>
    %163 = arith.addf %159, %162 : vector<8x8xf32>
    %164 = tpu.transpose %156, [1, 0] : vector<8x8xf32> -> vector<8x8xf32>
    %cst_143 = arith.constant dense<0.000000e+00> : vector<8x8xf32>
    %165 = tpu.matmul %149, %164, %cst_143 {dimension_numbers = #tpu.dot_dimension_numbers<[1], [0], [0], [1], [0, 0, 1, 1], [], []>} : vector<8x8xf32>, vector<8x8xf32>, vector<8x8xf32> -> vector<8x8xf32>
    %cst_144 = arith.constant 0.353553385 : f32
    %166 = vector.broadcast %cst_144 : f32 to vector<8x8xf32>
    %167 = arith.mulf %165, %166 : vector<8x8xf32>
    %168 = vector.broadcast %38 : vector<1x8xf32> to vector<8x8xf32>
    %169 = arith.addf %167, %168 : vector<8x8xf32>
    %cst_145 = arith.constant dense<0xFF800000> : vector<8xf32>
    %170 = vector.multi_reduction <maximumf>, %169, %cst_145 [1] : vector<8x8xf32> to vector<8xf32>
    %171 = vector.shape_cast %170 : vector<8xf32> to vector<8x1xf32>
    %172 = vector.broadcast %171 : vector<8x1xf32> to vector<8x8xf32>
    %173 = arith.subf %169, %172 : vector<8x8xf32>
    %174 = math.exp %173 : vector<8x8xf32>
    %cst_146 = arith.constant dense<0.000000e+00> : vector<8xf32>
    %175 = vector.multi_reduction <add>, %174, %cst_146 [1] : vector<8x8xf32> to vector<8xf32>
    %176 = vector.shape_cast %175 : vector<8xf32> to vector<8x1xf32>
    %177 = vector.broadcast %176 : vector<8x1xf32> to vector<8x8xf32>
    %178 = arith.divf %174, %177 : vector<8x8xf32>
    %cst_147 = arith.constant dense<0.000000e+00> : vector<8x8xf32>
    %179 = tpu.matmul %178, %163, %cst_147 {dimension_numbers = #tpu.dot_dimension_numbers<[1], [0], [0], [1], [0, 0, 1, 1], [], []>} : vector<8x8xf32>, vector<8x8xf32>, vector<8x8xf32> -> vector<8x8xf32>
    %c2_148 = arith.constant 2 : index
    %c0_149 = arith.constant 0 : index
    %c0_150 = arith.constant 0 : index
    %180 = vector.load %arg19[%c2_148, %c0_149, %c0_150] : memref<4x8x32xf32, #tpu.memory_space<vmem>>, vector<1x8x32xf32>
    %181 = vector.shape_cast %180 : vector<1x8x32xf32> to vector<8x32xf32>
    %cst_151 = arith.constant dense<0.000000e+00> : vector<8x32xf32>
    %182 = tpu.matmul %179, %181, %cst_151 {dimension_numbers = #tpu.dot_dimension_numbers<[1], [0], [0], [1], [0, 0, 1, 1], [], []>} : vector<8x8xf32>, vector<8x32xf32>, vector<8x32xf32> -> vector<8x32xf32>
    %183 = arith.addf %142, %182 : vector<8x32xf32>
    %c0_152 = arith.constant 0 : index
    %c3 = arith.constant 3 : index
    %c0_153 = arith.constant 0 : index
    %c0_154 = arith.constant 0 : index
    %184 = vector.load %arg17[%c0_152, %c3, %c0_153, %c0_154] : memref<3x4x32x8xf32, #tpu.memory_space<vmem>>, vector<1x1x32x8xf32>
    %185 = vector.shape_cast %184 : vector<1x1x32x8xf32> to vector<32x8xf32>
    %cst_155 = arith.constant dense<0.000000e+00> : vector<8x8xf32>
    %186 = tpu.matmul %58, %185, %cst_155 {dimension_numbers = #tpu.dot_dimension_numbers<[1], [0], [0], [1], [0, 0, 1, 1], [], []>} : vector<8x32xf32>, vector<32x8xf32>, vector<8x8xf32> -> vector<8x8xf32>
    %c0_156 = arith.constant 0 : index
    %c3_157 = arith.constant 3 : index
    %c0_158 = arith.constant 0 : index
    %c0_159 = arith.constant 0 : index
    %187 = vector.load %arg18[%c0_156, %c3_157, %c0_158, %c0_159] : memref<3x4x1x8xf32, #tpu.memory_space<vmem>>, vector<1x1x1x8xf32>
    %188 = vector.shape_cast %187 : vector<1x1x1x8xf32> to vector<1x8xf32>
    %189 = vector.broadcast %188 : vector<1x8xf32> to vector<8x8xf32>
    %190 = arith.addf %186, %189 : vector<8x8xf32>
    %c1_160 = arith.constant 1 : index
    %c3_161 = arith.constant 3 : index
    %c0_162 = arith.constant 0 : index
    %c0_163 = arith.constant 0 : index
    %191 = vector.load %arg17[%c1_160, %c3_161, %c0_162, %c0_163] : memref<3x4x32x8xf32, #tpu.memory_space<vmem>>, vector<1x1x32x8xf32>
    %192 = vector.shape_cast %191 : vector<1x1x32x8xf32> to vector<32x8xf32>
    %cst_164 = arith.constant dense<0.000000e+00> : vector<8x8xf32>
    %193 = tpu.matmul %58, %192, %cst_164 {dimension_numbers = #tpu.dot_dimension_numbers<[1], [0], [0], [1], [0, 0, 1, 1], [], []>} : vector<8x32xf32>, vector<32x8xf32>, vector<8x8xf32> -> vector<8x8xf32>
    %c1_165 = arith.constant 1 : index
    %c3_166 = arith.constant 3 : index
    %c0_167 = arith.constant 0 : index
    %c0_168 = arith.constant 0 : index
    %194 = vector.load %arg18[%c1_165, %c3_166, %c0_167, %c0_168] : memref<3x4x1x8xf32, #tpu.memory_space<vmem>>, vector<1x1x1x8xf32>
    %195 = vector.shape_cast %194 : vector<1x1x1x8xf32> to vector<1x8xf32>
    %196 = vector.broadcast %195 : vector<1x8xf32> to vector<8x8xf32>
    %197 = arith.addf %193, %196 : vector<8x8xf32>
    %c2_169 = arith.constant 2 : index
    %c3_170 = arith.constant 3 : index
    %c0_171 = arith.constant 0 : index
    %c0_172 = arith.constant 0 : index
    %198 = vector.load %arg17[%c2_169, %c3_170, %c0_171, %c0_172] : memref<3x4x32x8xf32, #tpu.memory_space<vmem>>, vector<1x1x32x8xf32>
    %199 = vector.shape_cast %198 : vector<1x1x32x8xf32> to vector<32x8xf32>
    %cst_173 = arith.constant dense<0.000000e+00> : vector<8x8xf32>
    %200 = tpu.matmul %58, %199, %cst_173 {dimension_numbers = #tpu.dot_dimension_numbers<[1], [0], [0], [1], [0, 0, 1, 1], [], []>} : vector<8x32xf32>, vector<32x8xf32>, vector<8x8xf32> -> vector<8x8xf32>
    %c2_174 = arith.constant 2 : index
    %c3_175 = arith.constant 3 : index
    %c0_176 = arith.constant 0 : index
    %c0_177 = arith.constant 0 : index
    %201 = vector.load %arg18[%c2_174, %c3_175, %c0_176, %c0_177] : memref<3x4x1x8xf32, #tpu.memory_space<vmem>>, vector<1x1x1x8xf32>
    %202 = vector.shape_cast %201 : vector<1x1x1x8xf32> to vector<1x8xf32>
    %203 = vector.broadcast %202 : vector<1x8xf32> to vector<8x8xf32>
    %204 = arith.addf %200, %203 : vector<8x8xf32>
    %205 = tpu.transpose %197, [1, 0] : vector<8x8xf32> -> vector<8x8xf32>
    %cst_178 = arith.constant dense<0.000000e+00> : vector<8x8xf32>
    %206 = tpu.matmul %190, %205, %cst_178 {dimension_numbers = #tpu.dot_dimension_numbers<[1], [0], [0], [1], [0, 0, 1, 1], [], []>} : vector<8x8xf32>, vector<8x8xf32>, vector<8x8xf32> -> vector<8x8xf32>
    %cst_179 = arith.constant 0.353553385 : f32
    %207 = vector.broadcast %cst_179 : f32 to vector<8x8xf32>
    %208 = arith.mulf %206, %207 : vector<8x8xf32>
    %209 = vector.broadcast %38 : vector<1x8xf32> to vector<8x8xf32>
    %210 = arith.addf %208, %209 : vector<8x8xf32>
    %cst_180 = arith.constant dense<0xFF800000> : vector<8xf32>
    %211 = vector.multi_reduction <maximumf>, %210, %cst_180 [1] : vector<8x8xf32> to vector<8xf32>
    %212 = vector.shape_cast %211 : vector<8xf32> to vector<8x1xf32>
    %213 = vector.broadcast %212 : vector<8x1xf32> to vector<8x8xf32>
    %214 = arith.subf %210, %213 : vector<8x8xf32>
    %215 = math.exp %214 : vector<8x8xf32>
    %cst_181 = arith.constant dense<0.000000e+00> : vector<8xf32>
    %216 = vector.multi_reduction <add>, %215, %cst_181 [1] : vector<8x8xf32> to vector<8xf32>
    %217 = vector.shape_cast %216 : vector<8xf32> to vector<8x1xf32>
    %218 = vector.broadcast %217 : vector<8x1xf32> to vector<8x8xf32>
    %219 = arith.divf %215, %218 : vector<8x8xf32>
    %cst_182 = arith.constant dense<0.000000e+00> : vector<8x8xf32>
    %220 = tpu.matmul %219, %204, %cst_182 {dimension_numbers = #tpu.dot_dimension_numbers<[1], [0], [0], [1], [0, 0, 1, 1], [], []>} : vector<8x8xf32>, vector<8x8xf32>, vector<8x8xf32> -> vector<8x8xf32>
    %c3_183 = arith.constant 3 : index
    %c0_184 = arith.constant 0 : index
    %c0_185 = arith.constant 0 : index
    %221 = vector.load %arg19[%c3_183, %c0_184, %c0_185] : memref<4x8x32xf32, #tpu.memory_space<vmem>>, vector<1x8x32xf32>
    %222 = vector.shape_cast %221 : vector<1x8x32xf32> to vector<8x32xf32>
    %cst_186 = arith.constant dense<0.000000e+00> : vector<8x32xf32>
    %223 = tpu.matmul %220, %222, %cst_186 {dimension_numbers = #tpu.dot_dimension_numbers<[1], [0], [0], [1], [0, 0, 1, 1], [], []>} : vector<8x8xf32>, vector<8x32xf32>, vector<8x32xf32> -> vector<8x32xf32>
    %224 = arith.addf %183, %223 : vector<8x32xf32>
    %225 = arith.addf %31, %224 : vector<8x32xf32>
    %c1_187 = arith.constant 1 : index
    %c0_188 = arith.constant 0 : index
    %c0_189 = arith.constant 0 : index
    %226 = vector.load %arg16[%c1_187, %c0_188, %c0_189] : memref<7x1x32xf32, #tpu.memory_space<vmem>>, vector<1x1x32xf32>
    %227 = vector.shape_cast %226 : vector<1x1x32xf32> to vector<1x32xf32>
    %228 = arith.mulf %225, %225 : vector<8x32xf32>
    %cst_190 = arith.constant dense<0.000000e+00> : vector<8xf32>
    %229 = vector.multi_reduction <add>, %228, %cst_190 [1] : vector<8x32xf32> to vector<8xf32>
    %230 = vector.shape_cast %229 : vector<8xf32> to vector<8x1xf32>
    %cst_191 = arith.constant 3.200000e+01 : f32
    %231 = vector.broadcast %cst_191 : f32 to vector<8x1xf32>
    %232 = arith.divf %230, %231 : vector<8x1xf32>
    %cst_192 = arith.constant 9.99999997E-7 : f32
    %233 = vector.broadcast %cst_192 : f32 to vector<8x1xf32>
    %234 = arith.addf %232, %233 : vector<8x1xf32>
    %235 = math.rsqrt %234 : vector<8x1xf32>
    %236 = vector.broadcast %235 : vector<8x1xf32> to vector<8x32xf32>
    %237 = arith.mulf %225, %236 : vector<8x32xf32>
    %238 = vector.broadcast %227 : vector<1x32xf32> to vector<8x32xf32>
    %239 = arith.mulf %237, %238 : vector<8x32xf32>
    %c0_193 = arith.constant 0 : index
    %c0_194 = arith.constant 0 : index
    %240 = vector.load %arg21[%c0_193, %c0_194] : memref<32x64xf32, #tpu.memory_space<vmem>>, vector<32x64xf32>
    %cst_195 = arith.constant dense<0.000000e+00> : vector<8x64xf32>
    %241 = tpu.matmul %239, %240, %cst_195 {dimension_numbers = #tpu.dot_dimension_numbers<[1], [0], [0], [1], [0, 0, 1, 1], [], []>} : vector<8x32xf32>, vector<32x64xf32>, vector<8x64xf32> -> vector<8x64xf32>
    %c0_196 = arith.constant 0 : index
    %c0_197 = arith.constant 0 : index
    %242 = vector.load %arg22[%c0_196, %c0_197] : memref<1x64xf32, #tpu.memory_space<vmem>>, vector<1x64xf32>
    %243 = vector.broadcast %242 : vector<1x64xf32> to vector<8x64xf32>
    %244 = arith.addf %241, %243 : vector<8x64xf32>
    %cst_198 = arith.constant 0.000000e+00 : f32
    %245 = vector.broadcast %cst_198 : f32 to vector<8x64xf32>
    %246 = arith.maximumf %244, %245 : vector<8x64xf32>
    %c0_199 = arith.constant 0 : index
    %c0_200 = arith.constant 0 : index
    %247 = vector.load %arg23[%c0_199, %c0_200] : memref<64x32xf32, #tpu.memory_space<vmem>>, vector<64x32xf32>
    %cst_201 = arith.constant dense<0.000000e+00> : vector<8x32xf32>
    %248 = tpu.matmul %246, %247, %cst_201 {dimension_numbers = #tpu.dot_dimension_numbers<[1], [0], [0], [1], [0, 0, 1, 1], [], []>} : vector<8x64xf32>, vector<64x32xf32>, vector<8x32xf32> -> vector<8x32xf32>
    %249 = arith.addf %225, %248 : vector<8x32xf32>
    %c0_202 = arith.constant 0 : index
    %c0_203 = arith.constant 0 : index
    %250 = vector.load %arg24[%c0_202, %c0_203] : memref<1x32xf32, #tpu.memory_space<vmem>>, vector<1x32xf32>
    %251 = vector.broadcast %250 : vector<1x32xf32> to vector<8x32xf32>
    %252 = arith.addf %249, %251 : vector<8x32xf32>
    %253 = arith.mulf %252, %252 : vector<8x32xf32>
    %cst_204 = arith.constant dense<0.000000e+00> : vector<8xf32>
    %254 = vector.multi_reduction <add>, %253, %cst_204 [1] : vector<8x32xf32> to vector<8xf32>
    %255 = vector.shape_cast %254 : vector<8xf32> to vector<8x1xf32>
    %cst_205 = arith.constant 3.200000e+01 : f32
    %256 = vector.broadcast %cst_205 : f32 to vector<8x1xf32>
    %257 = arith.divf %255, %256 : vector<8x1xf32>
    %cst_206 = arith.constant 9.99999997E-7 : f32
    %258 = vector.broadcast %cst_206 : f32 to vector<8x1xf32>
    %259 = arith.addf %257, %258 : vector<8x1xf32>
    %260 = math.rsqrt %259 : vector<8x1xf32>
    %261 = vector.broadcast %260 : vector<8x1xf32> to vector<8x32xf32>
    %262 = arith.mulf %252, %261 : vector<8x32xf32>
    %c2_207 = arith.constant 2 : index
    %c0_208 = arith.constant 0 : index
    %c0_209 = arith.constant 0 : index
    %263 = vector.load %arg16[%c2_207, %c0_208, %c0_209] : memref<7x1x32xf32, #tpu.memory_space<vmem>>, vector<1x1x32xf32>
    %264 = vector.shape_cast %263 : vector<1x1x32xf32> to vector<1x32xf32>
    %265 = vector.broadcast %264 : vector<1x32xf32> to vector<8x32xf32>
    %266 = arith.mulf %262, %265 : vector<8x32xf32>
    %267 = tpu.iota {dimensions = array<i32: 1>} : vector<8x64xi32>
    %c0_210 = arith.constant 0 : index
    %c0_211 = arith.constant 0 : index
    %c0_212 = arith.constant 0 : index
    %268 = vector.load %arg4[%c0_210, %c0_211, %c0_212] : memref<1x8x1xi32, #tpu.memory_space<vmem>>, vector<1x8x1xi32>
    %269 = vector.shape_cast %268 : vector<1x8x1xi32> to vector<8x1xi32>
    %270 = vector.broadcast %269 : vector<8x1xi32> to vector<8x64xi32>
    %271 = arith.cmpi eq, %267, %270 : vector<8x64xi32>
    %272 = arith.extui %271 : vector<8x64xi1> to vector<8x64xi32>
    %273 = arith.sitofp %272 : vector<8x64xi32> to vector<8x64xf32>
    %c0_213 = arith.constant 0 : index
    %c0_214 = arith.constant 0 : index
    %274 = vector.load %arg25[%c0_213, %c0_214] : memref<64x32xf32, #tpu.memory_space<vmem>>, vector<64x32xf32>
    %cst_215 = arith.constant dense<0.000000e+00> : vector<8x32xf32>
    %275 = tpu.matmul %273, %274, %cst_215 {dimension_numbers = #tpu.dot_dimension_numbers<[1], [0], [0], [1], [0, 0, 1, 1], [], []>} : vector<8x64xf32>, vector<64x32xf32>, vector<8x32xf32> -> vector<8x32xf32>
    %276 = arith.mulf %275, %275 : vector<8x32xf32>
    %cst_216 = arith.constant dense<0.000000e+00> : vector<8xf32>
    %277 = vector.multi_reduction <add>, %276, %cst_216 [1] : vector<8x32xf32> to vector<8xf32>
    %278 = vector.shape_cast %277 : vector<8xf32> to vector<8x1xf32>
    %cst_217 = arith.constant 3.200000e+01 : f32
    %279 = vector.broadcast %cst_217 : f32 to vector<8x1xf32>
    %280 = arith.divf %278, %279 : vector<8x1xf32>
    %cst_218 = arith.constant 9.99999997E-7 : f32
    %281 = vector.broadcast %cst_218 : f32 to vector<8x1xf32>
    %282 = arith.addf %280, %281 : vector<8x1xf32>
    %283 = math.rsqrt %282 : vector<8x1xf32>
    %284 = vector.broadcast %283 : vector<8x1xf32> to vector<8x32xf32>
    %285 = arith.mulf %275, %284 : vector<8x32xf32>
    %c3_219 = arith.constant 3 : index
    %c0_220 = arith.constant 0 : index
    %c0_221 = arith.constant 0 : index
    %286 = vector.load %arg16[%c3_219, %c0_220, %c0_221] : memref<7x1x32xf32, #tpu.memory_space<vmem>>, vector<1x1x32xf32>
    %287 = vector.shape_cast %286 : vector<1x1x32xf32> to vector<1x32xf32>
    %288 = vector.broadcast %287 : vector<1x32xf32> to vector<8x32xf32>
    %289 = arith.mulf %285, %288 : vector<8x32xf32>
    %c0_222 = arith.constant 0 : index
    %c0_223 = arith.constant 0 : index
    %290 = vector.load %arg29[%c0_222, %c0_223] : memref<1x32xf32, #tpu.memory_space<vmem>>, vector<1x32xf32>
    %c0_224 = arith.constant 0 : index
    %c0_225 = arith.constant 0 : index
    %c0_226 = arith.constant 0 : index
    %c0_227 = arith.constant 0 : index
    %291 = vector.load %arg26[%c0_224, %c0_225, %c0_226, %c0_227] : memref<3x4x32x8xf32, #tpu.memory_space<vmem>>, vector<1x1x32x8xf32>
    %292 = vector.shape_cast %291 : vector<1x1x32x8xf32> to vector<32x8xf32>
    %cst_228 = arith.constant dense<0.000000e+00> : vector<8x8xf32>
    %293 = tpu.matmul %289, %292, %cst_228 {dimension_numbers = #tpu.dot_dimension_numbers<[1], [0], [0], [1], [0, 0, 1, 1], [], []>} : vector<8x32xf32>, vector<32x8xf32>, vector<8x8xf32> -> vector<8x8xf32>
    %c0_229 = arith.constant 0 : index
    %c0_230 = arith.constant 0 : index
    %c0_231 = arith.constant 0 : index
    %c0_232 = arith.constant 0 : index
    %294 = vector.load %arg27[%c0_229, %c0_230, %c0_231, %c0_232] : memref<3x4x1x8xf32, #tpu.memory_space<vmem>>, vector<1x1x1x8xf32>
    %295 = vector.shape_cast %294 : vector<1x1x1x8xf32> to vector<1x8xf32>
    %296 = vector.broadcast %295 : vector<1x8xf32> to vector<8x8xf32>
    %297 = arith.addf %293, %296 : vector<8x8xf32>
    %c1_233 = arith.constant 1 : index
    %c0_234 = arith.constant 0 : index
    %c0_235 = arith.constant 0 : index
    %c0_236 = arith.constant 0 : index
    %298 = vector.load %arg26[%c1_233, %c0_234, %c0_235, %c0_236] : memref<3x4x32x8xf32, #tpu.memory_space<vmem>>, vector<1x1x32x8xf32>
    %299 = vector.shape_cast %298 : vector<1x1x32x8xf32> to vector<32x8xf32>
    %cst_237 = arith.constant dense<0.000000e+00> : vector<8x8xf32>
    %300 = tpu.matmul %289, %299, %cst_237 {dimension_numbers = #tpu.dot_dimension_numbers<[1], [0], [0], [1], [0, 0, 1, 1], [], []>} : vector<8x32xf32>, vector<32x8xf32>, vector<8x8xf32> -> vector<8x8xf32>
    %c1_238 = arith.constant 1 : index
    %c0_239 = arith.constant 0 : index
    %c0_240 = arith.constant 0 : index
    %c0_241 = arith.constant 0 : index
    %301 = vector.load %arg27[%c1_238, %c0_239, %c0_240, %c0_241] : memref<3x4x1x8xf32, #tpu.memory_space<vmem>>, vector<1x1x1x8xf32>
    %302 = vector.shape_cast %301 : vector<1x1x1x8xf32> to vector<1x8xf32>
    %303 = vector.broadcast %302 : vector<1x8xf32> to vector<8x8xf32>
    %304 = arith.addf %300, %303 : vector<8x8xf32>
    %c2_242 = arith.constant 2 : index
    %c0_243 = arith.constant 0 : index
    %c0_244 = arith.constant 0 : index
    %c0_245 = arith.constant 0 : index
    %305 = vector.load %arg26[%c2_242, %c0_243, %c0_244, %c0_245] : memref<3x4x32x8xf32, #tpu.memory_space<vmem>>, vector<1x1x32x8xf32>
    %306 = vector.shape_cast %305 : vector<1x1x32x8xf32> to vector<32x8xf32>
    %cst_246 = arith.constant dense<0.000000e+00> : vector<8x8xf32>
    %307 = tpu.matmul %289, %306, %cst_246 {dimension_numbers = #tpu.dot_dimension_numbers<[1], [0], [0], [1], [0, 0, 1, 1], [], []>} : vector<8x32xf32>, vector<32x8xf32>, vector<8x8xf32> -> vector<8x8xf32>
    %c2_247 = arith.constant 2 : index
    %c0_248 = arith.constant 0 : index
    %c0_249 = arith.constant 0 : index
    %c0_250 = arith.constant 0 : index
    %308 = vector.load %arg27[%c2_247, %c0_248, %c0_249, %c0_250] : memref<3x4x1x8xf32, #tpu.memory_space<vmem>>, vector<1x1x1x8xf32>
    %309 = vector.shape_cast %308 : vector<1x1x1x8xf32> to vector<1x8xf32>
    %310 = vector.broadcast %309 : vector<1x8xf32> to vector<8x8xf32>
    %311 = arith.addf %307, %310 : vector<8x8xf32>
    %312 = tpu.transpose %304, [1, 0] : vector<8x8xf32> -> vector<8x8xf32>
    %cst_251 = arith.constant dense<0.000000e+00> : vector<8x8xf32>
    %313 = tpu.matmul %297, %312, %cst_251 {dimension_numbers = #tpu.dot_dimension_numbers<[1], [0], [0], [1], [0, 0, 1, 1], [], []>} : vector<8x8xf32>, vector<8x8xf32>, vector<8x8xf32> -> vector<8x8xf32>
    %cst_252 = arith.constant 0.353553385 : f32
    %314 = vector.broadcast %cst_252 : f32 to vector<8x8xf32>
    %315 = arith.mulf %313, %314 : vector<8x8xf32>
    %316 = arith.addf %315, %44 : vector<8x8xf32>
    %cst_253 = arith.constant dense<0xFF800000> : vector<8xf32>
    %317 = vector.multi_reduction <maximumf>, %316, %cst_253 [1] : vector<8x8xf32> to vector<8xf32>
    %318 = vector.shape_cast %317 : vector<8xf32> to vector<8x1xf32>
    %319 = vector.broadcast %318 : vector<8x1xf32> to vector<8x8xf32>
    %320 = arith.subf %316, %319 : vector<8x8xf32>
    %321 = math.exp %320 : vector<8x8xf32>
    %cst_254 = arith.constant dense<0.000000e+00> : vector<8xf32>
    %322 = vector.multi_reduction <add>, %321, %cst_254 [1] : vector<8x8xf32> to vector<8xf32>
    %323 = vector.shape_cast %322 : vector<8xf32> to vector<8x1xf32>
    %324 = vector.broadcast %323 : vector<8x1xf32> to vector<8x8xf32>
    %325 = arith.divf %321, %324 : vector<8x8xf32>
    %cst_255 = arith.constant dense<0.000000e+00> : vector<8x8xf32>
    %326 = tpu.matmul %325, %311, %cst_255 {dimension_numbers = #tpu.dot_dimension_numbers<[1], [0], [0], [1], [0, 0, 1, 1], [], []>} : vector<8x8xf32>, vector<8x8xf32>, vector<8x8xf32> -> vector<8x8xf32>
    %c0_256 = arith.constant 0 : index
    %c0_257 = arith.constant 0 : index
    %c0_258 = arith.constant 0 : index
    %327 = vector.load %arg28[%c0_256, %c0_257, %c0_258] : memref<4x8x32xf32, #tpu.memory_space<vmem>>, vector<1x8x32xf32>
    %328 = vector.shape_cast %327 : vector<1x8x32xf32> to vector<8x32xf32>
    %cst_259 = arith.constant dense<0.000000e+00> : vector<8x32xf32>
    %329 = tpu.matmul %326, %328, %cst_259 {dimension_numbers = #tpu.dot_dimension_numbers<[1], [0], [0], [1], [0, 0, 1, 1], [], []>} : vector<8x8xf32>, vector<8x32xf32>, vector<8x32xf32> -> vector<8x32xf32>
    %330 = vector.broadcast %290 : vector<1x32xf32> to vector<8x32xf32>
    %331 = arith.addf %330, %329 : vector<8x32xf32>
    %c0_260 = arith.constant 0 : index
    %c1_261 = arith.constant 1 : index
    %c0_262 = arith.constant 0 : index
    %c0_263 = arith.constant 0 : index
    %332 = vector.load %arg26[%c0_260, %c1_261, %c0_262, %c0_263] : memref<3x4x32x8xf32, #tpu.memory_space<vmem>>, vector<1x1x32x8xf32>
    %333 = vector.shape_cast %332 : vector<1x1x32x8xf32> to vector<32x8xf32>
    %cst_264 = arith.constant dense<0.000000e+00> : vector<8x8xf32>
    %334 = tpu.matmul %289, %333, %cst_264 {dimension_numbers = #tpu.dot_dimension_numbers<[1], [0], [0], [1], [0, 0, 1, 1], [], []>} : vector<8x32xf32>, vector<32x8xf32>, vector<8x8xf32> -> vector<8x8xf32>
    %c0_265 = arith.constant 0 : index
    %c1_266 = arith.constant 1 : index
    %c0_267 = arith.constant 0 : index
    %c0_268 = arith.constant 0 : index
    %335 = vector.load %arg27[%c0_265, %c1_266, %c0_267, %c0_268] : memref<3x4x1x8xf32, #tpu.memory_space<vmem>>, vector<1x1x1x8xf32>
    %336 = vector.shape_cast %335 : vector<1x1x1x8xf32> to vector<1x8xf32>
    %337 = vector.broadcast %336 : vector<1x8xf32> to vector<8x8xf32>
    %338 = arith.addf %334, %337 : vector<8x8xf32>
    %c1_269 = arith.constant 1 : index
    %c1_270 = arith.constant 1 : index
    %c0_271 = arith.constant 0 : index
    %c0_272 = arith.constant 0 : index
    %339 = vector.load %arg26[%c1_269, %c1_270, %c0_271, %c0_272] : memref<3x4x32x8xf32, #tpu.memory_space<vmem>>, vector<1x1x32x8xf32>
    %340 = vector.shape_cast %339 : vector<1x1x32x8xf32> to vector<32x8xf32>
    %cst_273 = arith.constant dense<0.000000e+00> : vector<8x8xf32>
    %341 = tpu.matmul %289, %340, %cst_273 {dimension_numbers = #tpu.dot_dimension_numbers<[1], [0], [0], [1], [0, 0, 1, 1], [], []>} : vector<8x32xf32>, vector<32x8xf32>, vector<8x8xf32> -> vector<8x8xf32>
    %c1_274 = arith.constant 1 : index
    %c1_275 = arith.constant 1 : index
    %c0_276 = arith.constant 0 : index
    %c0_277 = arith.constant 0 : index
    %342 = vector.load %arg27[%c1_274, %c1_275, %c0_276, %c0_277] : memref<3x4x1x8xf32, #tpu.memory_space<vmem>>, vector<1x1x1x8xf32>
    %343 = vector.shape_cast %342 : vector<1x1x1x8xf32> to vector<1x8xf32>
    %344 = vector.broadcast %343 : vector<1x8xf32> to vector<8x8xf32>
    %345 = arith.addf %341, %344 : vector<8x8xf32>
    %c2_278 = arith.constant 2 : index
    %c1_279 = arith.constant 1 : index
    %c0_280 = arith.constant 0 : index
    %c0_281 = arith.constant 0 : index
    %346 = vector.load %arg26[%c2_278, %c1_279, %c0_280, %c0_281] : memref<3x4x32x8xf32, #tpu.memory_space<vmem>>, vector<1x1x32x8xf32>
    %347 = vector.shape_cast %346 : vector<1x1x32x8xf32> to vector<32x8xf32>
    %cst_282 = arith.constant dense<0.000000e+00> : vector<8x8xf32>
    %348 = tpu.matmul %289, %347, %cst_282 {dimension_numbers = #tpu.dot_dimension_numbers<[1], [0], [0], [1], [0, 0, 1, 1], [], []>} : vector<8x32xf32>, vector<32x8xf32>, vector<8x8xf32> -> vector<8x8xf32>
    %c2_283 = arith.constant 2 : index
    %c1_284 = arith.constant 1 : index
    %c0_285 = arith.constant 0 : index
    %c0_286 = arith.constant 0 : index
    %349 = vector.load %arg27[%c2_283, %c1_284, %c0_285, %c0_286] : memref<3x4x1x8xf32, #tpu.memory_space<vmem>>, vector<1x1x1x8xf32>
    %350 = vector.shape_cast %349 : vector<1x1x1x8xf32> to vector<1x8xf32>
    %351 = vector.broadcast %350 : vector<1x8xf32> to vector<8x8xf32>
    %352 = arith.addf %348, %351 : vector<8x8xf32>
    %353 = tpu.transpose %345, [1, 0] : vector<8x8xf32> -> vector<8x8xf32>
    %cst_287 = arith.constant dense<0.000000e+00> : vector<8x8xf32>
    %354 = tpu.matmul %338, %353, %cst_287 {dimension_numbers = #tpu.dot_dimension_numbers<[1], [0], [0], [1], [0, 0, 1, 1], [], []>} : vector<8x8xf32>, vector<8x8xf32>, vector<8x8xf32> -> vector<8x8xf32>
    %cst_288 = arith.constant 0.353553385 : f32
    %355 = vector.broadcast %cst_288 : f32 to vector<8x8xf32>
    %356 = arith.mulf %354, %355 : vector<8x8xf32>
    %357 = arith.addf %356, %44 : vector<8x8xf32>
    %cst_289 = arith.constant dense<0xFF800000> : vector<8xf32>
    %358 = vector.multi_reduction <maximumf>, %357, %cst_289 [1] : vector<8x8xf32> to vector<8xf32>
    %359 = vector.shape_cast %358 : vector<8xf32> to vector<8x1xf32>
    %360 = vector.broadcast %359 : vector<8x1xf32> to vector<8x8xf32>
    %361 = arith.subf %357, %360 : vector<8x8xf32>
    %362 = math.exp %361 : vector<8x8xf32>
    %cst_290 = arith.constant dense<0.000000e+00> : vector<8xf32>
    %363 = vector.multi_reduction <add>, %362, %cst_290 [1] : vector<8x8xf32> to vector<8xf32>
    %364 = vector.shape_cast %363 : vector<8xf32> to vector<8x1xf32>
    %365 = vector.broadcast %364 : vector<8x1xf32> to vector<8x8xf32>
    %366 = arith.divf %362, %365 : vector<8x8xf32>
    %cst_291 = arith.constant dense<0.000000e+00> : vector<8x8xf32>
    %367 = tpu.matmul %366, %352, %cst_291 {dimension_numbers = #tpu.dot_dimension_numbers<[1], [0], [0], [1], [0, 0, 1, 1], [], []>} : vector<8x8xf32>, vector<8x8xf32>, vector<8x8xf32> -> vector<8x8xf32>
    %c1_292 = arith.constant 1 : index
    %c0_293 = arith.constant 0 : index
    %c0_294 = arith.constant 0 : index
    %368 = vector.load %arg28[%c1_292, %c0_293, %c0_294] : memref<4x8x32xf32, #tpu.memory_space<vmem>>, vector<1x8x32xf32>
    %369 = vector.shape_cast %368 : vector<1x8x32xf32> to vector<8x32xf32>
    %cst_295 = arith.constant dense<0.000000e+00> : vector<8x32xf32>
    %370 = tpu.matmul %367, %369, %cst_295 {dimension_numbers = #tpu.dot_dimension_numbers<[1], [0], [0], [1], [0, 0, 1, 1], [], []>} : vector<8x8xf32>, vector<8x32xf32>, vector<8x32xf32> -> vector<8x32xf32>
    %371 = arith.addf %331, %370 : vector<8x32xf32>
    %c0_296 = arith.constant 0 : index
    %c2_297 = arith.constant 2 : index
    %c0_298 = arith.constant 0 : index
    %c0_299 = arith.constant 0 : index
    %372 = vector.load %arg26[%c0_296, %c2_297, %c0_298, %c0_299] : memref<3x4x32x8xf32, #tpu.memory_space<vmem>>, vector<1x1x32x8xf32>
    %373 = vector.shape_cast %372 : vector<1x1x32x8xf32> to vector<32x8xf32>
    %cst_300 = arith.constant dense<0.000000e+00> : vector<8x8xf32>
    %374 = tpu.matmul %289, %373, %cst_300 {dimension_numbers = #tpu.dot_dimension_numbers<[1], [0], [0], [1], [0, 0, 1, 1], [], []>} : vector<8x32xf32>, vector<32x8xf32>, vector<8x8xf32> -> vector<8x8xf32>
    %c0_301 = arith.constant 0 : index
    %c2_302 = arith.constant 2 : index
    %c0_303 = arith.constant 0 : index
    %c0_304 = arith.constant 0 : index
    %375 = vector.load %arg27[%c0_301, %c2_302, %c0_303, %c0_304] : memref<3x4x1x8xf32, #tpu.memory_space<vmem>>, vector<1x1x1x8xf32>
    %376 = vector.shape_cast %375 : vector<1x1x1x8xf32> to vector<1x8xf32>
    %377 = vector.broadcast %376 : vector<1x8xf32> to vector<8x8xf32>
    %378 = arith.addf %374, %377 : vector<8x8xf32>
    %c1_305 = arith.constant 1 : index
    %c2_306 = arith.constant 2 : index
    %c0_307 = arith.constant 0 : index
    %c0_308 = arith.constant 0 : index
    %379 = vector.load %arg26[%c1_305, %c2_306, %c0_307, %c0_308] : memref<3x4x32x8xf32, #tpu.memory_space<vmem>>, vector<1x1x32x8xf32>
    %380 = vector.shape_cast %379 : vector<1x1x32x8xf32> to vector<32x8xf32>
    %cst_309 = arith.constant dense<0.000000e+00> : vector<8x8xf32>
    %381 = tpu.matmul %289, %380, %cst_309 {dimension_numbers = #tpu.dot_dimension_numbers<[1], [0], [0], [1], [0, 0, 1, 1], [], []>} : vector<8x32xf32>, vector<32x8xf32>, vector<8x8xf32> -> vector<8x8xf32>
    %c1_310 = arith.constant 1 : index
    %c2_311 = arith.constant 2 : index
    %c0_312 = arith.constant 0 : index
    %c0_313 = arith.constant 0 : index
    %382 = vector.load %arg27[%c1_310, %c2_311, %c0_312, %c0_313] : memref<3x4x1x8xf32, #tpu.memory_space<vmem>>, vector<1x1x1x8xf32>
    %383 = vector.shape_cast %382 : vector<1x1x1x8xf32> to vector<1x8xf32>
    %384 = vector.broadcast %383 : vector<1x8xf32> to vector<8x8xf32>
    %385 = arith.addf %381, %384 : vector<8x8xf32>
    %c2_314 = arith.constant 2 : index
    %c2_315 = arith.constant 2 : index
    %c0_316 = arith.constant 0 : index
    %c0_317 = arith.constant 0 : index
    %386 = vector.load %arg26[%c2_314, %c2_315, %c0_316, %c0_317] : memref<3x4x32x8xf32, #tpu.memory_space<vmem>>, vector<1x1x32x8xf32>
    %387 = vector.shape_cast %386 : vector<1x1x32x8xf32> to vector<32x8xf32>
    %cst_318 = arith.constant dense<0.000000e+00> : vector<8x8xf32>
    %388 = tpu.matmul %289, %387, %cst_318 {dimension_numbers = #tpu.dot_dimension_numbers<[1], [0], [0], [1], [0, 0, 1, 1], [], []>} : vector<8x32xf32>, vector<32x8xf32>, vector<8x8xf32> -> vector<8x8xf32>
    %c2_319 = arith.constant 2 : index
    %c2_320 = arith.constant 2 : index
    %c0_321 = arith.constant 0 : index
    %c0_322 = arith.constant 0 : index
    %389 = vector.load %arg27[%c2_319, %c2_320, %c0_321, %c0_322] : memref<3x4x1x8xf32, #tpu.memory_space<vmem>>, vector<1x1x1x8xf32>
    %390 = vector.shape_cast %389 : vector<1x1x1x8xf32> to vector<1x8xf32>
    %391 = vector.broadcast %390 : vector<1x8xf32> to vector<8x8xf32>
    %392 = arith.addf %388, %391 : vector<8x8xf32>
    %393 = tpu.transpose %385, [1, 0] : vector<8x8xf32> -> vector<8x8xf32>
    %cst_323 = arith.constant dense<0.000000e+00> : vector<8x8xf32>
    %394 = tpu.matmul %378, %393, %cst_323 {dimension_numbers = #tpu.dot_dimension_numbers<[1], [0], [0], [1], [0, 0, 1, 1], [], []>} : vector<8x8xf32>, vector<8x8xf32>, vector<8x8xf32> -> vector<8x8xf32>
    %cst_324 = arith.constant 0.353553385 : f32
    %395 = vector.broadcast %cst_324 : f32 to vector<8x8xf32>
    %396 = arith.mulf %394, %395 : vector<8x8xf32>
    %397 = arith.addf %396, %44 : vector<8x8xf32>
    %cst_325 = arith.constant dense<0xFF800000> : vector<8xf32>
    %398 = vector.multi_reduction <maximumf>, %397, %cst_325 [1] : vector<8x8xf32> to vector<8xf32>
    %399 = vector.shape_cast %398 : vector<8xf32> to vector<8x1xf32>
    %400 = vector.broadcast %399 : vector<8x1xf32> to vector<8x8xf32>
    %401 = arith.subf %397, %400 : vector<8x8xf32>
    %402 = math.exp %401 : vector<8x8xf32>
    %cst_326 = arith.constant dense<0.000000e+00> : vector<8xf32>
    %403 = vector.multi_reduction <add>, %402, %cst_326 [1] : vector<8x8xf32> to vector<8xf32>
    %404 = vector.shape_cast %403 : vector<8xf32> to vector<8x1xf32>
    %405 = vector.broadcast %404 : vector<8x1xf32> to vector<8x8xf32>
    %406 = arith.divf %402, %405 : vector<8x8xf32>
    %cst_327 = arith.constant dense<0.000000e+00> : vector<8x8xf32>
    %407 = tpu.matmul %406, %392, %cst_327 {dimension_numbers = #tpu.dot_dimension_numbers<[1], [0], [0], [1], [0, 0, 1, 1], [], []>} : vector<8x8xf32>, vector<8x8xf32>, vector<8x8xf32> -> vector<8x8xf32>
    %c2_328 = arith.constant 2 : index
    %c0_329 = arith.constant 0 : index
    %c0_330 = arith.constant 0 : index
    %408 = vector.load %arg28[%c2_328, %c0_329, %c0_330] : memref<4x8x32xf32, #tpu.memory_space<vmem>>, vector<1x8x32xf32>
    %409 = vector.shape_cast %408 : vector<1x8x32xf32> to vector<8x32xf32>
    %cst_331 = arith.constant dense<0.000000e+00> : vector<8x32xf32>
    %410 = tpu.matmul %407, %409, %cst_331 {dimension_numbers = #tpu.dot_dimension_numbers<[1], [0], [0], [1], [0, 0, 1, 1], [], []>} : vector<8x8xf32>, vector<8x32xf32>, vector<8x32xf32> -> vector<8x32xf32>
    %411 = arith.addf %371, %410 : vector<8x32xf32>
    %c0_332 = arith.constant 0 : index
    %c3_333 = arith.constant 3 : index
    %c0_334 = arith.constant 0 : index
    %c0_335 = arith.constant 0 : index
    %412 = vector.load %arg26[%c0_332, %c3_333, %c0_334, %c0_335] : memref<3x4x32x8xf32, #tpu.memory_space<vmem>>, vector<1x1x32x8xf32>
    %413 = vector.shape_cast %412 : vector<1x1x32x8xf32> to vector<32x8xf32>
    %cst_336 = arith.constant dense<0.000000e+00> : vector<8x8xf32>
    %414 = tpu.matmul %289, %413, %cst_336 {dimension_numbers = #tpu.dot_dimension_numbers<[1], [0], [0], [1], [0, 0, 1, 1], [], []>} : vector<8x32xf32>, vector<32x8xf32>, vector<8x8xf32> -> vector<8x8xf32>
    %c0_337 = arith.constant 0 : index
    %c3_338 = arith.constant 3 : index
    %c0_339 = arith.constant 0 : index
    %c0_340 = arith.constant 0 : index
    %415 = vector.load %arg27[%c0_337, %c3_338, %c0_339, %c0_340] : memref<3x4x1x8xf32, #tpu.memory_space<vmem>>, vector<1x1x1x8xf32>
    %416 = vector.shape_cast %415 : vector<1x1x1x8xf32> to vector<1x8xf32>
    %417 = vector.broadcast %416 : vector<1x8xf32> to vector<8x8xf32>
    %418 = arith.addf %414, %417 : vector<8x8xf32>
    %c1_341 = arith.constant 1 : index
    %c3_342 = arith.constant 3 : index
    %c0_343 = arith.constant 0 : index
    %c0_344 = arith.constant 0 : index
    %419 = vector.load %arg26[%c1_341, %c3_342, %c0_343, %c0_344] : memref<3x4x32x8xf32, #tpu.memory_space<vmem>>, vector<1x1x32x8xf32>
    %420 = vector.shape_cast %419 : vector<1x1x32x8xf32> to vector<32x8xf32>
    %cst_345 = arith.constant dense<0.000000e+00> : vector<8x8xf32>
    %421 = tpu.matmul %289, %420, %cst_345 {dimension_numbers = #tpu.dot_dimension_numbers<[1], [0], [0], [1], [0, 0, 1, 1], [], []>} : vector<8x32xf32>, vector<32x8xf32>, vector<8x8xf32> -> vector<8x8xf32>
    %c1_346 = arith.constant 1 : index
    %c3_347 = arith.constant 3 : index
    %c0_348 = arith.constant 0 : index
    %c0_349 = arith.constant 0 : index
    %422 = vector.load %arg27[%c1_346, %c3_347, %c0_348, %c0_349] : memref<3x4x1x8xf32, #tpu.memory_space<vmem>>, vector<1x1x1x8xf32>
    %423 = vector.shape_cast %422 : vector<1x1x1x8xf32> to vector<1x8xf32>
    %424 = vector.broadcast %423 : vector<1x8xf32> to vector<8x8xf32>
    %425 = arith.addf %421, %424 : vector<8x8xf32>
    %c2_350 = arith.constant 2 : index
    %c3_351 = arith.constant 3 : index
    %c0_352 = arith.constant 0 : index
    %c0_353 = arith.constant 0 : index
    %426 = vector.load %arg26[%c2_350, %c3_351, %c0_352, %c0_353] : memref<3x4x32x8xf32, #tpu.memory_space<vmem>>, vector<1x1x32x8xf32>
    %427 = vector.shape_cast %426 : vector<1x1x32x8xf32> to vector<32x8xf32>
    %cst_354 = arith.constant dense<0.000000e+00> : vector<8x8xf32>
    %428 = tpu.matmul %289, %427, %cst_354 {dimension_numbers = #tpu.dot_dimension_numbers<[1], [0], [0], [1], [0, 0, 1, 1], [], []>} : vector<8x32xf32>, vector<32x8xf32>, vector<8x8xf32> -> vector<8x8xf32>
    %c2_355 = arith.constant 2 : index
    %c3_356 = arith.constant 3 : index
    %c0_357 = arith.constant 0 : index
    %c0_358 = arith.constant 0 : index
    %429 = vector.load %arg27[%c2_355, %c3_356, %c0_357, %c0_358] : memref<3x4x1x8xf32, #tpu.memory_space<vmem>>, vector<1x1x1x8xf32>
    %430 = vector.shape_cast %429 : vector<1x1x1x8xf32> to vector<1x8xf32>
    %431 = vector.broadcast %430 : vector<1x8xf32> to vector<8x8xf32>
    %432 = arith.addf %428, %431 : vector<8x8xf32>
    %433 = tpu.transpose %425, [1, 0] : vector<8x8xf32> -> vector<8x8xf32>
    %cst_359 = arith.constant dense<0.000000e+00> : vector<8x8xf32>
    %434 = tpu.matmul %418, %433, %cst_359 {dimension_numbers = #tpu.dot_dimension_numbers<[1], [0], [0], [1], [0, 0, 1, 1], [], []>} : vector<8x8xf32>, vector<8x8xf32>, vector<8x8xf32> -> vector<8x8xf32>
    %cst_360 = arith.constant 0.353553385 : f32
    %435 = vector.broadcast %cst_360 : f32 to vector<8x8xf32>
    %436 = arith.mulf %434, %435 : vector<8x8xf32>
    %437 = arith.addf %436, %44 : vector<8x8xf32>
    %cst_361 = arith.constant dense<0xFF800000> : vector<8xf32>
    %438 = vector.multi_reduction <maximumf>, %437, %cst_361 [1] : vector<8x8xf32> to vector<8xf32>
    %439 = vector.shape_cast %438 : vector<8xf32> to vector<8x1xf32>
    %440 = vector.broadcast %439 : vector<8x1xf32> to vector<8x8xf32>
    %441 = arith.subf %437, %440 : vector<8x8xf32>
    %442 = math.exp %441 : vector<8x8xf32>
    %cst_362 = arith.constant dense<0.000000e+00> : vector<8xf32>
    %443 = vector.multi_reduction <add>, %442, %cst_362 [1] : vector<8x8xf32> to vector<8xf32>
    %444 = vector.shape_cast %443 : vector<8xf32> to vector<8x1xf32>
    %445 = vector.broadcast %444 : vector<8x1xf32> to vector<8x8xf32>
    %446 = arith.divf %442, %445 : vector<8x8xf32>
    %cst_363 = arith.constant dense<0.000000e+00> : vector<8x8xf32>
    %447 = tpu.matmul %446, %432, %cst_363 {dimension_numbers = #tpu.dot_dimension_numbers<[1], [0], [0], [1], [0, 0, 1, 1], [], []>} : vector<8x8xf32>, vector<8x8xf32>, vector<8x8xf32> -> vector<8x8xf32>
    %c3_364 = arith.constant 3 : index
    %c0_365 = arith.constant 0 : index
    %c0_366 = arith.constant 0 : index
    %448 = vector.load %arg28[%c3_364, %c0_365, %c0_366] : memref<4x8x32xf32, #tpu.memory_space<vmem>>, vector<1x8x32xf32>
    %449 = vector.shape_cast %448 : vector<1x8x32xf32> to vector<8x32xf32>
    %cst_367 = arith.constant dense<0.000000e+00> : vector<8x32xf32>
    %450 = tpu.matmul %447, %449, %cst_367 {dimension_numbers = #tpu.dot_dimension_numbers<[1], [0], [0], [1], [0, 0, 1, 1], [], []>} : vector<8x8xf32>, vector<8x32xf32>, vector<8x32xf32> -> vector<8x32xf32>
    %451 = arith.addf %411, %450 : vector<8x32xf32>
    %452 = arith.addf %275, %451 : vector<8x32xf32>
    %453 = arith.mulf %452, %452 : vector<8x32xf32>
    %cst_368 = arith.constant dense<0.000000e+00> : vector<8xf32>
    %454 = vector.multi_reduction <add>, %453, %cst_368 [1] : vector<8x32xf32> to vector<8xf32>
    %455 = vector.shape_cast %454 : vector<8xf32> to vector<8x1xf32>
    %cst_369 = arith.constant 3.200000e+01 : f32
    %456 = vector.broadcast %cst_369 : f32 to vector<8x1xf32>
    %457 = arith.divf %455, %456 : vector<8x1xf32>
    %cst_370 = arith.constant 9.99999997E-7 : f32
    %458 = vector.broadcast %cst_370 : f32 to vector<8x1xf32>
    %459 = arith.addf %457, %458 : vector<8x1xf32>
    %460 = math.rsqrt %459 : vector<8x1xf32>
    %461 = vector.broadcast %460 : vector<8x1xf32> to vector<8x32xf32>
    %462 = arith.mulf %452, %461 : vector<8x32xf32>
    %c4 = arith.constant 4 : index
    %c0_371 = arith.constant 0 : index
    %c0_372 = arith.constant 0 : index
    %463 = vector.load %arg16[%c4, %c0_371, %c0_372] : memref<7x1x32xf32, #tpu.memory_space<vmem>>, vector<1x1x32xf32>
    %464 = vector.shape_cast %463 : vector<1x1x32xf32> to vector<1x32xf32>
    %465 = vector.broadcast %464 : vector<1x32xf32> to vector<8x32xf32>
    %466 = arith.mulf %462, %465 : vector<8x32xf32>
    %c0_373 = arith.constant 0 : index
    %c0_374 = arith.constant 0 : index
    %467 = vector.load %arg33[%c0_373, %c0_374] : memref<1x32xf32, #tpu.memory_space<vmem>>, vector<1x32xf32>
    %c0_375 = arith.constant 0 : index
    %c0_376 = arith.constant 0 : index
    %c0_377 = arith.constant 0 : index
    %c0_378 = arith.constant 0 : index
    %468 = vector.load %arg30[%c0_375, %c0_376, %c0_377, %c0_378] : memref<3x4x32x8xf32, #tpu.memory_space<vmem>>, vector<1x1x32x8xf32>
    %469 = vector.shape_cast %468 : vector<1x1x32x8xf32> to vector<32x8xf32>
    %cst_379 = arith.constant dense<0.000000e+00> : vector<8x8xf32>
    %470 = tpu.matmul %466, %469, %cst_379 {dimension_numbers = #tpu.dot_dimension_numbers<[1], [0], [0], [1], [0, 0, 1, 1], [], []>} : vector<8x32xf32>, vector<32x8xf32>, vector<8x8xf32> -> vector<8x8xf32>
    %c0_380 = arith.constant 0 : index
    %c0_381 = arith.constant 0 : index
    %c0_382 = arith.constant 0 : index
    %c0_383 = arith.constant 0 : index
    %471 = vector.load %arg31[%c0_380, %c0_381, %c0_382, %c0_383] : memref<3x4x1x8xf32, #tpu.memory_space<vmem>>, vector<1x1x1x8xf32>
    %472 = vector.shape_cast %471 : vector<1x1x1x8xf32> to vector<1x8xf32>
    %473 = vector.broadcast %472 : vector<1x8xf32> to vector<8x8xf32>
    %474 = arith.addf %470, %473 : vector<8x8xf32>
    %c1_384 = arith.constant 1 : index
    %c0_385 = arith.constant 0 : index
    %c0_386 = arith.constant 0 : index
    %c0_387 = arith.constant 0 : index
    %475 = vector.load %arg30[%c1_384, %c0_385, %c0_386, %c0_387] : memref<3x4x32x8xf32, #tpu.memory_space<vmem>>, vector<1x1x32x8xf32>
    %476 = vector.shape_cast %475 : vector<1x1x32x8xf32> to vector<32x8xf32>
    %cst_388 = arith.constant dense<0.000000e+00> : vector<8x8xf32>
    %477 = tpu.matmul %266, %476, %cst_388 {dimension_numbers = #tpu.dot_dimension_numbers<[1], [0], [0], [1], [0, 0, 1, 1], [], []>} : vector<8x32xf32>, vector<32x8xf32>, vector<8x8xf32> -> vector<8x8xf32>
    %c1_389 = arith.constant 1 : index
    %c0_390 = arith.constant 0 : index
    %c0_391 = arith.constant 0 : index
    %c0_392 = arith.constant 0 : index
    %478 = vector.load %arg31[%c1_389, %c0_390, %c0_391, %c0_392] : memref<3x4x1x8xf32, #tpu.memory_space<vmem>>, vector<1x1x1x8xf32>
    %479 = vector.shape_cast %478 : vector<1x1x1x8xf32> to vector<1x8xf32>
    %480 = vector.broadcast %479 : vector<1x8xf32> to vector<8x8xf32>
    %481 = arith.addf %477, %480 : vector<8x8xf32>
    %c2_393 = arith.constant 2 : index
    %c0_394 = arith.constant 0 : index
    %c0_395 = arith.constant 0 : index
    %c0_396 = arith.constant 0 : index
    %482 = vector.load %arg30[%c2_393, %c0_394, %c0_395, %c0_396] : memref<3x4x32x8xf32, #tpu.memory_space<vmem>>, vector<1x1x32x8xf32>
    %483 = vector.shape_cast %482 : vector<1x1x32x8xf32> to vector<32x8xf32>
    %cst_397 = arith.constant dense<0.000000e+00> : vector<8x8xf32>
    %484 = tpu.matmul %266, %483, %cst_397 {dimension_numbers = #tpu.dot_dimension_numbers<[1], [0], [0], [1], [0, 0, 1, 1], [], []>} : vector<8x32xf32>, vector<32x8xf32>, vector<8x8xf32> -> vector<8x8xf32>
    %c2_398 = arith.constant 2 : index
    %c0_399 = arith.constant 0 : index
    %c0_400 = arith.constant 0 : index
    %c0_401 = arith.constant 0 : index
    %485 = vector.load %arg31[%c2_398, %c0_399, %c0_400, %c0_401] : memref<3x4x1x8xf32, #tpu.memory_space<vmem>>, vector<1x1x1x8xf32>
    %486 = vector.shape_cast %485 : vector<1x1x1x8xf32> to vector<1x8xf32>
    %487 = vector.broadcast %486 : vector<1x8xf32> to vector<8x8xf32>
    %488 = arith.addf %484, %487 : vector<8x8xf32>
    %489 = tpu.transpose %481, [1, 0] : vector<8x8xf32> -> vector<8x8xf32>
    %cst_402 = arith.constant dense<0.000000e+00> : vector<8x8xf32>
    %490 = tpu.matmul %474, %489, %cst_402 {dimension_numbers = #tpu.dot_dimension_numbers<[1], [0], [0], [1], [0, 0, 1, 1], [], []>} : vector<8x8xf32>, vector<8x8xf32>, vector<8x8xf32> -> vector<8x8xf32>
    %cst_403 = arith.constant 0.353553385 : f32
    %491 = vector.broadcast %cst_403 : f32 to vector<8x8xf32>
    %492 = arith.mulf %490, %491 : vector<8x8xf32>
    %493 = vector.broadcast %38 : vector<1x8xf32> to vector<8x8xf32>
    %494 = arith.addf %492, %493 : vector<8x8xf32>
    %cst_404 = arith.constant dense<0xFF800000> : vector<8xf32>
    %495 = vector.multi_reduction <maximumf>, %494, %cst_404 [1] : vector<8x8xf32> to vector<8xf32>
    %496 = vector.shape_cast %495 : vector<8xf32> to vector<8x1xf32>
    %497 = vector.broadcast %496 : vector<8x1xf32> to vector<8x8xf32>
    %498 = arith.subf %494, %497 : vector<8x8xf32>
    %499 = math.exp %498 : vector<8x8xf32>
    %cst_405 = arith.constant dense<0.000000e+00> : vector<8xf32>
    %500 = vector.multi_reduction <add>, %499, %cst_405 [1] : vector<8x8xf32> to vector<8xf32>
    %501 = vector.shape_cast %500 : vector<8xf32> to vector<8x1xf32>
    %502 = vector.broadcast %501 : vector<8x1xf32> to vector<8x8xf32>
    %503 = arith.divf %499, %502 : vector<8x8xf32>
    %cst_406 = arith.constant dense<0.000000e+00> : vector<8x8xf32>
    %504 = tpu.matmul %503, %488, %cst_406 {dimension_numbers = #tpu.dot_dimension_numbers<[1], [0], [0], [1], [0, 0, 1, 1], [], []>} : vector<8x8xf32>, vector<8x8xf32>, vector<8x8xf32> -> vector<8x8xf32>
    %c0_407 = arith.constant 0 : index
    %c0_408 = arith.constant 0 : index
    %c0_409 = arith.constant 0 : index
    %505 = vector.load %arg32[%c0_407, %c0_408, %c0_409] : memref<4x8x32xf32, #tpu.memory_space<vmem>>, vector<1x8x32xf32>
    %506 = vector.shape_cast %505 : vector<1x8x32xf32> to vector<8x32xf32>
    %cst_410 = arith.constant dense<0.000000e+00> : vector<8x32xf32>
    %507 = tpu.matmul %504, %506, %cst_410 {dimension_numbers = #tpu.dot_dimension_numbers<[1], [0], [0], [1], [0, 0, 1, 1], [], []>} : vector<8x8xf32>, vector<8x32xf32>, vector<8x32xf32> -> vector<8x32xf32>
    %508 = vector.broadcast %467 : vector<1x32xf32> to vector<8x32xf32>
    %509 = arith.addf %508, %507 : vector<8x32xf32>
    %c0_411 = arith.constant 0 : index
    %c1_412 = arith.constant 1 : index
    %c0_413 = arith.constant 0 : index
    %c0_414 = arith.constant 0 : index
    %510 = vector.load %arg30[%c0_411, %c1_412, %c0_413, %c0_414] : memref<3x4x32x8xf32, #tpu.memory_space<vmem>>, vector<1x1x32x8xf32>
    %511 = vector.shape_cast %510 : vector<1x1x32x8xf32> to vector<32x8xf32>
    %cst_415 = arith.constant dense<0.000000e+00> : vector<8x8xf32>
    %512 = tpu.matmul %466, %511, %cst_415 {dimension_numbers = #tpu.dot_dimension_numbers<[1], [0], [0], [1], [0, 0, 1, 1], [], []>} : vector<8x32xf32>, vector<32x8xf32>, vector<8x8xf32> -> vector<8x8xf32>
    %c0_416 = arith.constant 0 : index
    %c1_417 = arith.constant 1 : index
    %c0_418 = arith.constant 0 : index
    %c0_419 = arith.constant 0 : index
    %513 = vector.load %arg31[%c0_416, %c1_417, %c0_418, %c0_419] : memref<3x4x1x8xf32, #tpu.memory_space<vmem>>, vector<1x1x1x8xf32>
    %514 = vector.shape_cast %513 : vector<1x1x1x8xf32> to vector<1x8xf32>
    %515 = vector.broadcast %514 : vector<1x8xf32> to vector<8x8xf32>
    %516 = arith.addf %512, %515 : vector<8x8xf32>
    %c1_420 = arith.constant 1 : index
    %c1_421 = arith.constant 1 : index
    %c0_422 = arith.constant 0 : index
    %c0_423 = arith.constant 0 : index
    %517 = vector.load %arg30[%c1_420, %c1_421, %c0_422, %c0_423] : memref<3x4x32x8xf32, #tpu.memory_space<vmem>>, vector<1x1x32x8xf32>
    %518 = vector.shape_cast %517 : vector<1x1x32x8xf32> to vector<32x8xf32>
    %cst_424 = arith.constant dense<0.000000e+00> : vector<8x8xf32>
    %519 = tpu.matmul %266, %518, %cst_424 {dimension_numbers = #tpu.dot_dimension_numbers<[1], [0], [0], [1], [0, 0, 1, 1], [], []>} : vector<8x32xf32>, vector<32x8xf32>, vector<8x8xf32> -> vector<8x8xf32>
    %c1_425 = arith.constant 1 : index
    %c1_426 = arith.constant 1 : index
    %c0_427 = arith.constant 0 : index
    %c0_428 = arith.constant 0 : index
    %520 = vector.load %arg31[%c1_425, %c1_426, %c0_427, %c0_428] : memref<3x4x1x8xf32, #tpu.memory_space<vmem>>, vector<1x1x1x8xf32>
    %521 = vector.shape_cast %520 : vector<1x1x1x8xf32> to vector<1x8xf32>
    %522 = vector.broadcast %521 : vector<1x8xf32> to vector<8x8xf32>
    %523 = arith.addf %519, %522 : vector<8x8xf32>
    %c2_429 = arith.constant 2 : index
    %c1_430 = arith.constant 1 : index
    %c0_431 = arith.constant 0 : index
    %c0_432 = arith.constant 0 : index
    %524 = vector.load %arg30[%c2_429, %c1_430, %c0_431, %c0_432] : memref<3x4x32x8xf32, #tpu.memory_space<vmem>>, vector<1x1x32x8xf32>
    %525 = vector.shape_cast %524 : vector<1x1x32x8xf32> to vector<32x8xf32>
    %cst_433 = arith.constant dense<0.000000e+00> : vector<8x8xf32>
    %526 = tpu.matmul %266, %525, %cst_433 {dimension_numbers = #tpu.dot_dimension_numbers<[1], [0], [0], [1], [0, 0, 1, 1], [], []>} : vector<8x32xf32>, vector<32x8xf32>, vector<8x8xf32> -> vector<8x8xf32>
    %c2_434 = arith.constant 2 : index
    %c1_435 = arith.constant 1 : index
    %c0_436 = arith.constant 0 : index
    %c0_437 = arith.constant 0 : index
    %527 = vector.load %arg31[%c2_434, %c1_435, %c0_436, %c0_437] : memref<3x4x1x8xf32, #tpu.memory_space<vmem>>, vector<1x1x1x8xf32>
    %528 = vector.shape_cast %527 : vector<1x1x1x8xf32> to vector<1x8xf32>
    %529 = vector.broadcast %528 : vector<1x8xf32> to vector<8x8xf32>
    %530 = arith.addf %526, %529 : vector<8x8xf32>
    %531 = tpu.transpose %523, [1, 0] : vector<8x8xf32> -> vector<8x8xf32>
    %cst_438 = arith.constant dense<0.000000e+00> : vector<8x8xf32>
    %532 = tpu.matmul %516, %531, %cst_438 {dimension_numbers = #tpu.dot_dimension_numbers<[1], [0], [0], [1], [0, 0, 1, 1], [], []>} : vector<8x8xf32>, vector<8x8xf32>, vector<8x8xf32> -> vector<8x8xf32>
    %cst_439 = arith.constant 0.353553385 : f32
    %533 = vector.broadcast %cst_439 : f32 to vector<8x8xf32>
    %534 = arith.mulf %532, %533 : vector<8x8xf32>
    %535 = vector.broadcast %38 : vector<1x8xf32> to vector<8x8xf32>
    %536 = arith.addf %534, %535 : vector<8x8xf32>
    %cst_440 = arith.constant dense<0xFF800000> : vector<8xf32>
    %537 = vector.multi_reduction <maximumf>, %536, %cst_440 [1] : vector<8x8xf32> to vector<8xf32>
    %538 = vector.shape_cast %537 : vector<8xf32> to vector<8x1xf32>
    %539 = vector.broadcast %538 : vector<8x1xf32> to vector<8x8xf32>
    %540 = arith.subf %536, %539 : vector<8x8xf32>
    %541 = math.exp %540 : vector<8x8xf32>
    %cst_441 = arith.constant dense<0.000000e+00> : vector<8xf32>
    %542 = vector.multi_reduction <add>, %541, %cst_441 [1] : vector<8x8xf32> to vector<8xf32>
    %543 = vector.shape_cast %542 : vector<8xf32> to vector<8x1xf32>
    %544 = vector.broadcast %543 : vector<8x1xf32> to vector<8x8xf32>
    %545 = arith.divf %541, %544 : vector<8x8xf32>
    %cst_442 = arith.constant dense<0.000000e+00> : vector<8x8xf32>
    %546 = tpu.matmul %545, %530, %cst_442 {dimension_numbers = #tpu.dot_dimension_numbers<[1], [0], [0], [1], [0, 0, 1, 1], [], []>} : vector<8x8xf32>, vector<8x8xf32>, vector<8x8xf32> -> vector<8x8xf32>
    %c1_443 = arith.constant 1 : index
    %c0_444 = arith.constant 0 : index
    %c0_445 = arith.constant 0 : index
    %547 = vector.load %arg32[%c1_443, %c0_444, %c0_445] : memref<4x8x32xf32, #tpu.memory_space<vmem>>, vector<1x8x32xf32>
    %548 = vector.shape_cast %547 : vector<1x8x32xf32> to vector<8x32xf32>
    %cst_446 = arith.constant dense<0.000000e+00> : vector<8x32xf32>
    %549 = tpu.matmul %546, %548, %cst_446 {dimension_numbers = #tpu.dot_dimension_numbers<[1], [0], [0], [1], [0, 0, 1, 1], [], []>} : vector<8x8xf32>, vector<8x32xf32>, vector<8x32xf32> -> vector<8x32xf32>
    %550 = arith.addf %509, %549 : vector<8x32xf32>
    %c0_447 = arith.constant 0 : index
    %c2_448 = arith.constant 2 : index
    %c0_449 = arith.constant 0 : index
    %c0_450 = arith.constant 0 : index
    %551 = vector.load %arg30[%c0_447, %c2_448, %c0_449, %c0_450] : memref<3x4x32x8xf32, #tpu.memory_space<vmem>>, vector<1x1x32x8xf32>
    %552 = vector.shape_cast %551 : vector<1x1x32x8xf32> to vector<32x8xf32>
    %cst_451 = arith.constant dense<0.000000e+00> : vector<8x8xf32>
    %553 = tpu.matmul %466, %552, %cst_451 {dimension_numbers = #tpu.dot_dimension_numbers<[1], [0], [0], [1], [0, 0, 1, 1], [], []>} : vector<8x32xf32>, vector<32x8xf32>, vector<8x8xf32> -> vector<8x8xf32>
    %c0_452 = arith.constant 0 : index
    %c2_453 = arith.constant 2 : index
    %c0_454 = arith.constant 0 : index
    %c0_455 = arith.constant 0 : index
    %554 = vector.load %arg31[%c0_452, %c2_453, %c0_454, %c0_455] : memref<3x4x1x8xf32, #tpu.memory_space<vmem>>, vector<1x1x1x8xf32>
    %555 = vector.shape_cast %554 : vector<1x1x1x8xf32> to vector<1x8xf32>
    %556 = vector.broadcast %555 : vector<1x8xf32> to vector<8x8xf32>
    %557 = arith.addf %553, %556 : vector<8x8xf32>
    %c1_456 = arith.constant 1 : index
    %c2_457 = arith.constant 2 : index
    %c0_458 = arith.constant 0 : index
    %c0_459 = arith.constant 0 : index
    %558 = vector.load %arg30[%c1_456, %c2_457, %c0_458, %c0_459] : memref<3x4x32x8xf32, #tpu.memory_space<vmem>>, vector<1x1x32x8xf32>
    %559 = vector.shape_cast %558 : vector<1x1x32x8xf32> to vector<32x8xf32>
    %cst_460 = arith.constant dense<0.000000e+00> : vector<8x8xf32>
    %560 = tpu.matmul %266, %559, %cst_460 {dimension_numbers = #tpu.dot_dimension_numbers<[1], [0], [0], [1], [0, 0, 1, 1], [], []>} : vector<8x32xf32>, vector<32x8xf32>, vector<8x8xf32> -> vector<8x8xf32>
    %c1_461 = arith.constant 1 : index
    %c2_462 = arith.constant 2 : index
    %c0_463 = arith.constant 0 : index
    %c0_464 = arith.constant 0 : index
    %561 = vector.load %arg31[%c1_461, %c2_462, %c0_463, %c0_464] : memref<3x4x1x8xf32, #tpu.memory_space<vmem>>, vector<1x1x1x8xf32>
    %562 = vector.shape_cast %561 : vector<1x1x1x8xf32> to vector<1x8xf32>
    %563 = vector.broadcast %562 : vector<1x8xf32> to vector<8x8xf32>
    %564 = arith.addf %560, %563 : vector<8x8xf32>
    %c2_465 = arith.constant 2 : index
    %c2_466 = arith.constant 2 : index
    %c0_467 = arith.constant 0 : index
    %c0_468 = arith.constant 0 : index
    %565 = vector.load %arg30[%c2_465, %c2_466, %c0_467, %c0_468] : memref<3x4x32x8xf32, #tpu.memory_space<vmem>>, vector<1x1x32x8xf32>
    %566 = vector.shape_cast %565 : vector<1x1x32x8xf32> to vector<32x8xf32>
    %cst_469 = arith.constant dense<0.000000e+00> : vector<8x8xf32>
    %567 = tpu.matmul %266, %566, %cst_469 {dimension_numbers = #tpu.dot_dimension_numbers<[1], [0], [0], [1], [0, 0, 1, 1], [], []>} : vector<8x32xf32>, vector<32x8xf32>, vector<8x8xf32> -> vector<8x8xf32>
    %c2_470 = arith.constant 2 : index
    %c2_471 = arith.constant 2 : index
    %c0_472 = arith.constant 0 : index
    %c0_473 = arith.constant 0 : index
    %568 = vector.load %arg31[%c2_470, %c2_471, %c0_472, %c0_473] : memref<3x4x1x8xf32, #tpu.memory_space<vmem>>, vector<1x1x1x8xf32>
    %569 = vector.shape_cast %568 : vector<1x1x1x8xf32> to vector<1x8xf32>
    %570 = vector.broadcast %569 : vector<1x8xf32> to vector<8x8xf32>
    %571 = arith.addf %567, %570 : vector<8x8xf32>
    %572 = tpu.transpose %564, [1, 0] : vector<8x8xf32> -> vector<8x8xf32>
    %cst_474 = arith.constant dense<0.000000e+00> : vector<8x8xf32>
    %573 = tpu.matmul %557, %572, %cst_474 {dimension_numbers = #tpu.dot_dimension_numbers<[1], [0], [0], [1], [0, 0, 1, 1], [], []>} : vector<8x8xf32>, vector<8x8xf32>, vector<8x8xf32> -> vector<8x8xf32>
    %cst_475 = arith.constant 0.353553385 : f32
    %574 = vector.broadcast %cst_475 : f32 to vector<8x8xf32>
    %575 = arith.mulf %573, %574 : vector<8x8xf32>
    %576 = vector.broadcast %38 : vector<1x8xf32> to vector<8x8xf32>
    %577 = arith.addf %575, %576 : vector<8x8xf32>
    %cst_476 = arith.constant dense<0xFF800000> : vector<8xf32>
    %578 = vector.multi_reduction <maximumf>, %577, %cst_476 [1] : vector<8x8xf32> to vector<8xf32>
    %579 = vector.shape_cast %578 : vector<8xf32> to vector<8x1xf32>
    %580 = vector.broadcast %579 : vector<8x1xf32> to vector<8x8xf32>
    %581 = arith.subf %577, %580 : vector<8x8xf32>
    %582 = math.exp %581 : vector<8x8xf32>
    %cst_477 = arith.constant dense<0.000000e+00> : vector<8xf32>
    %583 = vector.multi_reduction <add>, %582, %cst_477 [1] : vector<8x8xf32> to vector<8xf32>
    %584 = vector.shape_cast %583 : vector<8xf32> to vector<8x1xf32>
    %585 = vector.broadcast %584 : vector<8x1xf32> to vector<8x8xf32>
    %586 = arith.divf %582, %585 : vector<8x8xf32>
    %cst_478 = arith.constant dense<0.000000e+00> : vector<8x8xf32>
    %587 = tpu.matmul %586, %571, %cst_478 {dimension_numbers = #tpu.dot_dimension_numbers<[1], [0], [0], [1], [0, 0, 1, 1], [], []>} : vector<8x8xf32>, vector<8x8xf32>, vector<8x8xf32> -> vector<8x8xf32>
    %c2_479 = arith.constant 2 : index
    %c0_480 = arith.constant 0 : index
    %c0_481 = arith.constant 0 : index
    %588 = vector.load %arg32[%c2_479, %c0_480, %c0_481] : memref<4x8x32xf32, #tpu.memory_space<vmem>>, vector<1x8x32xf32>
    %589 = vector.shape_cast %588 : vector<1x8x32xf32> to vector<8x32xf32>
    %cst_482 = arith.constant dense<0.000000e+00> : vector<8x32xf32>
    %590 = tpu.matmul %587, %589, %cst_482 {dimension_numbers = #tpu.dot_dimension_numbers<[1], [0], [0], [1], [0, 0, 1, 1], [], []>} : vector<8x8xf32>, vector<8x32xf32>, vector<8x32xf32> -> vector<8x32xf32>
    %591 = arith.addf %550, %590 : vector<8x32xf32>
    %c0_483 = arith.constant 0 : index
    %c3_484 = arith.constant 3 : index
    %c0_485 = arith.constant 0 : index
    %c0_486 = arith.constant 0 : index
    %592 = vector.load %arg30[%c0_483, %c3_484, %c0_485, %c0_486] : memref<3x4x32x8xf32, #tpu.memory_space<vmem>>, vector<1x1x32x8xf32>
    %593 = vector.shape_cast %592 : vector<1x1x32x8xf32> to vector<32x8xf32>
    %cst_487 = arith.constant dense<0.000000e+00> : vector<8x8xf32>
    %594 = tpu.matmul %466, %593, %cst_487 {dimension_numbers = #tpu.dot_dimension_numbers<[1], [0], [0], [1], [0, 0, 1, 1], [], []>} : vector<8x32xf32>, vector<32x8xf32>, vector<8x8xf32> -> vector<8x8xf32>
    %c0_488 = arith.constant 0 : index
    %c3_489 = arith.constant 3 : index
    %c0_490 = arith.constant 0 : index
    %c0_491 = arith.constant 0 : index
    %595 = vector.load %arg31[%c0_488, %c3_489, %c0_490, %c0_491] : memref<3x4x1x8xf32, #tpu.memory_space<vmem>>, vector<1x1x1x8xf32>
    %596 = vector.shape_cast %595 : vector<1x1x1x8xf32> to vector<1x8xf32>
    %597 = vector.broadcast %596 : vector<1x8xf32> to vector<8x8xf32>
    %598 = arith.addf %594, %597 : vector<8x8xf32>
    %c1_492 = arith.constant 1 : index
    %c3_493 = arith.constant 3 : index
    %c0_494 = arith.constant 0 : index
    %c0_495 = arith.constant 0 : index
    %599 = vector.load %arg30[%c1_492, %c3_493, %c0_494, %c0_495] : memref<3x4x32x8xf32, #tpu.memory_space<vmem>>, vector<1x1x32x8xf32>
    %600 = vector.shape_cast %599 : vector<1x1x32x8xf32> to vector<32x8xf32>
    %cst_496 = arith.constant dense<0.000000e+00> : vector<8x8xf32>
    %601 = tpu.matmul %266, %600, %cst_496 {dimension_numbers = #tpu.dot_dimension_numbers<[1], [0], [0], [1], [0, 0, 1, 1], [], []>} : vector<8x32xf32>, vector<32x8xf32>, vector<8x8xf32> -> vector<8x8xf32>
    %c1_497 = arith.constant 1 : index
    %c3_498 = arith.constant 3 : index
    %c0_499 = arith.constant 0 : index
    %c0_500 = arith.constant 0 : index
    %602 = vector.load %arg31[%c1_497, %c3_498, %c0_499, %c0_500] : memref<3x4x1x8xf32, #tpu.memory_space<vmem>>, vector<1x1x1x8xf32>
    %603 = vector.shape_cast %602 : vector<1x1x1x8xf32> to vector<1x8xf32>
    %604 = vector.broadcast %603 : vector<1x8xf32> to vector<8x8xf32>
    %605 = arith.addf %601, %604 : vector<8x8xf32>
    %c2_501 = arith.constant 2 : index
    %c3_502 = arith.constant 3 : index
    %c0_503 = arith.constant 0 : index
    %c0_504 = arith.constant 0 : index
    %606 = vector.load %arg30[%c2_501, %c3_502, %c0_503, %c0_504] : memref<3x4x32x8xf32, #tpu.memory_space<vmem>>, vector<1x1x32x8xf32>
    %607 = vector.shape_cast %606 : vector<1x1x32x8xf32> to vector<32x8xf32>
    %cst_505 = arith.constant dense<0.000000e+00> : vector<8x8xf32>
    %608 = tpu.matmul %266, %607, %cst_505 {dimension_numbers = #tpu.dot_dimension_numbers<[1], [0], [0], [1], [0, 0, 1, 1], [], []>} : vector<8x32xf32>, vector<32x8xf32>, vector<8x8xf32> -> vector<8x8xf32>
    %c2_506 = arith.constant 2 : index
    %c3_507 = arith.constant 3 : index
    %c0_508 = arith.constant 0 : index
    %c0_509 = arith.constant 0 : index
    %609 = vector.load %arg31[%c2_506, %c3_507, %c0_508, %c0_509] : memref<3x4x1x8xf32, #tpu.memory_space<vmem>>, vector<1x1x1x8xf32>
    %610 = vector.shape_cast %609 : vector<1x1x1x8xf32> to vector<1x8xf32>
    %611 = vector.broadcast %610 : vector<1x8xf32> to vector<8x8xf32>
    %612 = arith.addf %608, %611 : vector<8x8xf32>
    %613 = tpu.transpose %605, [1, 0] : vector<8x8xf32> -> vector<8x8xf32>
    %cst_510 = arith.constant dense<0.000000e+00> : vector<8x8xf32>
    %614 = tpu.matmul %598, %613, %cst_510 {dimension_numbers = #tpu.dot_dimension_numbers<[1], [0], [0], [1], [0, 0, 1, 1], [], []>} : vector<8x8xf32>, vector<8x8xf32>, vector<8x8xf32> -> vector<8x8xf32>
    %cst_511 = arith.constant 0.353553385 : f32
    %615 = vector.broadcast %cst_511 : f32 to vector<8x8xf32>
    %616 = arith.mulf %614, %615 : vector<8x8xf32>
    %617 = vector.broadcast %38 : vector<1x8xf32> to vector<8x8xf32>
    %618 = arith.addf %616, %617 : vector<8x8xf32>
    %cst_512 = arith.constant dense<0xFF800000> : vector<8xf32>
    %619 = vector.multi_reduction <maximumf>, %618, %cst_512 [1] : vector<8x8xf32> to vector<8xf32>
    %620 = vector.shape_cast %619 : vector<8xf32> to vector<8x1xf32>
    %621 = vector.broadcast %620 : vector<8x1xf32> to vector<8x8xf32>
    %622 = arith.subf %618, %621 : vector<8x8xf32>
    %623 = math.exp %622 : vector<8x8xf32>
    %cst_513 = arith.constant dense<0.000000e+00> : vector<8xf32>
    %624 = vector.multi_reduction <add>, %623, %cst_513 [1] : vector<8x8xf32> to vector<8xf32>
    %625 = vector.shape_cast %624 : vector<8xf32> to vector<8x1xf32>
    %626 = vector.broadcast %625 : vector<8x1xf32> to vector<8x8xf32>
    %627 = arith.divf %623, %626 : vector<8x8xf32>
    %cst_514 = arith.constant dense<0.000000e+00> : vector<8x8xf32>
    %628 = tpu.matmul %627, %612, %cst_514 {dimension_numbers = #tpu.dot_dimension_numbers<[1], [0], [0], [1], [0, 0, 1, 1], [], []>} : vector<8x8xf32>, vector<8x8xf32>, vector<8x8xf32> -> vector<8x8xf32>
    %c3_515 = arith.constant 3 : index
    %c0_516 = arith.constant 0 : index
    %c0_517 = arith.constant 0 : index
    %629 = vector.load %arg32[%c3_515, %c0_516, %c0_517] : memref<4x8x32xf32, #tpu.memory_space<vmem>>, vector<1x8x32xf32>
    %630 = vector.shape_cast %629 : vector<1x8x32xf32> to vector<8x32xf32>
    %cst_518 = arith.constant dense<0.000000e+00> : vector<8x32xf32>
    %631 = tpu.matmul %628, %630, %cst_518 {dimension_numbers = #tpu.dot_dimension_numbers<[1], [0], [0], [1], [0, 0, 1, 1], [], []>} : vector<8x8xf32>, vector<8x32xf32>, vector<8x32xf32> -> vector<8x32xf32>
    %632 = arith.addf %591, %631 : vector<8x32xf32>
    %633 = arith.addf %452, %632 : vector<8x32xf32>
    %c5 = arith.constant 5 : index
    %c0_519 = arith.constant 0 : index
    %c0_520 = arith.constant 0 : index
    %634 = vector.load %arg16[%c5, %c0_519, %c0_520] : memref<7x1x32xf32, #tpu.memory_space<vmem>>, vector<1x1x32xf32>
    %635 = vector.shape_cast %634 : vector<1x1x32xf32> to vector<1x32xf32>
    %636 = arith.mulf %633, %633 : vector<8x32xf32>
    %cst_521 = arith.constant dense<0.000000e+00> : vector<8xf32>
    %637 = vector.multi_reduction <add>, %636, %cst_521 [1] : vector<8x32xf32> to vector<8xf32>
    %638 = vector.shape_cast %637 : vector<8xf32> to vector<8x1xf32>
    %cst_522 = arith.constant 3.200000e+01 : f32
    %639 = vector.broadcast %cst_522 : f32 to vector<8x1xf32>
    %640 = arith.divf %638, %639 : vector<8x1xf32>
    %cst_523 = arith.constant 9.99999997E-7 : f32
    %641 = vector.broadcast %cst_523 : f32 to vector<8x1xf32>
    %642 = arith.addf %640, %641 : vector<8x1xf32>
    %643 = math.rsqrt %642 : vector<8x1xf32>
    %644 = vector.broadcast %643 : vector<8x1xf32> to vector<8x32xf32>
    %645 = arith.mulf %633, %644 : vector<8x32xf32>
    %646 = vector.broadcast %635 : vector<1x32xf32> to vector<8x32xf32>
    %647 = arith.mulf %645, %646 : vector<8x32xf32>
    %c0_524 = arith.constant 0 : index
    %c0_525 = arith.constant 0 : index
    %648 = vector.load %arg34[%c0_524, %c0_525] : memref<32x64xf32, #tpu.memory_space<vmem>>, vector<32x64xf32>
    %cst_526 = arith.constant dense<0.000000e+00> : vector<8x64xf32>
    %649 = tpu.matmul %647, %648, %cst_526 {dimension_numbers = #tpu.dot_dimension_numbers<[1], [0], [0], [1], [0, 0, 1, 1], [], []>} : vector<8x32xf32>, vector<32x64xf32>, vector<8x64xf32> -> vector<8x64xf32>
    %c0_527 = arith.constant 0 : index
    %c0_528 = arith.constant 0 : index
    %650 = vector.load %arg35[%c0_527, %c0_528] : memref<1x64xf32, #tpu.memory_space<vmem>>, vector<1x64xf32>
    %651 = vector.broadcast %650 : vector<1x64xf32> to vector<8x64xf32>
    %652 = arith.addf %649, %651 : vector<8x64xf32>
    %cst_529 = arith.constant 0.000000e+00 : f32
    %653 = vector.broadcast %cst_529 : f32 to vector<8x64xf32>
    %654 = arith.maximumf %652, %653 : vector<8x64xf32>
    %c0_530 = arith.constant 0 : index
    %c0_531 = arith.constant 0 : index
    %655 = vector.load %arg36[%c0_530, %c0_531] : memref<64x32xf32, #tpu.memory_space<vmem>>, vector<64x32xf32>
    %cst_532 = arith.constant dense<0.000000e+00> : vector<8x32xf32>
    %656 = tpu.matmul %654, %655, %cst_532 {dimension_numbers = #tpu.dot_dimension_numbers<[1], [0], [0], [1], [0, 0, 1, 1], [], []>} : vector<8x64xf32>, vector<64x32xf32>, vector<8x32xf32> -> vector<8x32xf32>
    %657 = arith.addf %633, %656 : vector<8x32xf32>
    %c0_533 = arith.constant 0 : index
    %c0_534 = arith.constant 0 : index
    %658 = vector.load %arg37[%c0_533, %c0_534] : memref<1x32xf32, #tpu.memory_space<vmem>>, vector<1x32xf32>
    %659 = vector.broadcast %658 : vector<1x32xf32> to vector<8x32xf32>
    %660 = arith.addf %657, %659 : vector<8x32xf32>
    %661 = arith.mulf %660, %660 : vector<8x32xf32>
    %cst_535 = arith.constant dense<0.000000e+00> : vector<8xf32>
    %662 = vector.multi_reduction <add>, %661, %cst_535 [1] : vector<8x32xf32> to vector<8xf32>
    %663 = vector.shape_cast %662 : vector<8xf32> to vector<8x1xf32>
    %cst_536 = arith.constant 3.200000e+01 : f32
    %664 = vector.broadcast %cst_536 : f32 to vector<8x1xf32>
    %665 = arith.divf %663, %664 : vector<8x1xf32>
    %cst_537 = arith.constant 9.99999997E-7 : f32
    %666 = vector.broadcast %cst_537 : f32 to vector<8x1xf32>
    %667 = arith.addf %665, %666 : vector<8x1xf32>
    %668 = math.rsqrt %667 : vector<8x1xf32>
    %669 = vector.broadcast %668 : vector<8x1xf32> to vector<8x32xf32>
    %670 = arith.mulf %660, %669 : vector<8x32xf32>
    %c6 = arith.constant 6 : index
    %c0_538 = arith.constant 0 : index
    %c0_539 = arith.constant 0 : index
    %671 = vector.load %arg16[%c6, %c0_538, %c0_539] : memref<7x1x32xf32, #tpu.memory_space<vmem>>, vector<1x1x32xf32>
    %672 = vector.shape_cast %671 : vector<1x1x32xf32> to vector<1x32xf32>
    %673 = vector.broadcast %672 : vector<1x32xf32> to vector<8x32xf32>
    %674 = arith.mulf %670, %673 : vector<8x32xf32>
    %c0_540 = arith.constant 0 : index
    %c0_541 = arith.constant 0 : index
    %675 = vector.load %arg38[%c0_540, %c0_541] : memref<32x64xf32, #tpu.memory_space<vmem>>, vector<32x64xf32>
    %cst_542 = arith.constant dense<0.000000e+00> : vector<8x64xf32>
    %676 = tpu.matmul %674, %675, %cst_542 {dimension_numbers = #tpu.dot_dimension_numbers<[1], [0], [0], [1], [0, 0, 1, 1], [], []>} : vector<8x32xf32>, vector<32x64xf32>, vector<8x64xf32> -> vector<8x64xf32>
    %c0_543 = arith.constant 0 : index
    %c0_544 = arith.constant 0 : index
    %677 = vector.load %arg39[%c0_543, %c0_544] : memref<1x64xf32, #tpu.memory_space<vmem>>, vector<1x64xf32>
    %678 = vector.broadcast %677 : vector<1x64xf32> to vector<8x64xf32>
    %679 = arith.addf %676, %678 : vector<8x64xf32>
    %c0_545 = arith.constant 0 : index
    %c0_546 = arith.constant 0 : index
    %c0_547 = arith.constant 0 : index
    %680 = vector.load %arg40[%c0_545, %c0_546, %c0_547] : memref<1x8x64xf32, #tpu.memory_space<vmem>>, vector<1x8x64xf32>
    %681 = vector.shape_cast %680 : vector<1x8x64xf32> to vector<8x64xf32>
    %682 = vector.shape_cast %679 : vector<8x64xf32> to vector<1x8x64xf32>
    tpu.vector_store %arg40[%c0_545, %c0_546, %c0_547], %682 {strides = array<i32>} : memref<1x8x64xf32, #tpu.memory_space<vmem>>, vector<1x8x64xf32>,
    %cst_548 = arith.constant dense<0xFF800000> : vector<8xf32>
    %683 = vector.multi_reduction <maximumf>, %679, %cst_548 [1] : vector<8x64xf32> to vector<8xf32>
    %684 = vector.shape_cast %683 : vector<8xf32> to vector<8x1xf32>
    %685 = vector.broadcast %684 : vector<8x1xf32> to vector<8x64xf32>
    %686 = arith.subf %679, %685 : vector<8x64xf32>
    %687 = math.exp %686 : vector<8x64xf32>
    %cst_549 = arith.constant dense<0.000000e+00> : vector<8xf32>
    %688 = vector.multi_reduction <add>, %687, %cst_549 [1] : vector<8x64xf32> to vector<8xf32>
    %689 = vector.shape_cast %688 : vector<8xf32> to vector<8x1xf32>
    %690 = math.log %689 : vector<8x1xf32>
    %691 = arith.addf %684, %690 : vector<8x1xf32>
    %c0_550 = arith.constant 0 : index
    %c0_551 = arith.constant 0 : index
    %c0_552 = arith.constant 0 : index
    %692 = vector.load %arg5[%c0_550, %c0_551, %c0_552] : memref<1x8x1xi32, #tpu.memory_space<vmem>>, vector<1x8x1xi32>
    %693 = vector.shape_cast %692 : vector<1x8x1xi32> to vector<8x1xi32>
    %694 = vector.broadcast %693 : vector<8x1xi32> to vector<8x64xi32>
    %695 = arith.cmpi eq, %267, %694 : vector<8x64xi32>
    %cst_553 = arith.constant 0.000000e+00 : f32
    %696 = vector.broadcast %cst_553 : f32 to vector<8x64xf32>
    %697 = arith.select %695, %679, %696 : vector<8x64xi1>, vector<8x64xf32>
    %cst_554 = arith.constant dense<0.000000e+00> : vector<8xf32>
    %698 = vector.multi_reduction <add>, %697, %cst_554 [1] : vector<8x64xf32> to vector<8xf32>
    %699 = vector.shape_cast %698 : vector<8xf32> to vector<8x1xf32>
    %700 = arith.subf %691, %699 : vector<8x1xf32>
    %c0_555 = arith.constant 0 : index
    %c0_556 = arith.constant 0 : index
    %c0_557 = arith.constant 0 : index
    %701 = vector.load %arg41[%c0_555, %c0_556, %c0_557] : memref<1x8x1xf32, #tpu.memory_space<vmem>>, vector<1x8x1xf32>
    %702 = vector.shape_cast %701 : vector<1x8x1xf32> to vector<8x1xf32>
    %703 = vector.shape_cast %700 : vector<8x1xf32> to vector<1x8x1xf32>
    tpu.vector_store %arg41[%c0_555, %c0_556, %c0_557], %703 {strides = array<i32>} : memref<1x8x1xf32, #tpu.memory_space<vmem>>, vector<1x8x1xf32>,
    return
  }
  func.func @transform_0(%arg0: i32) -> (i32, i32, i32) {
    %c0_i32 = arith.constant 0 : i32
    %c0_i32_0 = arith.constant 0 : i32
    %c0_i32_1 = arith.constant 0 : i32
    return %arg0, %c0_i32, %c0_i32_0 : i32, i32, i32
  }
  func.func @transform_1(%arg0: i32) -> (i32, i32, i32) {
    %c0_i32 = arith.constant 0 : i32
    %c0_i32_0 = arith.constant 0 : i32
    %c0_i32_1 = arith.constant 0 : i32
    return %arg0, %c0_i32, %c0_i32_0 : i32, i32, i32
  }
  func.func @transform_2(%arg0: i32) -> (i32, i32, i32) {
    %c0_i32 = arith.constant 0 : i32
    %c0_i32_0 = arith.constant 0 : i32
    %c0_i32_1 = arith.constant 0 : i32
    return %arg0, %c0_i32, %c0_i32_0 : i32, i32, i32
  }
  func.func @transform_3(%arg0: i32) -> (i32, i32, i32) {
    %c0_i32 = arith.constant 0 : i32
    %c0_i32_0 = arith.constant 0 : i32
    %c0_i32_1 = arith.constant 0 : i32
    return %arg0, %c0_i32, %c0_i32_0 : i32, i32, i32
  }
  func.func @transform_4(%arg0: i32) -> (i32, i32, i32) {
    %c0_i32 = arith.constant 0 : i32
    %c0_i32_0 = arith.constant 0 : i32
    %c0_i32_1 = arith.constant 0 : i32
    return %arg0, %c0_i32, %c0_i32_0 : i32, i32, i32
  }
  func.func @transform_5(%arg0: i32) -> (i32, i32) {
    %c0_i32 = arith.constant 0 : i32
    %c0_i32_0 = arith.constant 0 : i32
    %c0_i32_1 = arith.constant 0 : i32
    return %c0_i32, %c0_i32_0 : i32, i32
  }
  func.func @transform_6(%arg0: i32) -> (i32, i32) {
    %c0_i32 = arith.constant 0 : i32
    %c0_i32_0 = arith.constant 0 : i32
    %c0_i32_1 = arith.constant 0 : i32
    return %c0_i32, %c0_i32_0 : i32, i32
  }
  func.func @transform_7(%arg0: i32) -> (i32, i32) {
    %c0_i32 = arith.constant 0 : i32
    %c0_i32_0 = arith.constant 0 : i32
    %c0_i32_1 = arith.constant 0 : i32
    return %c0_i32, %c0_i32_0 : i32, i32
  }
  func.func @transform_8(%arg0: i32) -> (i32, i32) {
    %c0_i32 = arith.constant 0 : i32
    %c0_i32_0 = arith.constant 0 : i32
    %c0_i32_1 = arith.constant 0 : i32
    return %c0_i32, %c0_i32_0 : i32, i32
  }
  func.func @transform_9(%arg0: i32) -> (i32, i32) {
    %c0_i32 = arith.constant 0 : i32
    %c0_i32_0 = arith.constant 0 : i32
    %c0_i32_1 = arith.constant 0 : i32
    return %c0_i32, %c0_i32_0 : i32, i32
  }
  func.func @transform_10(%arg0: i32) -> (i32, i32) {
    %c0_i32 = arith.constant 0 : i32
    %c0_i32_0 = arith.constant 0 : i32
    %c0_i32_1 = arith.constant 0 : i32
    return %c0_i32, %c0_i32_0 : i32, i32
  }
  func.func @transform_11(%arg0: i32) -> (i32, i32) {
    %c0_i32 = arith.constant 0 : i32
    %c0_i32_0 = arith.constant 0 : i32
    %c0_i32_1 = arith.constant 0 : i32
    return %c0_i32, %c0_i32_0 : i32, i32
  }
  func.func @transform_12(%arg0: i32) -> (i32, i32) {
    %c0_i32 = arith.constant 0 : i32
    %c0_i32_0 = arith.constant 0 : i32
    %c0_i32_1 = arith.constant 0 : i32
    return %c0_i32, %c0_i32_0 : i32, i32
  }
  func.func @transform_13(%arg0: i32) -> (i32, i32) {
    %c0_i32 = arith.constant 0 : i32
    %c0_i32_0 = arith.constant 0 : i32
    %c0_i32_1 = arith.constant 0 : i32
    return %c0_i32, %c0_i32_0 : i32, i32
  }
  func.func @transform_14(%arg0: i32) -> (i32, i32) {
    %c0_i32 = arith.constant 0 : i32
    %c0_i32_0 = arith.constant 0 : i32
    %c0_i32_1 = arith.constant 0 : i32
    return %c0_i32, %c0_i32_0 : i32, i32
  }
  func.func @transform_15(%arg0: i32) -> (i32, i32, i32) {
    %c0_i32 = arith.constant 0 : i32
    %c0_i32_0 = arith.constant 0 : i32
    %c0_i32_1 = arith.constant 0 : i32
    %c0_i32_2 = arith.constant 0 : i32
    return %c0_i32, %c0_i32_0, %c0_i32_1 : i32, i32, i32
  }
  func.func @transform_16(%arg0: i32) -> (i32, i32, i32, i32) {
    %c0_i32 = arith.constant 0 : i32
    %c0_i32_0 = arith.constant 0 : i32
    %c0_i32_1 = arith.constant 0 : i32
    %c0_i32_2 = arith.constant 0 : i32
    %c0_i32_3 = arith.constant 0 : i32
    return %c0_i32, %c0_i32_0, %c0_i32_1, %c0_i32_2 : i32, i32, i32, i32
  }
  func.func @transform_17(%arg0: i32) -> (i32, i32, i32, i32) {
    %c0_i32 = arith.constant 0 : i32
    %c0_i32_0 = arith.constant 0 : i32
    %c0_i32_1 = arith.constant 0 : i32
    %c0_i32_2 = arith.constant 0 : i32
    %c0_i32_3 = arith.constant 0 : i32
    return %c0_i32, %c0_i32_0, %c0_i32_1, %c0_i32_2 : i32, i32, i32, i32
  }
  func.func @transform_18(%arg0: i32) -> (i32, i32, i32) {
    %c0_i32 = arith.constant 0 : i32
    %c0_i32_0 = arith.constant 0 : i32
    %c0_i32_1 = arith.constant 0 : i32
    %c0_i32_2 = arith.constant 0 : i32
    return %c0_i32, %c0_i32_0, %c0_i32_1 : i32, i32, i32
  }
  func.func @transform_19(%arg0: i32) -> (i32, i32) {
    %c0_i32 = arith.constant 0 : i32
    %c0_i32_0 = arith.constant 0 : i32
    %c0_i32_1 = arith.constant 0 : i32
    return %c0_i32, %c0_i32_0 : i32, i32
  }
  func.func @transform_20(%arg0: i32) -> (i32, i32) {
    %c0_i32 = arith.constant 0 : i32
    %c0_i32_0 = arith.constant 0 : i32
    %c0_i32_1 = arith.constant 0 : i32
    return %c0_i32, %c0_i32_0 : i32, i32
  }
  func.func @transform_21(%arg0: i32) -> (i32, i32) {
    %c0_i32 = arith.constant 0 : i32
    %c0_i32_0 = arith.constant 0 : i32
    %c0_i32_1 = arith.constant 0 : i32
    return %c0_i32, %c0_i32_0 : i32, i32
  }
  func.func @transform_22(%arg0: i32) -> (i32, i32) {
    %c0_i32 = arith.constant 0 : i32
    %c0_i32_0 = arith.constant 0 : i32
    %c0_i32_1 = arith.constant 0 : i32
    return %c0_i32, %c0_i32_0 : i32, i32
  }
  func.func @transform_23(%arg0: i32) -> (i32, i32) {
    %c0_i32 = arith.constant 0 : i32
    %c0_i32_0 = arith.constant 0 : i32
    %c0_i32_1 = arith.constant 0 : i32
    return %c0_i32, %c0_i32_0 : i32, i32
  }
  func.func @transform_24(%arg0: i32) -> (i32, i32) {
    %c0_i32 = arith.constant 0 : i32
    %c0_i32_0 = arith.constant 0 : i32
    %c0_i32_1 = arith.constant 0 : i32
    return %c0_i32, %c0_i32_0 : i32, i32
  }
  func.func @transform_25(%arg0: i32) -> (i32, i32, i32, i32) {
    %c0_i32 = arith.constant 0 : i32
    %c0_i32_0 = arith.constant 0 : i32
    %c0_i32_1 = arith.constant 0 : i32
    %c0_i32_2 = arith.constant 0 : i32
    %c0_i32_3 = arith.constant 0 : i32
    return %c0_i32, %c0_i32_0, %c0_i32_1, %c0_i32_2 : i32, i32, i32, i32
  }
  func.func @transform_26(%arg0: i32) -> (i32, i32, i32, i32) {
    %c0_i32 = arith.constant 0 : i32
    %c0_i32_0 = arith.constant 0 : i32
    %c0_i32_1 = arith.constant 0 : i32
    %c0_i32_2 = arith.constant 0 : i32
    %c0_i32_3 = arith.constant 0 : i32
    return %c0_i32, %c0_i32_0, %c0_i32_1, %c0_i32_2 : i32, i32, i32, i32
  }
  func.func @transform_27(%arg0: i32) -> (i32, i32, i32) {
    %c0_i32 = arith.constant 0 : i32
    %c0_i32_0 = arith.constant 0 : i32
    %c0_i32_1 = arith.constant 0 : i32
    %c0_i32_2 = arith.constant 0 : i32
    return %c0_i32, %c0_i32_0, %c0_i32_1 : i32, i32, i32
  }
  func.func @transform_28(%arg0: i32) -> (i32, i32) {
    %c0_i32 = arith.constant 0 : i32
    %c0_i32_0 = arith.constant 0 : i32
    %c0_i32_1 = arith.constant 0 : i32
    return %c0_i32, %c0_i32_0 : i32, i32
  }
  func.func @transform_29(%arg0: i32) -> (i32, i32, i32, i32) {
    %c0_i32 = arith.constant 0 : i32
    %c0_i32_0 = arith.constant 0 : i32
    %c0_i32_1 = arith.constant 0 : i32
    %c0_i32_2 = arith.constant 0 : i32
    %c0_i32_3 = arith.constant 0 : i32
    return %c0_i32, %c0_i32_0, %c0_i32_1, %c0_i32_2 : i32, i32, i32, i32
  }
  func.func @transform_30(%arg0: i32) -> (i32, i32, i32, i32) {
    %c0_i32 = arith.constant 0 : i32
    %c0_i32_0 = arith.constant 0 : i32
    %c0_i32_1 = arith.constant 0 : i32
    %c0_i32_2 = arith.constant 0 : i32
    %c0_i32_3 = arith.constant 0 : i32
    return %c0_i32, %c0_i32_0, %c0_i32_1, %c0_i32_2 : i32, i32, i32, i32
  }
  func.func @transform_31(%arg0: i32) -> (i32, i32, i32) {
    %c0_i32 = arith.constant 0 : i32
    %c0_i32_0 = arith.constant 0 : i32
    %c0_i32_1 = arith.constant 0 : i32
    %c0_i32_2 = arith.constant 0 : i32
    return %c0_i32, %c0_i32_0, %c0_i32_1 : i32, i32, i32
  }
  func.func @transform_32(%arg0: i32) -> (i32, i32) {
    %c0_i32 = arith.constant 0 : i32
    %c0_i32_0 = arith.constant 0 : i32
    %c0_i32_1 = arith.constant 0 : i32
    return %c0_i32, %c0_i32_0 : i32, i32
  }
  func.func @transform_33(%arg0: i32) -> (i32, i32) {
    %c0_i32 = arith.constant 0 : i32
    %c0_i32_0 = arith.constant 0 : i32
    %c0_i32_1 = arith.constant 0 : i32
    return %c0_i32, %c0_i32_0 : i32, i32
  }
  func.func @transform_34(%arg0: i32) -> (i32, i32) {
    %c0_i32 = arith.constant 0 : i32
    %c0_i32_0 = arith.constant 0 : i32
    %c0_i32_1 = arith.constant 0 : i32
    return %c0_i32, %c0_i32_0 : i32, i32
  }
  func.func @transform_35(%arg0: i32) -> (i32, i32) {
    %c0_i32 = arith.constant 0 : i32
    %c0_i32_0 = arith.constant 0 : i32
    %c0_i32_1 = arith.constant 0 : i32
    return %c0_i32, %c0_i32_0 : i32, i32
  }
  func.func @transform_36(%arg0: i32) -> (i32, i32) {
    %c0_i32 = arith.constant 0 : i32
    %c0_i32_0 = arith.constant 0 : i32
    %c0_i32_1 = arith.constant 0 : i32
    return %c0_i32, %c0_i32_0 : i32, i32
  }
  func.func @transform_37(%arg0: i32) -> (i32, i32) {
    %c0_i32 = arith.constant 0 : i32
    %c0_i32_0 = arith.constant 0 : i32
    %c0_i32_1 = arith.constant 0 : i32
    return %c0_i32, %c0_i32_0 : i32, i32
  }
  func.func @transform_38(%arg0: i32) -> (i32, i32) {
    %c0_i32 = arith.constant 0 : i32
    %c0_i32_0 = arith.constant 0 : i32
    %c0_i32_1 = arith.constant 0 : i32
    return %c0_i32, %c0_i32_0 : i32, i32
  }
  func.func @transform_39(%arg0: i32) -> (i32, i32, i32) {
    %c0_i32 = arith.constant 0 : i32
    %c0_i32_0 = arith.constant 0 : i32
    %c0_i32_1 = arith.constant 0 : i32
    return %arg0, %c0_i32, %c0_i32_0 : i32, i32, i32
  }
  func.func @transform_40(%arg0: i32) -> (i32, i32, i32) {
    %c0_i32 = arith.constant 0 : i32
    %c0_i32_0 = arith.constant 0 : i32
    %c0_i32_1 = arith.constant 0 : i32
    return %arg0, %c0_i32, %c0_i32_0 : i32, i32, i32
  }
}

</mosaic_0001>

<bundles_post_ra>
// kernel: aligned_t5_forward.1
= control target key start
LH: loop header
LB: loop body
LE: loop exit
PB: predicated region body
PF: predicated region fallthrough
CT: control target
= control target key end

     0   :  { %s5029_s6 = smov 1   ;;  %s5030_s10 = smov 2   ;;  %s5909_s0 = inlined_call_operand.smem [shape: u32[41], index: -1, kind: input, shape index: {}] }
   0x1   :  { %s5081_s5 = sld [smem:[%s5909_s0]]   ;;  %s5031_s14 = smov 3  }
   0x2   :  { %s5086_s9 = sld [smem:[%s5909_s0 + %s5029_s6]]   ;;  %s5032_s18 = smov 4  }
   0x3   :  { %s5091_s13 = sld [smem:[%s5909_s0 + %s5030_s10]]   ;;  %s5033_s22 = smov 5  }
   0x4   :  { %s5096_s17 = sld [smem:[%s5909_s0 + %s5031_s14]]   ;;  %s5034_s26 = smov 6  }
   0x5   :  { %s5101_s21 = sld [smem:[%s5909_s0 + %s5032_s18]]   ;;  %s5035_s30 = smov 7  }
   0x6   :  { %s5106_s25 = sld [smem:[%s5909_s0 + %s5033_s22]]   ;;  %s5036_s4 = smov 8  }
   0x7   :  { %5939 = sst [smem:[#allocation5_spill]] %s5081_s5  ;;  %s5037_s10 = smov 9  }
   0x8   :  { %5940 = sst [smem:[#allocation6_spill]] %s5086_s9  ;;  %s5038_s15 = smov 10  }
   0x9   :  { %5941 = sst [smem:[#allocation7_spill]] %s5091_s13  ;;  %s5039_s20 = smov 11  }
   0xa   :  { %5942 = sst [smem:[#allocation8_spill]] %s5096_s17  ;;  %s5041_s1 = smov 13  }
   0xb   :  { %5943 = sst [smem:[#allocation9_spill]] %s5101_s21  ;;  %s5042_s7 = smov 14  }
   0xc   :  { %s5111_s29 = sld [smem:[%s5909_s0 + %s5034_s26]]   ;;  %s5040_s26 = smov 12  }
   0xd   :  { %s5116_s3 = sld [smem:[%s5909_s0 + %s5035_s30]]   ;;  %s5044_s22 = smov 16  }
   0xe   :  { %s5121_s8 = sld [smem:[%s5909_s0 + %s5036_s4]]   ;;  %s5045_s28 = smov 17  }
   0xf   :  { %s5126_s14 = sld [smem:[%s5909_s0 + %s5037_s10]]  }
  0x10   :  { %s5131_s19 = sld [smem:[%s5909_s0 + %s5038_s15]]   ;;  %s5043_s15 = smov 15  }
  0x11   :  { %s5136_s24 = sld [smem:[%s5909_s0 + %s5039_s20]]  }
  0x12   :  { %s5141_s30 = sld [smem:[%s5909_s0 + %s5040_s26]]  }
  0x13   :  { %5944 = sst [smem:[#allocation10_spill]] %s5116_s3 }
  0x14   :  { %5945 = sst [smem:[#allocation11_spill]] %s5121_s8 }
  0x15   :  { %5946 = sst [smem:[#allocation12_spill]] %s5126_s14 }
  0x16   :  { %s5146_s6 = sld [smem:[%s5909_s0 + %s5041_s1]]  }
  0x17   :  { %s5151_s12 = sld [smem:[%s5909_s0 + %s5042_s7]]   ;;  %s5046_s7 = smov 18  }
  0x18   :  { %s5156_s20 = sld [smem:[%s5909_s0 + %s5043_s15]]   ;;  %s5047_s15 = smov 19  }
  0x19   :  { %s5161_s27 = sld [smem:[%s5909_s0 + %s5044_s22]]   ;;  %s5048_s22 = smov 20  }
  0x1a   :  { %s5166_s4 = sld [smem:[%s5909_s0 + %s5045_s28]]   ;;  %s5049_s28 = smov 21  }
  0x1b   :  { %s5171_s21 = sld [smem:[%s5909_s0 + %s5046_s7]]   ;;  %s5050_s7 = smov 22  }
  0x1c   :  { %5947 = sst [smem:[#allocation13_spill]] %s5146_s6 }
  0x1d   :  { %5948 = sst [smem:[#allocation14_spill]] %s5151_s12 }
  0x1e   :  { %s5176_s17 = sld [smem:[%s5909_s0 + %s5047_s15]]   ;;  %s5051_s15 = smov 23  }
  0x1f   :  { %s5181_s13 = sld [smem:[%s5909_s0 + %s5048_s22]]   ;;  %s5052_s22 = smov 24  }
  0x20   :  { %5949 = sst [smem:[#allocation15_spill]] %s5166_s4 }
  0x21   :  { %5950 = sst [smem:[#allocation16_spill]] %s5171_s21 }
  0x22   :  { %s5186_s4 = sld [smem:[%s5909_s0 + %s5049_s28]]   ;;  %s5053_s28 = smov 25  }
  0x23   :  { %s5191_s21 = sld [smem:[%s5909_s0 + %s5050_s7]]   ;;  %s5054_s7 = smov 26  }
  0x24   :  { %5951 = sst [smem:[#allocation17_spill]] %s5176_s17 }
  0x25   :  { %5952 = sst [smem:[#allocation18_spill]] %s5181_s13 }
  0x26   :  { %s5196_s17 = sld [smem:[%s5909_s0 + %s5051_s15]]   ;;  %s5055_s15 = smov 27  }
  0x27   :  { %s5201_s13 = sld [smem:[%s5909_s0 + %s5052_s22]]   ;;  %s5056_s22 = smov 28  }
  0x28   :  { %5953 = sst [smem:[#allocation19_spill]] %s5186_s4 }
  0x29   :  { %5954 = sst [smem:[#allocation20_spill]] %s5191_s21 }
  0x2a   :  { %s5206_s4 = sld [smem:[%s5909_s0 + %s5053_s28]]   ;;  %s5057_s28 = smov 29  }
  0x2b   :  { %s5211_s21 = sld [smem:[%s5909_s0 + %s5054_s7]]   ;;  %s5058_s7 = smov 30  }
  0x2c   :  { %5955 = sst [smem:[#allocation21_spill]] %s5196_s17 }
  0x2d   :  { %5956 = sst [smem:[#allocation22_spill]] %s5201_s13 }
  0x2e   :  { %s5216_s17 = sld [smem:[%s5909_s0 + %s5055_s15]]   ;;  %s5059_s15 = smov 31  }
  0x2f   :  { %s5221_s13 = sld [smem:[%s5909_s0 + %s5056_s22]]   ;;  %s5060_s22 = smov 32  }
  0x30   :  { %5957 = sst [smem:[#allocation23_spill]] %s5206_s4 }
  0x31   :  { %5958 = sst [smem:[#allocation24_spill]] %s5211_s21 }
  0x32   :  { %s5226_s4 = sld [smem:[%s5909_s0 + %s5057_s28]]   ;;  %s5061_s28 = smov 33  }
  0x33   :  { %s5231_s21 = sld [smem:[%s5909_s0 + %s5058_s7]]   ;;  %s5062_s7 = smov 34  }
  0x34   :  { %5959 = sst [smem:[#allocation25_spill]] %s5216_s17 }
  0x35   :  { %5960 = sst [smem:[#allocation26_spill]] %s5221_s13 }
  0x36   :  { %s5236_s17 = sld [smem:[%s5909_s0 + %s5059_s15]]   ;;  %s5063_s15 = smov 35  }
  0x37   :  { %s5241_s13 = sld [smem:[%s5909_s0 + %s5060_s22]]   ;;  %s5064_s22 = smov 36  }
  0x38   :  { %5961 = sst [smem:[#allocation27_spill]] %s5226_s4 }
  0x39   :  { %5962 = sst [smem:[#allocation28_spill]] %s5231_s21 }
  0x3a   :  { %s5246_s4 = sld [smem:[%s5909_s0 + %s5061_s28]]   ;;  %s5065_s28 = smov 37  }
  0x3b   :  { %s5251_s21 = sld [smem:[%s5909_s0 + %s5062_s7]]   ;;  %s5066_s7 = smov 38  }
  0x3c   :  { %5963 = sst [smem:[#allocation29_spill]] %s5236_s17 }
  0x3d   :  { %5964 = sst [smem:[#allocation30_spill]] %s5241_s13 }
  0x3e   :  { %s5256_s17 = sld [smem:[%s5909_s0 + %s5063_s15]]   ;;  %s5067_s15 = smov 39  }
  0x3f   :  { %s5261_s13 = sld [smem:[%s5909_s0 + %s5064_s22]]   ;;  %s5068_s22 = smov 40  }
  0x40   :  { %5965 = sst [smem:[#allocation31_spill]] %s5246_s4 }
  0x41   :  { %5966 = sst [smem:[#allocation32_spill]] %s5251_s21 }
  0x42   :  { %s5266_s4 = sld [smem:[%s5909_s0 + %s5065_s28]]  }
  0x43   :  { %s5271_s21 = sld [smem:[%s5909_s0 + %s5066_s7]]  }
  0x44   :  { %5967 = sst [smem:[#allocation33_spill]] %s5256_s17 }
  0x45   :  { %5968 = sst [smem:[#allocation34_spill]] %s5261_s13 }
  0x46   :  { %s5276_s17 = sld [smem:[%s5909_s0 + %s5067_s15]]  }
  0x47   :  { %s5281_s13 = sld [smem:[%s5909_s0 + %s5068_s22]]  }
  0x48   :  { %5969 = sst [smem:[#allocation35_spill]] %s5266_s4 }
  0x49   :  { %87 = vsyncpa [#allocation3], 0 }
  0x4a   :  { %89 = vsyncpa [#allocation3 + $0x1], 0  ;;  %s5283_s28 = smov 0   ;;  %s5285_s1 = smov 0  }
  0x4b   :  { %s5287_s2 = smov 0   ;;  %s5289_s7 = smov 0  }
  0x4c LB: > { %s5970_s14 = sld [smem:[#allocation12_spill]]  ;;  %s5304_s0 = sadd.s32 4294967295, %s5027_s7   ;;  %s5027_s7 = sphi %s5289_s7, %s6006_s7   ;;  %s5023_s2 = sphi %s5287_s2, %s6005_s2   ;;  %s5019_s1 = sphi %s5285_s1, %s6004_s1   ;;  %s5015_s28 = sphi %s5283_s28, %s6003_s28  }
  0x4d   : > { %s5971_s4 = sld [smem:[#allocation35_spill]]  ;;  %s4466_s10 = sadd.s32 4294967294, %s5027_s7  }
  0x4e   : > { %s5972_s6 = sld [smem:[#allocation13_spill]]  ;;  %s5308_s11 = sadd.s32 1, %s5027_s7  }
  0x4f   : > { %s5973_s3 = sld [smem:[#allocation10_spill]]  ;;  %s946_s15 = sadd.s32 1, %s5023_s2 }
  0x50   : > { %s943_s16 = ssub.s32 %s5027_s7, %s5308_s11  ;;  %p956_p0 = scmp.ne.s32.totalorder %s5023_s2, %s5019_s1 }
  0x51   : > { %p944_p1 = scmp.eq.s32.totalorder %s943_s16, 0  ;;  %p957_p2 = scmp.eq.s32.totalorder %s5304_s0, 1 }
  0x52   : > { %p962_p3 = scmp.ne.s32.totalorder %s5019_s1, %s5015_s28  ;;  %p963_p4 = scmp.eq.s32.totalorder %s4466_s10, 1 }
  0x53   : > { %s5319_s18 = scalar_select %p944_p1, %s5023_s2, %s946_s15  }
  0x54   : > { %p5321_p5 = por %p957_p2, %p956_p0  ;;  %p5325_p6 = por %p963_p4, %p962_p3 }
  0x55   : > { %p4469_p7 = scmp.ge.s32.totalorder %s5027_s7, 1  ;;  %p1143_p8 = scmp.lt.s32.totalorder %s5027_s7, 3 }
  0x57   : > { %p1144_p9 = pnand %p4469_p7, %p1143_p8 }
  0x58   : > { %p1259_p10 = scmp.lt.s32.totalorder (!%p1144_p9), %s5304_s0, 1  ;;  %s5976_s5 = sld [smem:[#allocation5_spill]] (!%p1144_p9) }
  0x59   : > { %1147 = sbr.rel (%p1144_p9) target bundleno = 9139 (0x23b3), region = 176  ;;  %s5977_s8 = sld [smem:[#allocation11_spill]] (!%p1144_p9) }
  0x5a   : > { %s5978_s9 = sld [smem:[#allocation6_spill]] (!%p1144_p9) }
  0x5b   : > { %s5979_s12 = sld [smem:[#allocation14_spill]] (!%p1144_p9) }
  0x5e   : > { %v1331_v0 = vld [vmem:[%s5973_s3 + $0x78] sm:$0xff]  ;;  %v1330_v1 = vld [vmem:[%s5973_s3 + $0x70] sm:$0xff]  ;;  %v1329_v2 = vld [vmem:[%s5973_s3 + $0x68] sm:$0xff]  ;;  %s5337_s26 = scalar_select %p1259_p10, %s5304_s0, 1  ;;  %v5069_v17 = vmov 0   ;;  %vm1387_vm0 = vcmask 1043456  }
  0x5f   : > { %1336 = vmatpush.msra.mxu1 %v1331_v0  ;;  %v1328_v3 = vld [vmem:[%s5973_s3 + $0x60] sm:$0xff]  ;;  %v1327_v4 = vld [vmem:[%s5973_s3 + $0x58] sm:$0xff]  ;;  %v1326_v5 = vld [vmem:[%s5973_s3 + $0x50] sm:$0xff]  ;;  %4841 = vset.pattern.permute.xlu0 %v5069_v17  ;;  %vm1377_vm1 = vcmask 31744   ;;  %vm1291_vm2 = vcmask 261120   ;;  %vm1499_vm3 = vcmask 195584  }
  0x60   : > { %v1325_v6 = vld [vmem:[%s5973_s3 + $0x48] sm:$0xff]  ;;  %s4471_s10 = sshll.u32 %s5337_s26, 2  ;;  %v1324_v7 = vld [vmem:[%s5973_s3 + $0x40] sm:$0xff]  ;;  %v1323_v8 = vld [vmem:[%s5973_s3 + $0x38] sm:$0xff]  ;;  %4842 = vset.pattern.permute.xlu1 %v5069_v17  ;;  %s5377_s16 = sshll.u32 %s5337_s26, 3  ;;  %vm1523_vm4 = vcmask 130048  }
  0x61   : > { %1337 = vmatpush.msra.mxu1 %v1330_v1  ;;  %v1322_v9 = vld [vmem:[%s5973_s3 + $0x30] sm:$0xff]  ;;  %v1321_v10 = vld [vmem:[%s5973_s3 + $0x28] sm:$0xff]  ;;  %v1320_v11 = vld [vmem:[%s5973_s3 + $0x20] sm:$0xff]  ;;  %s1262_s15 = scalar_lea.vmem %s5976_s5, %s4471_s10  ;;  %s1266_s10 = scalar_lea.vmem %s5978_s9, %s5377_s16  ;;  %vm1682_vm9 = vcmask 64512  }
  0x62   : > { %v1319_v12 = vld [vmem:[%s5973_s3 + $0x18] sm:$0xff]  ;;  %v1318_v13 = vld [vmem:[%s5973_s3 + $0x10] sm:$0xff]  ;;  %v1317_v14 = vld [vmem:[%s5973_s3 + $0x8] sm:$0xff]  ;;  %s5982_s5 = sld [smem:[#allocation16_spill]] }
  0x63   : > { %1338 = vmatpush.msra.mxu1 %v1329_v2  ;;  %v1316_v15 = vld [vmem:[%s5973_s3] sm:$0xff]  ;;  %v1360_v19 = vld [vmem:[%s5131_s19 + $0x8] sm:$0xff]  ;;  %v1361_v20 = vld [vmem:[%s5131_s19 + $0x10] sm:$0xff] }
  0x64   : > { %v1315_v16 = vld [vmem:[%s1262_s15] sm:$0xf]  ;;  %v1435_v21 = vld [vmem:[%s5136_s24 + $0x78] sm:$0xff]  ;;  %1374 = vperm.xlu1 %4842, %v1361_v20   ;;  %v1434_v22 = vld [vmem:[%s5136_s24 + $0x70] sm:$0xff]  ;;  %s5980_s15 = sld [smem:[#allocation15_spill]] }
  0x65   : > { %1339 = vmatpush.msra.mxu1 %v1328_v3  ;;  %v1359_v18 = vld [vmem:[%s5131_s19] sm:$0xff]  ;;  %1436 = vmatpush.msra.mxu3 %v1435_v21  ;;  %v1433_v23 = vld [vmem:[%s5136_s24 + $0x68] sm:$0xff]  ;;  %v1431_v25 = vld [vmem:[%s5136_s24 + $0x58] sm:$0xff] }
  0x66   : > { %1364 = vperm.xlu0 %4841, %v1359_v18   ;;  %v1432_v24 = vld [vmem:[%s5136_s24 + $0x60] sm:$0xff]  ;;  %v1430_v27 = vld [vmem:[%s5136_s24 + $0x50] sm:$0xff]  ;;  %v1429_v28 = vld [vmem:[%s5136_s24 + $0x48] sm:$0xff] }
  0x67   : > { %1340 = vmatpush.msra.mxu1 %v1327_v4  ;;  %1437 = vmatpush.msra.mxu3 %v1434_v22  ;;  %v4843_v26 = vld [vmem:[%s5977_s8] ss:$0 sm:$0xff]  ;;  %v1427_v33 = vld [vmem:[%s5136_s24 + $0x38] sm:$0xff]  ;;  %v1426_v34 = vld [vmem:[%s5136_s24 + $0x30] sm:$0xff]  ;;  %s5991_s8 = sld [smem:[#allocation25_spill]] }
  0x68   : > { %v1356_v31 = vld [vmem:[%s5970_s14] sm:$0xff]  ;;  %v1357_v35 = vld [vmem:[%s5970_s14 + $0x8] sm:$0xff]  ;;  %v1358_v36 = vld [vmem:[%s5970_s14 + $0x10] sm:$0xff] }
  0x69   : > { %1341 = vmatpush.msra.mxu1 %v1326_v5  ;;  %1438 = vmatpush.msra.mxu3 %v1433_v23  ;;  %v1428_v32 = vld [vmem:[%s5136_s24 + $0x40] sm:$0xff]  ;;  %v1425_v37 = vld [vmem:[%s5136_s24 + $0x28] sm:$0xff]  ;;  %v1423_v39 = vld [vmem:[%s5136_s24 + $0x18] sm:$0xff] }
  0x6a   : > { %v1424_v38 = vld [vmem:[%s5136_s24 + $0x20] sm:$0xff]  ;;  %v1422_v40 = vld [vmem:[%s5136_s24 + $0x10] sm:$0xff]  ;;  %v1421_v41 = vld [vmem:[%s5136_s24 + $0x8] sm:$0xff] }
  0x6b   : > { %1342 = vmatpush.msra.mxu1 %v1325_v6  ;;  %1439 = vmatpush.msra.mxu3 %v1432_v24  ;;  %v1420_v42 = vld [vmem:[%s5136_s24] sm:$0xff]  ;;  %v1286_v55 = vld [vmem:[%s5106_s25 + $0x18] sm:$0xff]  ;;  %v1285_v56 = vld [vmem:[%s5106_s25 + $0x10] sm:$0xff] }
  0x6c   : > { %1307 = vmatpush.msra.mxu0 %v1286_v55  ;;  %v1284_v57 = vld [vmem:[%s5106_s25 + $0x8] sm:$0xff]  ;;  %v1283_v58 = vld [vmem:[%s5106_s25] sm:$0xff]  ;;  %v1498_v60 = vld [vmem:[%s5972_s6 + $0x10] sm:$0xff] }
  0x6d   : > { %1343 = vmatpush.msra.mxu1 %v1324_v7  ;;  %1440 = vmatpush.msra.mxu3 %v1431_v25  ;;  %v1282_v59 = vld [vmem:[%s1266_s10] sm:$0xff]  ;;  %v1497_v61 = vld [vmem:[%s5972_s6 + $0x8] sm:$0xff]  ;;  %v4487_v20 = vld [vmem:[%s5161_s27 + $0x98] sm:$0xff]  ;;  %s5981_s10 = sld [smem:[#allocation7_spill]] }
  0x6e   : > { %1369 = vperm.xlu0 %4841, %v1360_v19   ;;  %1308 = vmatpush.msra.mxu0 %v1285_v56  ;;  %v1496_v62 = vld [vmem:[%s5972_s6] sm:$0xff]  ;;  %v1463_v2 = vld [vmem:[%s5141_s30 + $0x8] sm:$0xff]  ;;  %v1594_v19 = vld [vmem:[%s5161_s27 + $0x18] sm:$0xff]  ;;  %s5990_s6 = sld [smem:[#allocation24_spill]] }
  0x6f   : > { %1344 = vmatpush.msra.mxu1 %v1323_v8  ;;  %1441 = vmatpush.msra.mxu3 %v1430_v27  ;;  %v1462_v3 = vld [vmem:[%s5141_s30] sm:$0xff]  ;;  %v4509_v21 = vld [vmem:[%s5161_s27 + $0xb8] sm:$0xff]  ;;  %v1593_v22 = vld [vmem:[%s5161_s27 + $0x10] sm:$0xff] }
  0x70   : > { %1309 = vmatpush.msra.mxu0 %v1284_v57  ;;  %v4844_v5 = vld [vmem:[%s5111_s29] ss:$0 sm:$0xff]  ;;  %v4486_v23 = vld [vmem:[%s5161_s27 + $0x90] sm:$0xff]  ;;  %v4485_v27 = vld [vmem:[%s5161_s27 + $0x88] sm:$0xff] }
  0x71   : > { %1345 = vmatpush.msra.mxu1 %v1322_v9  ;;  %1442 = vmatpush.msra.mxu3 %v1429_v28  ;;  %v4845_v9 = vld [vmem:[%s5979_s12] ss:$0 sm:$0xff]  ;;  %v4508_v24 = vld [vmem:[%s5161_s27 + $0xb0] sm:$0xff]  ;;  %v4507_v28 = vld [vmem:[%s5161_s27 + $0xa8] sm:$0xff] }
  0x72   : > { %1310 = vmatpush.msra.mxu0 %v1283_v58  ;;  %v4849_v55 = vld [vmem:[%s5980_s15] ss:$0 sm:$0xff]  ;;  %v4502_v56 = vld [vmem:[%s5161_s27 + $0x30] sm:$0xff]  ;;  %v4848_v57 = vld [vmem:[%s5980_s15 + $0x5] ss:$0 sm:$0xff] }
  0x73   : > { %1346 = vmatpush.msra.mxu1 %v1321_v10  ;;  %1443 = vmatpush.msra.mxu3 %v1428_v32  ;;  %v4501_v58 = vld [vmem:[%s5161_s27 + $0x28] sm:$0xff]  ;;  %s1269_s3 = scalar_lea.vmem %s5981_s10, %s5337_s26  ;;  %s5984_s10 = sld [smem:[#allocation17_spill]] }
  0x74   : > { %4476 = vmatmul.msk.f32.vlgmr.msra.gmra.mxu0 %vm1291_vm2, %v1282_v59 }
  0x75   : > { %1347 = vmatpush.msra.mxu1 %v1320_v11  ;;  %1444 = vmatpush.msra.mxu3 %v1427_v33  ;;  %v4493_v33 = vld [vmem:[%s5161_s27 + $0x118] sm:$0xff] }
  0x76   : > { %1516 = vmatpush.msrb.mxu0 %v1498_v60 }
  0x77   : > { %1348 = vmatpush.msra.mxu1 %v1319_v12  ;;  %1445 = vmatpush.msra.mxu3 %v1426_v34  ;;  %v4492_v34 = vld [vmem:[%s5161_s27 + $0x110] sm:$0xff] }
  0x78   : > { %1517 = vmatpush.msrb.mxu0 %v1497_v61 }
  0x79   : > { %1349 = vmatpush.msra.mxu1 %v1318_v13  ;;  %1446 = vmatpush.msra.mxu3 %v1425_v37 }
  0x7a   : > { %1518 = vmatpush.msrb.mxu0 %v1496_v62  ;;  %v4500_v62 = vld [vmem:[%s5161_s27 + $0x20] sm:$0xff] }
  0x7b   : > { %1350 = vmatpush.msra.mxu1 %v1317_v14  ;;  %1447 = vmatpush.msra.mxu3 %v1424_v38  ;;  %v4490_v38 = vld [vmem:[%s5161_s27 + $0x100] sm:$0xff] }
  0x7c   : > { %1541 = vmatpush.msra.mxu0 %v1463_v2 }
  0x7d   : > { %1351 = vmatpush.msra.mxu1 %v1316_v15  ;;  %1448 = vmatpush.msra.mxu3 %v1423_v39  ;;  %v5070_v15 = vmov 32.0  }
  0x7e   : > { %1352 = vmatmul.f32.vlgmr.msra.gmra.mxu1 %v1315_v16  ;;  %1542 = vmatpush.msra.mxu0 %v1462_v3  ;;  %4897 = vrcp.f32 %v5070_v15  ;;  %v4532_v3 = vld [vmem:[%s5161_s27 + $0xd8] sm:$0xff] }
  0x7f   : > { %1449 = vmatpush.msra.mxu3 %v1422_v40  ;;  %1841 = vmatpush.msrb.mxu1 %v4509_v21 }
  0x81   : > { %1450 = vmatpush.msra.mxu3 %v1421_v41  ;;  %1842 = vmatpush.msrb.mxu1 %v4508_v24 }
  0x83   : > { %1451 = vmatpush.msra.mxu3 %v1420_v42  ;;  %1843 = vmatpush.msrb.mxu1 %v4507_v28 }
  0x84   : > { %v4898_v16 = vpop.eup %4897 }
  0x85   : > { %v1566_v17 = vmul.f32 32.0, %v4898_v16  ;;  %vm1570_vm5 = vweird.f32 %v4898_v16 }
  0x87   : > { %v1567_v18 = vsub.f32 1.0, %v1566_v17 }
  0x89   : > { %v1568_v25 = vmul.f32 %v4898_v16, %v1567_v18 }
  0x8b   : > { %v1569_v32 = vadd.f32 %v4898_v16, %v1568_v25 }
  0xd6   : > { %v1375_v51 = vpop.permute.xlu1 %1374 }
  0xd8   : > { %v1365_v43 = vpop.permute.xlu0 %1364 }
  0xe0   : > { %v1370_v47 = vpop.permute.xlu0 %1369 }
  0xf1   : > { %v1312_v6 = vpop.f32.mrf.mxu0 }
  0xf2   : > { %v1313_v7 = vadd.f32 %v4844_v5, %v1312_v6  ;;  %v4530_v5 = vld [vmem:[%s5161_s27 + $0xc8] sm:$0xff]  ;;  %v4529_v6 = vld [vmem:[%s5161_s27 + $0xc0] sm:$0xff] }
  0xfb   : > { %v1353_v29 = vpop.f32.mrf.mxu1 }
  0xfc   : > { %v1354_v30 = vadd.f32 %v4843_v26, %v1353_v29  ;;  %v1592_v26 = vld [vmem:[%s5161_s27 + $0x8] sm:$0xff]  ;;  %v1591_v29 = vld [vmem:[%s5161_s27] sm:$0xff] }
  0xfe   : > { %4477 = vmatpush.msk.msra.mxu2 %vm1387_vm0, %v1354_v30  ;;  %v4484_v30 = vld [vmem:[%s5161_s27 + $0x80] sm:$0xff] }
  0xff   : > { %4478 = vmatmul.msk.f32.vlgmr.msra.gmra.mxu2 %vm1377_vm1, %v1356_v31  ;;  %v4506_v31 = vld [vmem:[%s5161_s27 + $0xa0] sm:$0xff] }
 0x100   : > { %1614 = vmatpush.msrb.mxu2 %v1594_v19  ;;  %1844 = vmatpush.msrb.mxu1 %v4506_v31  ;;  %v4521_v19 = vld [vmem:[%s5982_s5 + $0x8] sm:$0xff] }
 0x101   : > { %1974 = vmatpush.msrb.mxu3 %v4521_v19  ;;  %v4536_v19 = vld [vmem:[%s5161_s27 + $0x148] sm:$0xff] }
 0x102   : > { %1615 = vmatpush.msrb.mxu2 %v1593_v22 }
 0x104   : > { %1616 = vmatpush.msrb.mxu2 %v1592_v26 }
 0x106   : > { %1617 = vmatpush.msrb.mxu2 %v1591_v29  ;;  %v4852_v29 = vld [vmem:[%s5980_s15 + $0x6] ss:$0 sm:$0xff] }
 0x107   : > { %4479 = vmatmul.msk.f32.gmra.mxu2 %vm1377_vm1, %v1357_v35  ;;  %v5412_v35 = vsel %vm1570_vm5, %v4898_v16, %v1569_v32  ;;  %v4851_v16 = vld [vmem:[%s5980_s15 + $0x1] ss:$0 sm:$0xff] }
 0x108   : > { %1674 = vmatpush.msra.mxu2 %v4493_v33 }
 0x10a   : > { %1675 = vmatpush.msra.mxu2 %v4492_v34 }
 0x10f   : > { %4480 = vmatmul.msk.f32.gmra.mxu2 %vm1377_vm1, %v1358_v36  ;;  %v4491_v36 = vld [vmem:[%s5161_s27 + $0x108] sm:$0xff] }
 0x110   : > { %1676 = vmatpush.msra.mxu2 %v4491_v36 }
 0x112   : > { %1677 = vmatpush.msra.mxu2 %v4490_v38 }
 0x182   : > { %v1408_v44 = vpop.f32.mrf.mxu2 }
 0x183   : > { %v1409_v45 = vadd.f32 %v1408_v44, %v1365_v43 }
 0x185   : > { %v1417_v46 = vmax.f32 %v1409_v45, 0.0 }
 0x187   : > { %1452 = vmatmul.f32.vlgmr.msra.gmra.mxu3 %v1417_v46 }
 0x18a   : > { %v1411_v48 = vpop.f32.mrf.mxu2 }
 0x18b   : > { %v1412_v49 = vadd.f32 %v1411_v48, %v1370_v47  ;;  %v4846_v47 = vld [vmem:[%s5156_s20] ss:$0 sm:$0xff] }
 0x18d   : > { %v1418_v50 = vmax.f32 %v1412_v49, 0.0 }
 0x18f   : > { %1455 = vmatmul.f32.gmra.mxu3 %v1418_v50 }
 0x192   : > { %v1414_v52 = vpop.f32.mrf.mxu2 }
 0x193   : > { %v1415_v53 = vadd.f32 %v1414_v52, %v1375_v51  ;;  %v4847_v51 = vld [vmem:[%s5980_s15 + $0x4] ss:$0 sm:$0xff] }
 0x195   : > { %v1419_v54 = vmax.f32 %v1415_v53, 0.0 }
 0x197   : > { %1458 = vmatmul.f32.gmra.mxu3 %v1419_v54  ;;  %v4503_v54 = vld [vmem:[%s5161_s27 + $0x38] sm:$0xff] }
 0x20a   : > { %v1453_v63 = vpop.f32.mrf.mxu3 }
 0x20b   : > { %1464 = vxpose.xlu1.b32.start [1/3] (short) (narrow) %v1453_v63, 8 }
 0x212   : > { %v1456_v0 = vpop.f32.mrf.mxu3 }
 0x213   : > { %1465 = vxpose.xlu1.b32.cont [2/3] (short) (narrow) %v1456_v0, 8  ;;  %v4850_v0 = vld [vmem:[%s5980_s15 + $0x8] ss:$0 sm:$0xff] }
 0x21a   : > { %v1459_v1 = vpop.f32.mrf.mxu3 }
 0x21b   : > { %1466 = vxpose.xlu1.b32.end [3/3] (short) (narrow) %v1459_v1, 8 }
 0x2af   : > { %v1480_v4 = vpop.trf.xlu1 }
 0x2b0   : > { %4481 = vmatmul.msk.f32.vlgmr.msrb.gmra.mxu0 %vm1499_vm3, %v1480_v4  ;;  %v4531_v4 = vld [vmem:[%s5161_s27 + $0xd0] sm:$0xff] }
 0x2b1   : > { %1644 = vmatpush.msrb.mxu0 %v4487_v20 }
 0x2b3   : > { %1645 = vmatpush.msrb.mxu0 %v4486_v23 }
 0x2b5   : > { %1646 = vmatpush.msrb.mxu0 %v4485_v27 }
 0x2b7   : > { %1647 = vmatpush.msrb.mxu0 %v4484_v30 }
 0x2b8   : > { %4482 = vmatmul.msk.f32.vlgmr.msra.gmra.mxu0 %vm1523_vm4, %v1313_v7  ;;  %v1552_v7 = vld [vmem:[%s1269_s3] sm:$0x1]  ;;  %s5983_s3 = sld [smem:[#allocation8_spill]] }
 0x2b9   : > { %vm1553_vm10 = vcmp.gt.s32.totalorder %v1552_v7, 0 }
 0x2be   : > { %s1273_s26 = scalar_lea.vmem %s5983_s3, %s5377_s16  ;;  %s5985_s3 = sld [smem:[#allocation22_spill]] }
 0x2bf   : > { %v2479_v32 = vld [vmem:[%s1273_s26] sm:$0xff]  ;;  %s5986_s26 = sld [smem:[#allocation18_spill]] }
 0x32d   : > { %v1520_v8 = vpop.f32.mrf.mxu0 }
 0x335   : > { %v1544_v10 = vpop.f32.mrf.mxu0 }
 0x336   : > { %v1545_v11 = vadd.f32 %v1544_v10, %v1520_v8  ;;  %v5071_v8 = vmov -1e+09  }
 0x338   : > { %v5393_v12 = vadd.f32 %v4845_v9, %v1545_v11  ;;  %v1554_v9 = vsel %vm1553_vm10, 0.0, %v5071_v8 }
 0x339   : > { %v5449_v10 = vperm.slane %v1554_v9, 0 }
 0x33a   : > { %v1561_v13 = vmul.f32 %v5393_v12, %v5393_v12 }
 0x33c   : > { %v1562_v14 = vsel %vm1291_vm2, %v1561_v13, 0.0 }
 0x33d   : > { %1563 = vadd.xlane.f32.xlu2 %v1562_v14 }
 0x3b0   : > { %v1564_v37 = vpop.xlane.xlu2 %1563 }
 0x3b1   : > { %v1572_v39 = vmul.f32 %v5412_v35, %v1564_v37 }
 0x3b3   : > { %v1573_v40 = vadd.f32 1e-06, %v1572_v39 }
 0x3b5   : > { %4899 = vrsqrt.f32 %v1573_v40  ;;  %vm1580_vm7 = vweird.f32 %v1573_v40 }
 0x3bb   : > { %v4900_v41 = vpop.eup %4899 }
 0x3bc   : > { %v1575_v42 = vmul.f32 %v4900_v41, %v1573_v40  ;;  %vm1581_vm6 = vweird.f32 %v4900_v41 }
 0x3bd   : > { %vm1582_vm8 = vmor %vm1580_vm7, %vm1581_vm6 }
 0x3be   : > { %v1576_v43 = vmul.f32 %v4900_v41, %v1575_v42 }
 0x3c0   : > { %v1577_v44 = vmul.f32 0.5, %v1576_v43 }
 0x3c2   : > { %v1578_v45 = vsub.f32 1.5, %v1577_v44 }
 0x3c4   : > { %v1579_v46 = vmul.f32 %v4900_v41, %v1578_v45 }
 0x3c6   : > { %v1583_v48 = vsel %vm1582_vm8, %v4900_v41, %v1579_v46 }
 0x3c7   : > { %v1584_v49 = vmul.f32 %v1583_v48, %v5393_v12 }
 0x3c9   : > { %v5419_v50 = vmul.f32 %v4846_v47, %v1584_v49 }
 0x3cb   : > { %4483 = vmatmul.msk.f32.vlgmr.msrb.gmra.mxu2 %vm1291_vm2, %v5419_v50  ;;  %4489 = vmatmul.msk.f32.vlgmr.msrb.gmra.mxu0 %vm1291_vm2, %v5419_v50 }
 0x3cc   : > { %4511 = vmatmul.msk.f32.vlgmr.msrb.gmra.mxu1 %vm1291_vm2, %v5419_v50 }
 0x3d3   : > { %4495 = vmatmul.msk.f32.vlgmr.msra.gmra.mxu2 %vm1291_vm2, %v5419_v50 }
 0x448   : > { %v1649_v52 = vpop.f32.mrf.mxu0 }
 0x449   : > { %v1650_v53 = vadd.f32 %v4847_v51, %v1649_v52  ;;  %v1846_v59 = vpop.f32.mrf.mxu1  ;;  %v1761_v52 = vld [vmem:[%s5982_s5] sm:$0xff] }
 0x44a   : > { %v1847_v63 = vadd.f32 %v4848_v57, %v1846_v59  ;;  %v4526_v57 = vld [vmem:[%s5161_s27 + $0x58] sm:$0xff]  ;;  %v4525_v59 = vld [vmem:[%s5161_s27 + $0x50] sm:$0xff] }
 0x44b   : > { %4496 = vmatpush.xpose.msk.msra.mxu0 %vm1682_vm9, %v1650_v53  ;;  %v4515_v53 = vld [vmem:[%s5161_s27 + $0x138] sm:$0xff] }
 0x44e   : > { %v1619_v60 = vpop.f32.mrf.mxu2 }
 0x44f   : > { %1811 = vmatpush.msrb.mxu0 %v4503_v54  ;;  %v1620_v61 = vadd.f32 %v4849_v55, %v1619_v60  ;;  %v4514_v54 = vld [vmem:[%s5161_s27 + $0x130] sm:$0xff]  ;;  %v4513_v55 = vld [vmem:[%s5161_s27 + $0x128] sm:$0xff] }
 0x450   : > { %v4524_v60 = vld [vmem:[%s5161_s27 + $0x48] sm:$0xff] }
 0x451   : > { %1812 = vmatpush.msrb.mxu0 %v4502_v56  ;;  %v4512_v56 = vld [vmem:[%s5161_s27 + $0x120] sm:$0xff] }
 0x452   : > { %4497 = vmatmul.msk.f32.vlgmr.msra.gmra.mxu0 %vm1682_vm9, %v1620_v61  ;;  %v4523_v61 = vld [vmem:[%s5161_s27 + $0x40] sm:$0xff] }
 0x453   : > { %1813 = vmatpush.msrb.mxu0 %v4501_v58 }
 0x455   : > { %1814 = vmatpush.msrb.mxu0 %v4500_v62 }
 0x456   : > { %v1679_v1 = vpop.f32.mrf.mxu2 }
 0x457   : > { %4518 = vmatpush.xpose.msk.msra.mxu0 %vm1682_vm9, %v1847_v63  ;;  %v1680_v2 = vadd.f32 %v4850_v0, %v1679_v1 }
 0x459   : > { %1756 = vmatpush.msrb.mxu2 %v1680_v2 }
 0x45a   : > { %4505 = vmatmul.msk.f32.vlgmr.msrb.gmra.mxu0 %vm1291_vm2, %v5419_v50 }
 0x45b   : > { %2032 = vmatpush.msrb.mxu0 %v4532_v3  ;;  %1780 = vmatpush.msra.mxu2 %v1761_v52 }
 0x45d   : > { %2033 = vmatpush.msrb.mxu0 %v4531_v4 }
 0x45f   : > { %2034 = vmatpush.msrb.mxu0 %v4530_v5 }
 0x461   : > { %2035 = vmatpush.msrb.mxu0 %v4529_v6 }
 0x4cf   : > { %v1706_v11 = vpop.f32.mrf.mxu0 }
 0x4d0   : > { %v1709_v13 = vmul.f32 0.35355338, %v1706_v11  ;;  %v4854_v11 = vld [vmem:[%s5980_s15 + $0x9] ss:$0 sm:$0xff] }
 0x4d2   : > { %v1713_v14 = vadd.f32 %v5449_v10, %v1709_v13 }
 0x4d4   : > { %v1714_v15 = vsel %vm1682_vm9, %v1713_v14, -inf }
 0x4d5   : > { %1715 = vmax.xlane.f32.xlu2 %v1714_v15 }
 0x4d7   : > { %v1816_v17 = vpop.f32.mrf.mxu0 }
 0x4d8   : > { %v1817_v18 = vadd.f32 %v4851_v16, %v1816_v17  ;;  %v4538_v17 = vld [vmem:[%s5161_s27 + $0x158] sm:$0xff] }
 0x4da   : > { %4519 = vmatmul.msk.f32.vlgmr.msra.gmra.mxu0 %vm1682_vm9, %v1817_v18  ;;  %v4537_v18 = vld [vmem:[%s5161_s27 + $0x150] sm:$0xff] }
 0x4e2   : > { %4534 = vmatmul.msk.f32.vlgmr.msrb.gmra.mxu0 %vm1291_vm2, %v5419_v50 }
 0x548   : > { %v1716_v20 = vpop.xlane.xlu2 %1715 }
 0x549   : > { %v1717_v21 = vsub.f32 %v1713_v14, %v1716_v20  ;;  %v4535_v20 = vld [vmem:[%s5161_s27 + $0x140] sm:$0xff] }
 0x54b   : > { %v1718_v22 = vmul.f32 1.442695, %v1717_v21  ;;  %v4549_v21 = vld [vmem:[%s5161_s27 + $0x78] sm:$0xff] }
 0x54d   : > { %4901 = vpow2.f32 %v1718_v22  ;;  %v4548_v22 = vld [vmem:[%s5161_s27 + $0x70] sm:$0xff] }
 0x553   : > { %v4902_v23 = vpop.eup %4901 }
 0x554   : > { %v1720_v24 = vsel %vm1682_vm9, %v4902_v23, 0.0 }
 0x555   : > { %1721 = vadd.xlane.f32.xlu0 %v1720_v24  ;;  %v4546_v24 = vld [vmem:[%s5161_s27 + $0x60] sm:$0xff] }
 0x557   : > { %v1902_v25 = vpop.f32.mrf.mxu0 }
 0x558   : > { %v1905_v26 = vmul.f32 0.35355338, %v1902_v25  ;;  %v4555_v25 = vld [vmem:[%s5161_s27 + $0xf8] sm:$0xff] }
 0x55a   : > { %v1906_v27 = vadd.f32 %v1905_v26, %v5449_v10 }
 0x55c   : > { %v1907_v28 = vsel %vm1682_vm9, %v1906_v27, -inf }
 0x55d   : > { %1908 = vmax.xlane.f32.xlu2 %v1907_v28  ;;  %v4855_v28 = vld [vmem:[%s5980_s15 + $0x2] ss:$0 sm:$0xff] }
 0x55f   : > { %v2037_v30 = vpop.f32.mrf.mxu0 }
 0x560   : > { %v2038_v31 = vadd.f32 %v4852_v29, %v2037_v30  ;;  %v4553_v29 = vld [vmem:[%s5161_s27 + $0xe8] sm:$0xff] }
 0x562   : > { %4541 = vmatpush.xpose.msk.msra.mxu3 %vm1682_vm9, %v2038_v31  ;;  %v4856_v31 = vld [vmem:[%s5980_s15 + $0xa] ss:$0 sm:$0xff] }
 0x569   : > { %2481 = vperm.xlu0 %4841, %v2479_v32   ;;  %v4552_v32 = vld [vmem:[%s5161_s27 + $0xe0] sm:$0xff] }
 0x5c8   : > { %v1722_v33 = vpop.xlane.xlu0 %1721 }
 0x5c9   : > { %4903 = vrcp.f32 %v1722_v33  ;;  %v1734_v40 = vand.u32 2147483648, %v1722_v33  ;;  %v1732_v43 = vand.u32 2147483647, %v1722_v33  ;;  %vm1728_vm12 = vweird.f32 %v1722_v33 }
 0x5cb   : > { %v1735_v45 = vor.u32 1.1754944e-38, %v1734_v40  ;;  %vm1733_vm14 = vcmp.eq.f32.partialorder %v1732_v43, 8.507059e+37 }
 0x5cf   : > { %v4904_v34 = vpop.eup %4903 }
 0x5d0   : > { %v1724_v36 = vmul.f32 %v4904_v34, %v1722_v33  ;;  %v1909_v37 = vpop.xlane.xlu2 %1908  ;;  %vm1729_vm11 = vweird.f32 %v4904_v34 }
 0x5d1   : > { %v1910_v38 = vsub.f32 %v1906_v27, %v1909_v37  ;;  %vm1730_vm13 = vmor %vm1728_vm12, %vm1729_vm11  ;;  %v4554_v27 = vld [vmem:[%s5161_s27 + $0xf0] sm:$0xff] }
 0x5d2   : > { %v1725_v39 = vsub.f32 1.0, %v1724_v36  ;;  %v4544_v37 = vld [vmem:[%s5982_s5 + $0x10] sm:$0xff] }
 0x5d3   : > { %v1911_v41 = vmul.f32 1.442695, %v1910_v38  ;;  %2165 = vmatpush.msra.mxu0 %v4544_v37  ;;  %v4853_v38 = vld [vmem:[%s5984_s10] ss:$0 sm:$0xff]  ;;  %s5987_s10 = sld [smem:[#allocation23_spill]] }
 0x5d4   : > { %v1726_v42 = vmul.f32 %v4904_v34, %v1725_v39 }
 0x5d5   : > { %4905 = vpow2.f32 %v1911_v41 }
 0x5d6   : > { %v1727_v44 = vadd.f32 %v4904_v34, %v1726_v42 }
 0x5d8   : > { %v1731_v46 = vsel %vm1730_vm13, %v4904_v34, %v1727_v44 }
 0x5d9   : > { %v1736_v47 = vsel %vm1733_vm14, %v1735_v45, %v1731_v46  ;;  %v4858_v46 = vld [vmem:[%s5980_s15 + $0x7] ss:$0 sm:$0xff]  ;;  %vm2426_vm14 = vcmask 523264  }
 0x5da   : > { %v1737_v48 = vmul.f32 %v4902_v23, %v1736_v47  ;;  %v4547_v23 = vld [vmem:[%s5161_s27 + $0x68] sm:$0xff] }
 0x5db   : > { %v4906_v49 = vpop.eup %4905 }
 0x5dc   : > { %4498 = vmatmul.msk.f32.vlgmr.msrb.gmra.mxu2 %vm1682_vm9, %v1737_v48  ;;  %v1913_v51 = vsel %vm1682_vm9, %v4906_v49, 0.0 }
 0x5dd   : > { %1914 = vadd.xlane.f32.xlu2 %v1913_v51  ;;  %1871 = vmatpush.msrb.mxu2 %v4515_v53 }
 0x5df   : > { %1872 = vmatpush.msrb.mxu2 %v4514_v54 }
 0x5e1   : > { %1873 = vmatpush.msrb.mxu2 %v4513_v55  ;;  %v4561_v55 = vld [vmem:[%s5161_s27 + $0x178] sm:$0xff] }
 0x5e3   : > { %1874 = vmatpush.msrb.mxu2 %v4512_v56  ;;  %v4560_v56 = vld [vmem:[%s5161_s27 + $0x170] sm:$0xff] }
 0x650   : > { %v1915_v62 = vpop.xlane.xlu2 %1914 }
 0x651   : > { %4907 = vrcp.f32 %v1915_v62  ;;  %v1927_v5 = vand.u32 2147483648, %v1915_v62  ;;  %vm1921_vm0 = vweird.f32 %v1915_v62  ;;  %v1925_v6 = vand.u32 2147483647, %v1915_v62 }
 0x653   : > { %v1928_v9 = vor.u32 1.1754944e-38, %v1927_v5  ;;  %vm1926_vm3 = vcmp.eq.f32.partialorder %v1925_v6, 8.507059e+37 }
 0x657   : > { %v4908_v63 = vpop.eup %4907 }
 0x658   : > { %v1917_v0 = vmul.f32 %v4908_v63, %v1915_v62  ;;  %vm1922_vm15 = vweird.f32 %v4908_v63 }
 0x659   : > { %vm1923_vm1 = vmor %vm1921_vm0, %vm1922_vm15 }
 0x65a   : > { %v1918_v1 = vsub.f32 1.0, %v1917_v0 }
 0x65c   : > { %v1919_v2 = vmul.f32 %v4908_v63, %v1918_v1 }
 0x65e   : > { %v1920_v3 = vadd.f32 %v4908_v63, %v1919_v2 }
 0x65f   : > { %v1758_v58 = vpop.f32.mrf.mxu2 }
 0x660   : > { %4499 = vmatmul.msk.f32.vlgmr.msra.gmra.mxu2 %vm1682_vm9, %v1758_v58  ;;  %v1924_v7 = vsel %vm1923_vm1, %v4908_v63, %v1920_v3  ;;  %v4558_v58 = vld [vmem:[%s5161_s27 + $0x160] sm:$0xff] }
 0x661   : > { %2002 = vmatpush.msra.mxu2 %v4526_v57  ;;  %v1929_v13 = vsel %vm1926_vm3, %v1928_v9, %v1924_v7  ;;  %v4559_v57 = vld [vmem:[%s5161_s27 + $0x168] sm:$0xff]  ;;  %v4857_v9 = vld [vmem:[%s5980_s15 + $0x3] ss:$0 sm:$0xff] }
 0x662   : > { %v1930_v16 = vmul.f32 %v4906_v49, %v1929_v13  ;;  %v4859_v13 = vld [vmem:[%s5980_s15 + $0xb] ss:$0 sm:$0xff]  ;;  %s4985_s15 = scalar_lea.hbm %s5276_s17, 16 }
 0x663   : > { %2003 = vmatpush.msra.mxu2 %v4525_v59 }
 0x665   : > { %2004 = vmatpush.msra.mxu2 %v4524_v60 }
 0x667   : > { %2005 = vmatpush.msra.mxu2 %v4523_v61 }
 0x668   : > { %4517 = vmatmul.msk.f32.vlgmr.msrb.gmra.mxu2 %vm1291_vm2, %v5419_v50 }
 0x670   : > { %4528 = vmatmul.msk.f32.vlgmr.msra.gmra.mxu2 %vm1291_vm2, %v5419_v50 }
 0x6e3   : > { %v1782_v4 = vpop.f32.mrf.mxu2 }
 0x6e4   : > { %v1788_v39 = vadd.f32 %v4853_v38, %v1782_v4 }
 0x6eb   : > { %v1876_v14 = vpop.f32.mrf.mxu2 }
 0x6ec   : > { %v1877_v15 = vadd.f32 %v4854_v11, %v1876_v14 }
 0x6ee   : > { %1949 = vmatpush.msra.mxu1 %v1877_v15 }
 0x6ef   : > { %4520 = vmatmul.msk.f32.vlgmr.msra.gmra.mxu1 %vm1682_vm9, %v1930_v16 }
 0x6f0   : > { %2062 = vmatpush.msrb.mxu1 %v4538_v17 }
 0x6f2   : > { %2063 = vmatpush.msrb.mxu1 %v4537_v18 }
 0x6f3   : > { %v2007_v30 = vpop.f32.mrf.mxu2 }
 0x6f4   : > { %2064 = vmatpush.msrb.mxu1 %v4536_v19  ;;  %v2008_v33 = vadd.f32 %v4855_v28, %v2007_v30  ;;  %v2492_v28 = vld [vmem:[%s5985_s3 + $0x30] sm:$0xff]  ;;  %v2490_v30 = vld [vmem:[%s5985_s3 + $0x20] sm:$0xff] }
 0x6f6   : > { %2065 = vmatpush.msrb.mxu1 %v4535_v20 }
 0x6f7   : > { %4540 = vmatmul.msk.f32.vlgmr.msrb.gmra.mxu1 %vm1291_vm2, %v5419_v50 }
 0x6f8   : > { %2193 = vmatpush.msra.mxu1 %v4549_v21 }
 0x6fa   : > { %2194 = vmatpush.msra.mxu1 %v4548_v22 }
 0x6fc   : > { %2195 = vmatpush.msra.mxu1 %v4547_v23 }
 0x6fe   : > { %2196 = vmatpush.msra.mxu1 %v4546_v24 }
 0x6ff   : > { %4551 = vmatmul.msk.f32.vlgmr.msra.gmra.mxu1 %vm1291_vm2, %v5419_v50 }
 0x76c   : > { %v1951_v26 = vpop.f32.mrf.mxu1 }
 0x76d   : > { %4522 = vmatmul.msk.f32.vlgmr.msrb.gmra.mxu3 %vm1682_vm9, %v1951_v26 }
 0x76e   : > { %2223 = vmatpush.msrb.mxu3 %v4555_v25 }
 0x770   : > { %2224 = vmatpush.msrb.mxu3 %v4554_v27  ;;  %v2493_v27 = vld [vmem:[%s5985_s3 + $0x38] sm:$0xff] }
 0x772   : > { %2225 = vmatpush.msrb.mxu3 %v4553_v29  ;;  %v2491_v29 = vld [vmem:[%s5985_s3 + $0x28] sm:$0xff] }
 0x774   : > { %v2067_v34 = vpop.f32.mrf.mxu1  ;;  %2226 = vmatpush.msrb.mxu3 %v4552_v32  ;;  %v2488_v32 = vld [vmem:[%s5985_s3 + $0x10] sm:$0xff] }
 0x775   : > { %v2068_v36 = vadd.f32 %v4856_v31, %v2067_v34  ;;  %4542 = vmatmul.msk.f32.vlgmr.msra.gmra.mxu3 %vm1682_vm9, %v2008_v33  ;;  %v2489_v31 = vld [vmem:[%s5985_s3 + $0x18] sm:$0xff]  ;;  %v2487_v33 = vld [vmem:[%s5985_s3 + $0x8] sm:$0xff]  ;;  %v2486_v34 = vld [vmem:[%s5985_s3] sm:$0xff]  ;;  %s5988_s3 = sld [smem:[#allocation20_spill]] }
 0x777   : > { %2140 = vmatpush.msrb.mxu2 %v2068_v36 }
 0x779   : > { %2253 = vmatpush.msra.mxu2 %v4561_v55 }
 0x77b   : > { %2254 = vmatpush.msra.mxu2 %v4560_v56 }
 0x77c   : > { %v2198_v11 = vpop.f32.mrf.mxu1 }
 0x77d   : > { %4557 = vmatmul.msk.f32.vlgmr.msrb.gmra.mxu3 %vm1291_vm2, %v5419_v50  ;;  %2255 = vmatpush.msra.mxu2 %v4559_v57  ;;  %v2199_v14 = vadd.f32 %v4857_v9, %v2198_v11  ;;  %v2542_v9 = vld [vmem:[%s5987_s10 + $0x8] sm:$0xff] }
 0x77e   : > { %v4578_v11 = vld [vmem:[%s5987_s10 + $0x88] sm:$0xff] }
 0x77f   : > { %2256 = vmatpush.msra.mxu2 %v4558_v58 }
 0x7f0   : > { %v1976_v40 = vpop.f32.mrf.mxu3 }
 0x7f1   : > { %v1979_v41 = vadd.f32 %v1976_v40, %v1788_v39 }
 0x7f8   : > { %v2093_v42 = vpop.f32.mrf.mxu3 }
 0x7f9   : > { %v2096_v43 = vmul.f32 0.35355338, %v2093_v42 }
 0x7fb   : > { %v2097_v44 = vadd.f32 %v2096_v43, %v5449_v10 }
 0x7fd   : > { %v2098_v45 = vsel %vm1682_vm9, %v2097_v44, -inf }
 0x7fe   : > { %2099 = vmax.xlane.f32.xlu2 %v2098_v45  ;;  %v1555_v45 = vlaneseq }
 0x800   : > { %v2228_v47 = vpop.f32.mrf.mxu3 }
 0x801   : > { %v2229_v48 = vadd.f32 %v4858_v46, %v2228_v47 }
 0x803   : > { %4564 = vmatpush.xpose.msk.msrb.mxu0 %vm1682_vm9, %v2229_v48 }
 0x871   : > { %v2100_v49 = vpop.xlane.xlu2 %2099 }
 0x872   : > { %v2101_v51 = vsub.f32 %v2097_v44, %v2100_v49  ;;  %v5535_v49 = vand.u32 127, %v1555_v45 }
 0x874   : > { %v2102_v52 = vmul.f32 1.442695, %v2101_v51  ;;  %v2482_v51 = vpop.permute.xlu0 %2481 }
 0x875   : > { %vm2483_vm13 = vcmp.eq.s32.totalorder %v5535_v49, %v2482_v51 }
 0x876   : > { %4909 = vpow2.f32 %v2102_v52  ;;  %v5072_v52 = vmov 0.0  }
 0x87c   : > { %v4910_v53 = vpop.eup %4909 }
 0x87d   : > { %v2104_v54 = vsel %vm1682_vm9, %v4910_v53, 0.0 }
 0x87e   : > { %2105 = vadd.xlane.f32.xlu2 %v2104_v54  ;;  %v4567_v54 = vld [vmem:[%s5982_s5 + $0x18] sm:$0xff]  ;;  %s5989_s5 = sld [smem:[#allocation19_spill]] }
 0x87f   : > { %2356 = vmatpush.msra.mxu3 %v4567_v54  ;;  %v4594_v54 = vld [vmem:[%s5987_s10 + $0x28] sm:$0xff] }
 0x8f1   : > { %v2106_v59 = vpop.xlane.xlu2 %2105 }
 0x8f2   : > { %4911 = vrcp.f32 %v2106_v59  ;;  %v2118_v63 = vand.u32 2147483648, %v2106_v59  ;;  %v2116_v1 = vand.u32 2147483647, %v2106_v59  ;;  %vm2112_vm5 = vweird.f32 %v2106_v59 }
 0x8f4   : > { %v2119_v3 = vor.u32 1.1754944e-38, %v2118_v63  ;;  %vm2117_vm7 = vcmp.eq.f32.partialorder %v2116_v1, 8.507059e+37  ;;  %v2387_v1 = vld [vmem:[%s5986_s26 + $0x8] sm:$0xff] }
 0x8f8   : > { %v4912_v60 = vpop.eup %4911 }
 0x8f9   : > { %v2108_v61 = vmul.f32 %v4912_v60, %v2106_v59  ;;  %vm2113_vm4 = vweird.f32 %v4912_v60 }
 0x8fa   : > { %vm2114_vm6 = vmor %vm2112_vm5, %vm2113_vm4 }
 0x8fb   : > { %v2109_v62 = vsub.f32 1.0, %v2108_v61 }
 0x8fd   : > { %v2110_v0 = vmul.f32 %v4912_v60, %v2109_v62 }
 0x8ff   : > { %v2111_v2 = vadd.f32 %v4912_v60, %v2110_v0  ;;  %v2388_v0 = vld [vmem:[%s5986_s26 + $0x10] sm:$0xff] }
 0x901   : > { %v2115_v4 = vsel %vm2114_vm6, %v4912_v60, %v2111_v2  ;;  %v2386_v2 = vld [vmem:[%s5986_s26] sm:$0xff] }
 0x902   : > { %v2120_v5 = vsel %vm2117_vm7, %v2119_v3, %v2115_v4  ;;  %v2544_v3 = vld [vmem:[%s5987_s10 + $0x18] sm:$0xff] }
 0x903   : > { %v2121_v6 = vmul.f32 %v4910_v53, %v2120_v5  ;;  %v4573_v53 = vsel %vm2483_vm13, 1.0, %v5072_v52  ;;  %v4580_v4 = vld [vmem:[%s5987_s10 + $0x98] sm:$0xff]  ;;  %2564 = vmatpush.msrb.mxu3 %v2544_v3  ;;  %v2543_v5 = vld [vmem:[%s5987_s10 + $0x10] sm:$0xff] }
 0x904   : > { %v4596_v52 = vld [vmem:[%s5987_s10 + $0x38] sm:$0xff] }
 0x905   : > { %4543 = vmatmul.msk.f32.vlgmr.msrb.gmra.mxu2 %vm1682_vm9, %v2121_v6  ;;  %v4579_v6 = vld [vmem:[%s5987_s10 + $0x90] sm:$0xff]  ;;  %2565 = vmatpush.msrb.mxu3 %v2543_v5  ;;  %v4602_v5 = vld [vmem:[%s5987_s10 + $0xb8] sm:$0xff] }
 0x907   : > { %2566 = vmatpush.msrb.mxu3 %v2542_v9  ;;  %v4865_v9 = vld [vmem:[%s5990_s6 + $0x8] ss:$0 sm:$0xff] }
 0x90d   : > { %4563 = vmatmul.msk.f32.vlgmr.msra.gmra.mxu2 %vm1291_vm2, %v5419_v50 }
 0x988   : > { %v2142_v7 = vpop.f32.mrf.mxu2 }
 0x989   : > { %4545 = vmatmul.msk.f32.vlgmr.msra.gmra.mxu0 %vm1682_vm9, %v2142_v7 }
 0x990   : > { %v2258_v15 = vpop.f32.mrf.mxu2 }
 0x991   : > { %v2259_v16 = vadd.f32 %v4859_v13, %v2258_v15  ;;  %4565 = vmatmul.msk.f32.vlgmr.msrb.gmra.mxu0 %vm1682_vm9, %v2199_v14  ;;  %v2541_v14 = vld [vmem:[%s5987_s10] sm:$0xff] }
 0x992   : > { %v4577_v15 = vld [vmem:[%s5987_s10 + $0x80] sm:$0xff]  ;;  %2567 = vmatpush.msrb.mxu3 %v2541_v14 }
 0x993   : > { %2331 = vmatpush.msrb.mxu1 %v2259_v16  ;;  %v4599_v14 = vld [vmem:[%s5987_s10 + $0xa0] sm:$0xff] }
 0x995   : > { %2505 = vmatpush.msra.mxu1 %v2493_v27 }
 0x997   : > { %2506 = vmatpush.msra.mxu1 %v2492_v28 }
 0x999   : > { %2507 = vmatpush.msra.mxu1 %v2491_v29  ;;  %v2425_v29 = vld [vmem:[%s5988_s3 + $0x38] sm:$0xff] }
 0x99a   : > { %2438 = vmatpush.msra.mxu0 %v2425_v29  ;;  %v4608_v29 = vld [vmem:[%s5987_s10 + $0x138] sm:$0xff] }
 0x99b   : > { %2508 = vmatpush.msra.mxu1 %v2490_v30  ;;  %v2424_v30 = vld [vmem:[%s5988_s3 + $0x30] sm:$0xff] }
 0x99c   : > { %2439 = vmatpush.msra.mxu0 %v2424_v30  ;;  %v4607_v30 = vld [vmem:[%s5987_s10 + $0x130] sm:$0xff] }
 0x99d   : > { %2509 = vmatpush.msra.mxu1 %v2489_v31 }
 0x99f   : > { %2510 = vmatpush.msra.mxu1 %v2488_v32 }
 0x9a1   : > { %2511 = vmatpush.msra.mxu1 %v2487_v33  ;;  %v4860_v33 = vld [vmem:[%s5156_s20 + $0x1] ss:$0 sm:$0xff] }
 0x9a3   : > { %2512 = vmatpush.msra.mxu1 %v2486_v34  ;;  %v2423_v34 = vld [vmem:[%s5988_s3 + $0x28] sm:$0xff] }
 0x9a4   : > { %2440 = vmatpush.msra.mxu0 %v2423_v34 }
 0xa06   : > { %v2167_v17 = vpop.f32.mrf.mxu0 }
 0xa07   : > { %v2170_v18 = vadd.f32 %v2167_v17, %v1979_v41  ;;  %v4586_v17 = vld [vmem:[%s5987_s10 + $0x118] sm:$0xff] }
 0xa0e   : > { %v2284_v19 = vpop.f32.mrf.mxu0 }
 0xa0f   : > { %v2287_v20 = vmul.f32 0.35355338, %v2284_v19  ;;  %v4584_v19 = vld [vmem:[%s5987_s10 + $0x108] sm:$0xff] }
 0xa11   : > { %v2288_v50 = vadd.f32 %v2287_v20, %v5449_v10  ;;  %v4583_v20 = vld [vmem:[%s5987_s10 + $0x100] sm:$0xff] }
 0xa13   : > { %v2289_v21 = vsel %vm1682_vm9, %v2288_v50, -inf }
 0xa14   : > { %2290 = vmax.xlane.f32.xlu2 %v2289_v21 }
 0xa87   : > { %v2291_v22 = vpop.xlane.xlu2 %2290 }
 0xa88   : > { %v2292_v23 = vsub.f32 %v2288_v50, %v2291_v22 }
 0xa8a   : > { %v2293_v24 = vmul.f32 1.442695, %v2292_v23 }
 0xa8c   : > { %4913 = vpow2.f32 %v2293_v24 }
 0xa92   : > { %v4914_v25 = vpop.eup %4913 }
 0xa93   : > { %v2295_v26 = vsel %vm1682_vm9, %v4914_v25, 0.0 }
 0xa94   : > { %2296 = vadd.xlane.f32.xlu2 %v2295_v26 }
 0xb07   : > { %v2297_v36 = vpop.xlane.xlu2 %2296 }
 0xb08   : > { %4915 = vrcp.f32 %v2297_v36  ;;  %v2309_v40 = vand.u32 2147483648, %v2297_v36  ;;  %v2307_v42 = vand.u32 2147483647, %v2297_v36  ;;  %vm2303_vm10 = vweird.f32 %v2297_v36 }
 0xb0a   : > { %v2310_v44 = vor.u32 1.1754944e-38, %v2309_v40  ;;  %vm2308_vm12 = vcmp.eq.f32.partialorder %v2307_v42, 8.507059e+37  ;;  %v2421_v42 = vld [vmem:[%s5988_s3 + $0x18] sm:$0xff] }
 0xb0e   : > { %v4916_v37 = vpop.eup %4915 }
 0xb0f   : > { %v2299_v38 = vmul.f32 %v4916_v37, %v2297_v36  ;;  %vm2304_vm8 = vweird.f32 %v4916_v37 }
 0xb10   : > { %vm2305_vm11 = vmor %vm2303_vm10, %vm2304_vm8 }
 0xb11   : > { %v2300_v39 = vsub.f32 1.0, %v2299_v38 }
 0xb13   : > { %v2301_v41 = vmul.f32 %v4916_v37, %v2300_v39  ;;  %v2422_v39 = vld [vmem:[%s5988_s3 + $0x20] sm:$0xff] }
 0xb14   : > { %2441 = vmatpush.msra.mxu0 %v2422_v39 }
 0xb15   : > { %v2302_v43 = vadd.f32 %v4916_v37, %v2301_v41 }
 0xb16   : > { %2442 = vmatpush.msra.mxu0 %v2421_v42 }
 0xb17   : > { %v2306_v46 = vsel %vm2305_vm11, %v4916_v37, %v2302_v43 }
 0xb18   : > { %v2311_v47 = vsel %vm2308_vm12, %v2310_v44, %v2306_v46  ;;  %v4861_v46 = vld [vmem:[%s5156_s20 + $0x3] ss:$0 sm:$0xff] }
 0xb19   : > { %v2312_v48 = vmul.f32 %v4914_v25, %v2311_v47 }
 0xb1b   : > { %4566 = vmatmul.msk.f32.vlgmr.msrb.gmra.mxu1 %vm1682_vm9, %v2312_v48 }
 0xb23   : > { %4574 = vmatmul.msk.f32.vlgmr.msra.gmra.mxu1 %vm2426_vm14, %v4573_v53  ;;  %v4595_v53 = vld [vmem:[%s5987_s10 + $0x30] sm:$0xff] }
 0xb98   : > { %v2333_v55 = vpop.f32.mrf.mxu1 }
 0xb99   : > { %4568 = vmatmul.msk.f32.vlgmr.msra.gmra.mxu3 %vm1682_vm9, %v2333_v55  ;;  %v4593_v55 = vld [vmem:[%s5987_s10 + $0x20] sm:$0xff] }
 0xb9a   : > { %2624 = vmatpush.msra.mxu3 %v4586_v17  ;;  %v1556_v17 = vshrl.u32 %v1555_v45, 7 }
 0xb9c   : > { %vm1559_vm6 = vcmp.le.s32.totalorder %v5535_v49, %v1556_v17 }
 0xba0   : > { %v5548_v61 = vpop.f32.mrf.mxu1 }
 0xba1   : > { %v2517_v62 = vmul.f32 %v5548_v61, %v5548_v61 }
 0xba3   : > { %v2518_v63 = vsel %vm1291_vm2, %v2517_v62, 0.0 }
 0xc1c   : > { %v2358_v56 = vpop.f32.mrf.mxu3 }
 0xc1d   : > { %v2361_v57 = vadd.f32 %v2358_v56, %v2170_v18  ;;  %v4585_v18 = vld [vmem:[%s5987_s10 + $0x110] sm:$0xff] }
 0xc1e   : > { %2625 = vmatpush.msra.mxu3 %v4585_v18  ;;  %v2420_v56 = vld [vmem:[%s5988_s3 + $0x10] sm:$0xff] }
 0xc1f   : > { %v5543_v58 = vadd.f32 %v2361_v57, %v5393_v12  ;;  %v2389_v12 = vld [vmem:[%s5986_s26 + $0x18] sm:$0xff]  ;;  %2443 = vmatpush.msra.mxu0 %v2420_v56  ;;  %v2419_v57 = vld [vmem:[%s5988_s3 + $0x8] sm:$0xff] }
 0xc20   : > { %2409 = vmatpush.msrb.mxu2 %v2389_v12  ;;  %2626 = vmatpush.msra.mxu3 %v4584_v19  ;;  %v5615_v19 = vsel %vm1559_vm6, 0.0, %v5071_v8 }
 0xc21   : > { %v2365_v59 = vmul.f32 %v5543_v58, %v5543_v58  ;;  %2444 = vmatpush.msra.mxu0 %v2419_v57  ;;  %v4624_v57 = vld [vmem:[%s5987_s10 + $0xd0] sm:$0xff] }
 0xc22   : > { %2410 = vmatpush.msrb.mxu2 %v2388_v0  ;;  %2627 = vmatpush.msra.mxu3 %v4583_v20  ;;  %v4864_v0 = vld [vmem:[%s5990_s6 + $0x4] ss:$0 sm:$0xff] }
 0xc23   : > { %v2366_v60 = vsel %vm1291_vm2, %v2365_v59, 0.0  ;;  %v2418_v59 = vld [vmem:[%s5988_s3] sm:$0xff] }
 0xc24   : > { %2367 = vadd.xlane.f32.xlu2 %v2366_v60  ;;  %2411 = vmatpush.msrb.mxu2 %v2387_v1  ;;  %v4862_v60 = vld [vmem:[%s5989_s5] ss:$0 sm:$0xff]  ;;  %s5992_s5 = sld [smem:[#allocation9_spill]] }
 0xc25   : > { %2445 = vmatpush.msra.mxu0 %v2418_v59  ;;  %v4863_v1 = vld [vmem:[%s5990_s6] ss:$0 sm:$0xff]  ;;  %v4866_v59 = vld [vmem:[%s5990_s6 + $0x1] ss:$0 sm:$0xff] }
 0xc26   : > { %2412 = vmatpush.msrb.mxu2 %v2386_v2 }
 0xc28   : > { %2594 = vmatpush.msra.mxu2 %v4580_v4 }
 0xc2a   : > { %2595 = vmatpush.msra.mxu2 %v4579_v6  ;;  %s1277_s3 = scalar_lea.vmem %s5992_s5, %s5377_s16  ;;  %s5994_s5 = sld [smem:[#allocation21_spill]] }
 0xc2b   : > { %v4263_v45 = vld [vmem:[%s1277_s3] sm:$0xff]  ;;  %s5993_s3 = sld [smem:[#allocation26_spill]] }
 0xc2c   : > { %2519 = vadd.xlane.f32.xlu2 %v2518_v63  ;;  %2596 = vmatpush.msra.mxu2 %v4578_v11  ;;  %v4600_v11 = vld [vmem:[%s5987_s10 + $0xa8] sm:$0xff] }
 0xc2e   : > { %2597 = vmatpush.msra.mxu2 %v4577_v15 }
 0xc97   : > { %v2368_v7 = vpop.xlane.xlu2 %2367 }
 0xc98   : > { %v2369_v13 = vmul.f32 %v2368_v7, %v5412_v35  ;;  %v4601_v7 = vld [vmem:[%s5987_s10 + $0xb0] sm:$0xff] }
 0xc9a   : > { %v2370_v16 = vadd.f32 1e-06, %v2369_v13 }
 0xc9c   : > { %4917 = vrsqrt.f32 %v2370_v16  ;;  %vm2377_vm0 = vweird.f32 %v2370_v16 }
 0xc9f   : > { %v2520_v50 = vpop.xlane.xlu2 %2519 }
 0xca0   : > { %v2521_v21 = vmul.f32 %v2520_v50, %v5412_v35 }
 0xca2   : > { %v4918_v22 = vpop.eup %4917  ;;  %v2522_v23 = vadd.f32 1e-06, %v2521_v21 }
 0xca3   : > { %v2372_v24 = vmul.f32 %v4918_v22, %v2370_v16  ;;  %vm2378_vm15 = vweird.f32 %v4918_v22  ;;  %v2707_v16 = vld [vmem:[%s5991_s8] sm:$0xff] }
 0xca4   : > { %4919 = vrsqrt.f32 %v2522_v23  ;;  %vm2379_vm1 = vmor %vm2377_vm0, %vm2378_vm15  ;;  %vm2529_vm4 = vweird.f32 %v2522_v23  ;;  %2726 = vmatpush.msrb.mxu1 %v2707_v16 }
 0xca5   : > { %v2373_v25 = vmul.f32 %v4918_v22, %v2372_v24 }
 0xca7   : > { %v2374_v26 = vmul.f32 0.5, %v2373_v25 }
 0xca9   : > { %v2375_v27 = vsub.f32 1.5, %v2374_v26 }
 0xcaa   : > { %v4920_v28 = vpop.eup %4919 }
 0xcab   : > { %v2376_v31 = vmul.f32 %v4918_v22, %v2375_v27  ;;  %v2524_v32 = vmul.f32 %v4920_v28, %v2522_v23  ;;  %vm2530_vm3 = vweird.f32 %v4920_v28 }
 0xcac   : > { %vm2531_vm5 = vmor %vm2529_vm4, %vm2530_vm3 }
 0xcad   : > { %v2380_v36 = vsel %vm2379_vm1, %v4918_v22, %v2376_v31  ;;  %v2525_v37 = vmul.f32 %v4920_v28, %v2524_v32  ;;  %v4868_v22 = vld [vmem:[%s5990_s6 + $0x5] ss:$0 sm:$0xff]  ;;  %v4606_v31 = vld [vmem:[%s5987_s10 + $0x128] sm:$0xff] }
 0xcae   : > { %v2381_v38 = vmul.f32 %v2380_v36, %v5543_v58  ;;  %v4605_v32 = vld [vmem:[%s5987_s10 + $0x120] sm:$0xff] }
 0xcaf   : > { %v2526_v40 = vmul.f32 0.5, %v2525_v37 }
 0xcb0   : > { %v2385_v41 = vmul.f32 %v4860_v33, %v2381_v38 }
 0xcb1   : > { %v2527_v43 = vsub.f32 1.5, %v2526_v40 }
 0xcb2   : > { %4570 = vmatmul.msk.f32.vlgmr.msrb.gmra.mxu2 %vm1291_vm2, %v2385_v41 }
 0xcb3   : > { %v2528_v44 = vmul.f32 %v4920_v28, %v2527_v43 }
 0xcb5   : > { %v2532_v47 = vsel %vm2531_vm5, %v4920_v28, %v2528_v44 }
 0xcb6   : > { %v2533_v48 = vmul.f32 %v2532_v47, %v5548_v61  ;;  %v4619_v47 = vld [vmem:[%s5987_s10 + $0x58] sm:$0xff] }
 0xcb8   : > { %v5581_v51 = vmul.f32 %v4861_v46, %v2533_v48  ;;  %v4618_v48 = vld [vmem:[%s5987_s10 + $0x50] sm:$0xff] }
 0xcba   : > { %4576 = vmatmul.msk.f32.vlgmr.msrb.gmra.mxu3 %vm1291_vm2, %v5581_v51  ;;  %4582 = vmatmul.msk.f32.vlgmr.msra.gmra.mxu2 %vm1291_vm2, %v5581_v51 }
 0xcbb   : > { %2757 = vmatpush.msrb.mxu3 %v4596_v52  ;;  %v4617_v52 = vld [vmem:[%s5987_s10 + $0x48] sm:$0xff] }
 0xcbd   : > { %2758 = vmatpush.msrb.mxu3 %v4595_v53  ;;  %v4616_v53 = vld [vmem:[%s5987_s10 + $0x40] sm:$0xff] }
 0xcbf   : > { %2759 = vmatpush.msrb.mxu3 %v4594_v54 }
 0xcc1   : > { %2760 = vmatpush.msrb.mxu3 %v4593_v55  ;;  %v4625_v55 = vld [vmem:[%s5987_s10 + $0xd8] sm:$0xff] }
 0xcc2   : > { %4588 = vmatmul.msk.f32.vlgmr.msra.gmra.mxu3 %vm1291_vm2, %v5581_v51 }
 0xcca   : > { %4598 = vmatmul.msk.f32.vlgmr.msrb.gmra.mxu3 %vm1291_vm2, %v5581_v51 }
 0xd35   : > { %v2414_v62 = vpop.f32.mrf.mxu2 }
 0xd36   : > { %v2415_v63 = vadd.f32 %v4862_v60, %v2414_v62  ;;  %v4623_v60 = vld [vmem:[%s5987_s10 + $0xc8] sm:$0xff] }
 0xd38   : > { %v2417_v12 = vmax.f32 %v2415_v63, 0.0  ;;  %v4869_v63 = vld [vmem:[%s5990_s6 + $0x9] ss:$0 sm:$0xff] }
 0xd3a   : > { %4571 = vmatmul.msk.f32.vlgmr.msra.gmra.mxu0 %vm2426_vm14, %v2417_v12  ;;  %v4622_v12 = vld [vmem:[%s5987_s10 + $0xc0] sm:$0xff] }
 0xd3d   : > { %v2569_v2 = vpop.f32.mrf.mxu3  ;;  %v2599_v3 = vpop.f32.mrf.mxu2 }
 0xd3e   : > { %v2600_v4 = vadd.f32 %v4864_v0, %v2599_v3  ;;  %v2570_v6 = vadd.f32 %v4863_v1, %v2569_v2  ;;  %v4614_v3 = vld [vmem:[%s5991_s8 + $0x8] sm:$0xff] }
 0xd40   : > { %4589 = vmatpush.xpose.msk.msrb.mxu2 %vm1682_vm9, %v2600_v4 }
 0xd43   : > { %4590 = vmatmul.msk.f32.vlgmr.msrb.gmra.mxu2 %vm1682_vm9, %v2570_v6 }
 0xd44   : > { %2787 = vmatpush.msra.mxu2 %v4602_v5 }
 0xd45   : > { %v2629_v13 = vpop.f32.mrf.mxu3 }
 0xd46   : > { %2788 = vmatpush.msra.mxu2 %v4601_v7  ;;  %v2630_v15 = vadd.f32 %v4865_v9, %v2629_v13 }
 0xd48   : > { %2789 = vmatpush.msra.mxu2 %v4600_v11  ;;  %2702 = vmatpush.msrb.mxu0 %v2630_v15  ;;  %v4872_v11 = vld [vmem:[%s5990_s6 + $0x6] ss:$0 sm:$0xff] }
 0xd4a   : > { %2790 = vmatpush.msra.mxu2 %v4599_v14  ;;  %2817 = vmatpush.msra.mxu0 %v4608_v29 }
 0xd4b   : > { %4604 = vmatmul.msk.f32.vlgmr.msra.gmra.mxu2 %vm1291_vm2, %v5581_v51 }
 0xd4c   : > { %2818 = vmatpush.msra.mxu0 %v4607_v30  ;;  %2920 = vmatpush.msrb.mxu2 %v4614_v3 }
 0xd4d   : > { %v2762_v62 = vpop.f32.mrf.mxu3 }
 0xd4e   : > { %2819 = vmatpush.msra.mxu0 %v4606_v31  ;;  %v2763_v0 = vadd.f32 %v4866_v59, %v2762_v62 }
 0xd50   : > { %2820 = vmatpush.msra.mxu0 %v4605_v32 }
 0xdb7   : > { %v5637_v54 = vpop.f32.mrf.mxu0 }
 0xdc6   : > { %v2655_v18 = vpop.f32.mrf.mxu2 }
 0xdc7   : > { %v2658_v20 = vmul.f32 0.35355338, %v2655_v18 }
 0xdc9   : > { %v2659_v50 = vadd.f32 %v2658_v20, %v5615_v19 }
 0xdcb   : > { %v2660_v21 = vsel %vm1682_vm9, %v2659_v50, -inf }
 0xdcc   : > { %2661 = vmax.xlane.f32.xlu1 %v2660_v21  ;;  %v4630_v21 = vld [vmem:[%s5987_s10 + $0x150] sm:$0xff] }
 0xdce   : > { %v2792_v23 = vpop.f32.mrf.mxu2 }
 0xdcf   : > { %v2793_v24 = vadd.f32 %v4868_v22, %v2792_v23  ;;  %v4629_v22 = vld [vmem:[%s5987_s10 + $0x148] sm:$0xff]  ;;  %v4628_v23 = vld [vmem:[%s5987_s10 + $0x140] sm:$0xff] }
 0xdd1   : > { %4611 = vmatpush.xpose.msk.msra.mxu1 %vm1682_vm9, %v2793_v24 }
 0xde5   : > { %4265 = vperm.xlu1 %4842, %v4263_v45  }
 0xe3f   : > { %v2662_v8 = vpop.xlane.xlu1 %2661 }
 0xe40   : > { %v2663_v25 = vsub.f32 %v2659_v50, %v2662_v8  ;;  %v4631_v50 = vld [vmem:[%s5987_s10 + $0x158] sm:$0xff] }
 0xe42   : > { %v2664_v26 = vmul.f32 1.442695, %v2663_v25 }
 0xe44   : > { %4921 = vpow2.f32 %v2664_v26 }
 0xe4a   : > { %v4922_v27 = vpop.eup %4921 }
 0xe4b   : > { %v2666_v28 = vsel %vm1682_vm9, %v4922_v27, 0.0 }
 0xe4c   : > { %2667 = vadd.xlane.f32.xlu0 %v2666_v28 }
 0xebf   : > { %v2668_v33 = vpop.xlane.xlu0 %2667 }
 0xec0   : > { %4923 = vrcp.f32 %v2668_v33  ;;  %v2680_v38 = vand.u32 2147483648, %v2668_v33  ;;  %v2678_v40 = vand.u32 2147483647, %v2668_v33  ;;  %vm2674_vm8 = vweird.f32 %v2668_v33 }
 0xec2   : > { %v2681_v42 = vor.u32 1.1754944e-38, %v2680_v38  ;;  %vm2679_vm11 = vcmp.eq.f32.partialorder %v2678_v40, 8.507059e+37  ;;  %v4639_v38 = vld [vmem:[%s5987_s10 + $0x60] sm:$0xff] }
 0xec6   : > { %v4924_v34 = vpop.eup %4923 }
 0xec7   : > { %v2670_v36 = vmul.f32 %v4924_v34, %v2668_v33  ;;  %vm2675_vm7 = vweird.f32 %v4924_v34 }
 0xec8   : > { %vm2676_vm10 = vmor %vm2674_vm8, %vm2675_vm7 }
 0xec9   : > { %v2671_v37 = vsub.f32 1.0, %v2670_v36  ;;  %v4641_v36 = vld [vmem:[%s5987_s10 + $0x70] sm:$0xff] }
 0xecb   : > { %v2672_v39 = vmul.f32 %v4924_v34, %v2671_v37  ;;  %v4640_v37 = vld [vmem:[%s5987_s10 + $0x68] sm:$0xff] }
 0xecd   : > { %v2673_v41 = vadd.f32 %v4924_v34, %v2672_v39  ;;  %v4648_v39 = vld [vmem:[%s5987_s10 + $0xf8] sm:$0xff] }
 0xecf   : > { %v2677_v43 = vsel %vm2676_vm10, %v4924_v34, %v2673_v41  ;;  %v4642_v34 = vld [vmem:[%s5987_s10 + $0x78] sm:$0xff]  ;;  %v4647_v41 = vld [vmem:[%s5987_s10 + $0xf0] sm:$0xff] }
 0xed0   : > { %v2682_v44 = vsel %vm2679_vm11, %v2681_v42, %v2677_v43  ;;  %v4870_v42 = vld [vmem:[%s5990_s6 + $0x2] ss:$0 sm:$0xff]  ;;  %v4646_v43 = vld [vmem:[%s5987_s10 + $0xe8] sm:$0xff] }
 0xed1   : > { %v2683_v46 = vmul.f32 %v4922_v27, %v2682_v44 }
 0xed3   : > { %4591 = vmatmul.msk.f32.vlgmr.msrb.gmra.mxu0 %vm1682_vm9, %v2683_v46  ;;  %v4873_v46 = vld [vmem:[%s5990_s6 + $0xa] ss:$0 sm:$0xff] }
 0xed4   : > { %2948 = vmatpush.msrb.mxu0 %v4619_v47  ;;  %v4645_v47 = vld [vmem:[%s5987_s10 + $0xe0] sm:$0xff] }
 0xed6   : > { %2949 = vmatpush.msrb.mxu0 %v4618_v48 }
 0xed8   : > { %2950 = vmatpush.msrb.mxu0 %v4617_v52 }
 0xeda   : > { %2951 = vmatpush.msrb.mxu0 %v4616_v53 }
 0xedb   : > { %4610 = vmatmul.msk.f32.vlgmr.msra.gmra.mxu0 %vm1291_vm2, %v5581_v51 }
 0xee3   : > { %4621 = vmatmul.msk.f32.vlgmr.msrb.gmra.mxu0 %vm1291_vm2, %v5581_v51 }
 0xf50   : > { %v2704_v56 = vpop.f32.mrf.mxu0 }
 0xf51   : > { %4592 = vmatmul.msk.f32.vlgmr.msrb.gmra.mxu1 %vm1682_vm9, %v2704_v56  ;;  %v4871_v56 = vld [vmem:[%s5993_s3] ss:$0 sm:$0xff]  ;;  %s5995_s3 = sld [smem:[#allocation27_spill]] }
 0xf52   : > { %2978 = vmatpush.msrb.mxu1 %v4625_v55  ;;  %v4637_v55 = vld [vmem:[%s5991_s8 + $0x10] sm:$0xff] }
 0xf54   : > { %2979 = vmatpush.msrb.mxu1 %v4624_v57 }
 0xf56   : > { %2980 = vmatpush.msrb.mxu1 %v4623_v60 }
 0xf58   : > { %v2822_v1 = vpop.f32.mrf.mxu0  ;;  %2981 = vmatpush.msrb.mxu1 %v4622_v12 }
 0xf59   : > { %v2823_v2 = vadd.f32 %v4869_v63, %v2822_v1  ;;  %4612 = vmatmul.msk.f32.vlgmr.msra.gmra.mxu1 %vm1682_vm9, %v2763_v0  ;;  %v4875_v1 = vld [vmem:[%s5990_s6 + $0x7] ss:$0 sm:$0xff] }
 0xf5a   : > { %3111 = vmatpush.msra.mxu1 %v4637_v55 }
 0xf5b   : > { %2895 = vmatpush.msra.mxu3 %v2823_v2 }
 0xf5d   : > { %3008 = vmatpush.msrb.mxu3 %v4631_v50 }
 0xf5f   : > { %3009 = vmatpush.msrb.mxu3 %v4630_v21 }
 0xf60   : > { %v2953_v44 = vpop.f32.mrf.mxu0 }
 0xf61   : > { %4627 = vmatmul.msk.f32.vlgmr.msrb.gmra.mxu1 %vm1291_vm2, %v5581_v51  ;;  %3010 = vmatpush.msrb.mxu3 %v4629_v22  ;;  %v2954_v48 = vadd.f32 %v4870_v42, %v2953_v44  ;;  %v4667_v44 = vld [vmem:[%s5995_s3 + $0x98] sm:$0xff] }
 0xf63   : > { %3011 = vmatpush.msrb.mxu3 %v4628_v23 }
 0xfce   : > { %v5650_v4 = vpop.f32.mrf.mxu1 }
 0xfcf   : > { %v2734_v57 = vadd.f32 %v4871_v56, %v5650_v4 }
 0xfd6   : > { %v2848_v5 = vpop.f32.mrf.mxu1 }
 0xfd7   : > { %v2851_v6 = vmul.f32 0.35355338, %v2848_v5 }
 0xfd9   : > { %v2852_v7 = vadd.f32 %v2851_v6, %v5615_v19 }
 0xfdb   : > { %v2853_v9 = vsel %vm1682_vm9, %v2852_v7, -inf }
 0xfdc   : > { %2854 = vmax.xlane.f32.xlu2 %v2853_v9 }
 0xfde   : > { %v2983_v13 = vpop.f32.mrf.mxu1 }
 0xfdf   : > { %v2984_v14 = vadd.f32 %v4872_v11, %v2983_v13  ;;  %v4654_v11 = vld [vmem:[%s5987_s10 + $0x178] sm:$0xff]  ;;  %v4653_v13 = vld [vmem:[%s5987_s10 + $0x170] sm:$0xff] }
 0xfe1   : > { %4634 = vmatpush.xpose.msk.msra.mxu2 %vm1682_vm9, %v2984_v14  ;;  %v4652_v14 = vld [vmem:[%s5987_s10 + $0x168] sm:$0xff] }
0x104f   : > { %v2855_v15 = vpop.xlane.xlu2 %2854 }
0x1050   : > { %v2856_v16 = vsub.f32 %v2852_v7, %v2855_v15  ;;  %v4651_v15 = vld [vmem:[%s5987_s10 + $0x160] sm:$0xff] }
0x1052   : > { %v2857_v17 = vmul.f32 1.442695, %v2856_v16 }
0x1054   : > { %4925 = vpow2.f32 %v2857_v17 }
0x105a   : > { %v4926_v18 = vpop.eup %4925 }
0x105b   : > { %v2859_v20 = vsel %vm1682_vm9, %v4926_v18, 0.0 }
0x105c   : > { %2860 = vadd.xlane.f32.xlu2 %v2859_v20 }
0x10cf   : > { %v2861_v24 = vpop.xlane.xlu2 %2860 }
0x10d0   : > { %4927 = vrcp.f32 %v2861_v24  ;;  %v2873_v26 = vand.u32 2147483648, %v2861_v24  ;;  %v2871_v28 = vand.u32 2147483647, %v2861_v24  ;;  %vm2867_vm13 = vweird.f32 %v2861_v24 }
0x10d2   : > { %v2874_v30 = vor.u32 1.1754944e-38, %v2873_v26  ;;  %vm2872_vm0 = vcmp.eq.f32.partialorder %v2871_v28, 8.507059e+37 }
0x10d6   : > { %v4928_v45 = vpop.eup %4927 }
0x10d7   : > { %v2863_v8 = vmul.f32 %v4928_v45, %v2861_v24  ;;  %vm2868_vm12 = vweird.f32 %v4928_v45 }
0x10d8   : > { %vm2869_vm15 = vmor %vm2867_vm13, %vm2868_vm12 }
0x10d9   : > { %v2864_v25 = vsub.f32 1.0, %v2863_v8 }
0x10db   : > { %v2865_v27 = vmul.f32 %v4928_v45, %v2864_v25 }
0x10dd   : > { %v2866_v29 = vadd.f32 %v4928_v45, %v2865_v27  ;;  %v4874_v27 = vld [vmem:[%s5990_s6 + $0x3] ss:$0 sm:$0xff] }
0x10df   : > { %v2870_v31 = vsel %vm2869_vm15, %v4928_v45, %v2866_v29  ;;  %v4876_v29 = vld [vmem:[%s5990_s6 + $0xb] ss:$0 sm:$0xff]  ;;  %s5997_s6 = sld [smem:[#allocation29_spill]] }
0x10e0   : > { %v2875_v32 = vsel %vm2872_vm0, %v2874_v30, %v2870_v31 }
0x10e1   : > { %v2876_v33 = vmul.f32 %v4926_v18, %v2875_v32 }
0x10e3   : > { %4613 = vmatmul.msk.f32.vlgmr.msra.gmra.mxu3 %vm1682_vm9, %v2876_v33 }
0x10e4   : > { %3139 = vmatpush.msra.mxu3 %v4642_v34 }
0x10e6   : > { %3140 = vmatpush.msra.mxu3 %v4641_v36 }
0x10e8   : > { %3141 = vmatpush.msra.mxu3 %v4640_v37  ;;  %v4867_v37 = vld [vmem:[%s5994_s5] ss:$0 sm:$0xff]  ;;  %s5996_s5 = sld [smem:[#allocation28_spill]] }
0x10ea   : > { %3142 = vmatpush.msra.mxu3 %v4639_v38 }
0x10eb   : > { %4633 = vmatmul.msk.f32.vlgmr.msrb.gmra.mxu3 %vm1291_vm2, %v5581_v51 }
0x10f3   : > { %4644 = vmatmul.msk.f32.vlgmr.msra.gmra.mxu3 %vm1291_vm2, %v5581_v51 }
0x1166   : > { %v2897_v40 = vpop.f32.mrf.mxu3 }
0x1167   : > { %4615 = vmatmul.msk.f32.vlgmr.msrb.gmra.mxu2 %vm1682_vm9, %v2897_v40 }
0x1168   : > { %3169 = vmatpush.msrb.mxu2 %v4648_v39 }
0x116a   : > { %3170 = vmatpush.msrb.mxu2 %v4647_v41 }
0x116c   : > { %3171 = vmatpush.msrb.mxu2 %v4646_v43 }
0x116e   : > { %v3013_v52 = vpop.f32.mrf.mxu3  ;;  %3172 = vmatpush.msrb.mxu2 %v4645_v47 }
0x116f   : > { %v3014_v53 = vadd.f32 %v4873_v46, %v3013_v52  ;;  %4635 = vmatmul.msk.f32.vlgmr.msra.gmra.mxu2 %vm1682_vm9, %v2954_v48  ;;  %v4666_v46 = vld [vmem:[%s5995_s3 + $0x90] sm:$0xff]  ;;  %v4665_v48 = vld [vmem:[%s5995_s3 + $0x88] sm:$0xff] }
0x1171   : > { %3086 = vmatpush.msra.mxu0 %v3014_v53 }
0x1173   : > { %3199 = vmatpush.msrb.mxu0 %v4654_v11 }
0x1175   : > { %3200 = vmatpush.msrb.mxu0 %v4653_v13  ;;  %v4660_v13 = vld [vmem:[%s5991_s8 + $0x18] sm:$0xff]  ;;  %s5998_s8 = sld [smem:[#allocation30_spill]] }
0x1176   : > { %v3144_v28 = vpop.f32.mrf.mxu3  ;;  %3302 = vmatpush.msra.mxu2 %v4660_v13 }
0x1177   : > { %4650 = vmatmul.msk.f32.vlgmr.msrb.gmra.mxu2 %vm1291_vm2, %v5581_v51  ;;  %3201 = vmatpush.msrb.mxu0 %v4652_v14  ;;  %v3145_v30 = vadd.f32 %v4874_v27, %v3144_v28  ;;  %v3335_v27 = vld [vmem:[%s5995_s3 + $0x10] sm:$0xff]  ;;  %v3334_v28 = vld [vmem:[%s5995_s3 + $0x8] sm:$0xff] }
0x1179   : > { %3202 = vmatpush.msrb.mxu0 %v4651_v15 }
0x11ea   : > { %v2922_v59 = vpop.f32.mrf.mxu2 }
0x11eb   : > { %v2925_v60 = vadd.f32 %v2922_v59, %v2734_v57 }
0x11f2   : > { %v3039_v62 = vpop.f32.mrf.mxu2 }
0x11f3   : > { %v3042_v63 = vmul.f32 0.35355338, %v3039_v62 }
0x11f5   : > { %v3043_v12 = vadd.f32 %v3042_v63, %v5615_v19 }
0x11f7   : > { %v3044_v0 = vsel %vm1682_vm9, %v3043_v12, -inf }
0x11f8   : > { %3045 = vmax.xlane.f32.xlu2 %v3044_v0 }
0x11fa   : > { %v3174_v2 = vpop.f32.mrf.mxu2 }
0x11fb   : > { %v3175_v3 = vadd.f32 %v4875_v1, %v3174_v2  ;;  %v4877_v1 = vld [vmem:[%s5156_s20 + $0x2] ss:$0 sm:$0xff] }
0x11fd   : > { %4657 = vmatpush.xpose.msk.msrb.mxu1 %vm1682_vm9, %v3175_v3 }
0x126b   : > { %v3046_v5 = vpop.xlane.xlu2 %3045 }
0x126c   : > { %v3047_v4 = vsub.f32 %v3043_v12, %v3046_v5 }
0x126e   : > { %v3048_v6 = vmul.f32 1.442695, %v3047_v4  ;;  %v4673_v4 = vld [vmem:[%s5995_s3 + $0x118] sm:$0xff] }
0x1270   : > { %4929 = vpow2.f32 %v3048_v6  ;;  %v4672_v6 = vld [vmem:[%s5995_s3 + $0x110] sm:$0xff] }
0x1276   : > { %v4930_v7 = vpop.eup %4929 }
0x1277   : > { %v3050_v9 = vsel %vm1682_vm9, %v4930_v7, 0.0 }
0x1278   : > { %3051 = vadd.xlane.f32.xlu2 %v3050_v9  ;;  %v4670_v9 = vld [vmem:[%s5995_s3 + $0x100] sm:$0xff] }
0x12eb   : > { %v3052_v16 = vpop.xlane.xlu2 %3051 }
0x12ec   : > { %4931 = vrcp.f32 %v3052_v16  ;;  %v3064_v50 = vand.u32 2147483648, %v3052_v16  ;;  %v3062_v22 = vand.u32 2147483647, %v3052_v16  ;;  %vm3058_vm3 = vweird.f32 %v3052_v16 }
0x12ee   : > { %v3065_v24 = vor.u32 1.1754944e-38, %v3064_v50  ;;  %vm3063_vm5 = vcmp.eq.f32.partialorder %v3062_v22, 8.507059e+37 }
0x12f2   : > { %v4932_v17 = vpop.eup %4931 }
0x12f3   : > { %v3054_v18 = vmul.f32 %v4932_v17, %v3052_v16  ;;  %vm3059_vm1 = vweird.f32 %v4932_v17 }
0x12f4   : > { %vm3060_vm4 = vmor %vm3058_vm3, %vm3059_vm1 }
0x12f5   : > { %v3055_v20 = vsub.f32 1.0, %v3054_v18 }
0x12f7   : > { %v3056_v21 = vmul.f32 %v4932_v17, %v3055_v20 }
0x12f9   : > { %v3057_v23 = vadd.f32 %v4932_v17, %v3056_v21 }
0x12fb   : > { %v3061_v45 = vsel %vm3060_vm4, %v4932_v17, %v3057_v23 }
0x12fc   : > { %v3066_v8 = vsel %vm3063_vm5, %v3065_v24, %v3061_v45  ;;  %v4878_v45 = vld [vmem:[%s5996_s5 + $0x4] ss:$0 sm:$0xff] }
0x12fd   : > { %v3067_v25 = vmul.f32 %v4930_v7, %v3066_v8  ;;  %v4671_v7 = vld [vmem:[%s5995_s3 + $0x108] sm:$0xff] }
0x12ff   : > { %4636 = vmatmul.msk.f32.vlgmr.msra.gmra.mxu0 %vm1682_vm9, %v3067_v25 }
0x1307   : > { %4656 = vmatmul.msk.f32.vlgmr.msrb.gmra.mxu0 %vm1291_vm2, %v5581_v51  ;;  %v2450_v51 = vadd.f32 %v5637_v54, %v5543_v58  ;;  %v4664_v54 = vld [vmem:[%s5995_s3 + $0x80] sm:$0xff] }
0x1309   : > { %v2455_v40 = vadd.f32 %v4867_v37, %v2450_v51 }
0x130b   : > { %v2456_v42 = vmul.f32 %v2455_v40, %v2455_v40 }
0x130d   : > { %v2457_v43 = vsel %vm1291_vm2, %v2456_v42, 0.0  ;;  %v4681_v42 = vld [vmem:[%s5995_s3 + $0x28] sm:$0xff] }
0x137c   : > { %v3088_v26 = vpop.f32.mrf.mxu0 }
0x137d   : > { %4638 = vmatmul.msk.f32.vlgmr.msra.gmra.mxu1 %vm1682_vm9, %v3088_v26  ;;  %v3336_v26 = vld [vmem:[%s5995_s3 + $0x18] sm:$0xff] }
0x137e   : > { %3389 = vmatpush.msra.mxu1 %v4667_v44  ;;  %3356 = vmatpush.msra.mxu0 %v3336_v26 }
0x1380   : > { %3390 = vmatpush.msra.mxu1 %v4666_v46  ;;  %3357 = vmatpush.msra.mxu0 %v3335_v27 }
0x1382   : > { %3391 = vmatpush.msra.mxu1 %v4665_v48  ;;  %3358 = vmatpush.msra.mxu0 %v3334_v28 }
0x1384   : > { %v3204_v31 = vpop.f32.mrf.mxu0  ;;  %3392 = vmatpush.msra.mxu1 %v4664_v54 }
0x1385   : > { %v3205_v32 = vadd.f32 %v4876_v29, %v3204_v31  ;;  %4658 = vmatmul.msk.f32.vlgmr.msrb.gmra.mxu1 %vm1682_vm9, %v3145_v30  ;;  %v3333_v29 = vld [vmem:[%s5995_s3] sm:$0xff]  ;;  %v4879_v31 = vld [vmem:[%s5996_s5 + $0x8] ss:$0 sm:$0xff] }
0x1386   : > { %3359 = vmatpush.msra.mxu0 %v3333_v29 }
0x1387   : > { %3277 = vmatpush.msrb.mxu3 %v3205_v32 }
0x1389   : > { %3419 = vmatpush.msra.mxu3 %v4673_v4 }
0x138b   : > { %3420 = vmatpush.msra.mxu3 %v4672_v6 }
0x138d   : > { %3421 = vmatpush.msra.mxu3 %v4671_v7  ;;  %v4883_v7 = vld [vmem:[%s5996_s5 + $0x5] ss:$0 sm:$0xff] }
0x138f   : > { %3422 = vmatpush.msra.mxu3 %v4670_v9 }
0x13fa   : > { %v3113_v33 = vpop.f32.mrf.mxu1 }
0x13fb   : > { %v5699_v34 = vadd.f32 %v3113_v33, %v2925_v60 }
0x1402   : > { %v3230_v36 = vpop.f32.mrf.mxu1 }
0x1403   : > { %v3233_v38 = vmul.f32 0.35355338, %v3230_v36 }
0x1405   : > { %v3234_v39 = vadd.f32 %v3233_v38, %v5615_v19 }
0x1407   : > { %v3235_v41 = vsel %vm1682_vm9, %v3234_v39, -inf }
0x1408   : > { %3236 = vmax.xlane.f32.xlu2 %v3235_v41  ;;  %v4682_v41 = vld [vmem:[%s5995_s3 + $0x30] sm:$0xff] }
0x1410   : > { %2458 = vadd.xlane.f32.xlu2 %v2457_v43  ;;  %v4680_v43 = vld [vmem:[%s5995_s3 + $0x20] sm:$0xff] }
0x147b   : > { %v3237_v47 = vpop.xlane.xlu2 %3236 }
0x147c   : > { %v3238_v58 = vsub.f32 %v3234_v39, %v3237_v47 }
0x147e   : > { %v3239_v52 = vmul.f32 1.442695, %v3238_v58 }
0x1480   : > { %4933 = vpow2.f32 %v3239_v52 }
0x1483   : > { %v2459_v19 = vpop.xlane.xlu2 %2458 }
0x1484   : > { %v2460_v53 = vmul.f32 %v2459_v19, %v5412_v35  ;;  %v4880_v19 = vld [vmem:[%s5156_s20 + $0x4] ss:$0 sm:$0xff] }
0x1486   : > { %v4934_v55 = vpop.eup %4933  ;;  %v2461_v56 = vadd.f32 1e-06, %v2460_v53 }
0x1487   : > { %v3241_v57 = vsel %vm1682_vm9, %v4934_v55, 0.0 }
0x1488   : > { %4935 = vrsqrt.f32 %v2461_v56  ;;  %3242 = vadd.xlane.f32.xlu0 %v3241_v57  ;;  %vm2468_vm7 = vweird.f32 %v2461_v56  ;;  %v4689_v57 = vld [vmem:[%s5995_s3 + $0xb8] sm:$0xff] }
0x148e   : > { %v4936_v59 = vpop.eup %4935 }
0x148f   : > { %v2463_v60 = vmul.f32 %v4936_v59, %v2461_v56  ;;  %vm2469_vm6 = vweird.f32 %v4936_v59 }
0x1490   : > { %vm2470_vm8 = vmor %vm2468_vm7, %vm2469_vm6 }
0x1491   : > { %v2464_v62 = vmul.f32 %v4936_v59, %v2463_v60  ;;  %v4687_v60 = vld [vmem:[%s5995_s3 + $0xa8] sm:$0xff] }
0x1493   : > { %v2465_v63 = vmul.f32 0.5, %v2464_v62  ;;  %v4686_v62 = vld [vmem:[%s5995_s3 + $0xa0] sm:$0xff] }
0x1495   : > { %v2466_v12 = vsub.f32 1.5, %v2465_v63  ;;  %v4881_v63 = vld [vmem:[%s5996_s5] ss:$0 sm:$0xff] }
0x1497   : > { %v2467_v0 = vmul.f32 %v4936_v59, %v2466_v12 }
0x1499   : > { %v2471_v2 = vsel %vm2470_vm8, %v4936_v59, %v2467_v0  ;;  %v4688_v59 = vld [vmem:[%s5995_s3 + $0xb0] sm:$0xff] }
0x149a   : > { %v2472_v3 = vmul.f32 %v2471_v2, %v2455_v40  ;;  %v4683_v40 = vld [vmem:[%s5995_s3 + $0x38] sm:$0xff] }
0x149c   : > { %v5714_v5 = vmul.f32 %v4877_v1, %v2472_v3  ;;  %v3502_v1 = vld [vmem:[%s5997_s6] sm:$0xff] }
0x149d   : > { %3521 = vmatpush.msrb.mxu1 %v3502_v1  ;;  %v4718_v1 = vld [vmem:[%s5995_s3 + $0x158] sm:$0xff] }
0x149e   : > { %4669 = vmatmul.msk.f32.vlgmr.msra.gmra.mxu1 %vm1291_vm2, %v5714_v5 }
0x14fb   : > { %v3243_v11 = vpop.xlane.xlu0 %3242 }
0x14fc   : > { %4937 = vrcp.f32 %v3243_v11  ;;  %v3255_v17 = vand.u32 2147483648, %v3243_v11  ;;  %v3253_v20 = vand.u32 2147483647, %v3243_v11  ;;  %vm3249_vm11 = vweird.f32 %v3243_v11 }
0x14fe   : > { %v3256_v21 = vor.u32 1.1754944e-38, %v3255_v17  ;;  %vm3254_vm13 = vcmp.eq.f32.partialorder %v3253_v20, 8.507059e+37  ;;  %v4694_v20 = vld [vmem:[%s5995_s3 + $0x130] sm:$0xff] }
0x1502   : > { %v4938_v14 = vpop.eup %4937 }
0x1503   : > { %v3245_v15 = vmul.f32 %v4938_v14, %v3243_v11  ;;  %vm3250_vm10 = vweird.f32 %v4938_v14 }
0x1504   : > { %vm3251_vm12 = vmor %vm3249_vm11, %vm3250_vm10 }
0x1505   : > { %v3246_v16 = vsub.f32 1.0, %v3245_v15 }
0x1507   : > { %v3247_v18 = vmul.f32 %v4938_v14, %v3246_v16 }
0x1509   : > { %v3248_v50 = vadd.f32 %v4938_v14, %v3247_v18  ;;  %v4695_v18 = vld [vmem:[%s5995_s3 + $0x138] sm:$0xff] }
0x150b   : > { %v3252_v22 = vsel %vm3251_vm12, %v4938_v14, %v3248_v50  ;;  %v4693_v50 = vld [vmem:[%s5995_s3 + $0x128] sm:$0xff] }
0x150c   : > { %v3257_v23 = vsel %vm3254_vm13, %v3256_v21, %v3252_v22  ;;  %v4692_v21 = vld [vmem:[%s5995_s3 + $0x120] sm:$0xff] }
0x150d   : > { %v3258_v24 = vmul.f32 %v4934_v55, %v3257_v23 }
0x150f   : > { %4659 = vmatmul.msk.f32.vlgmr.msrb.gmra.mxu3 %vm1682_vm9, %v3258_v24 }
0x1510   : > { %3552 = vmatpush.msrb.mxu3 %v4683_v40  ;;  %v4711_v40 = vld [vmem:[%s5995_s3 + $0xd0] sm:$0xff] }
0x1512   : > { %3553 = vmatpush.msrb.mxu3 %v4682_v41  ;;  %v4882_v41 = vld [vmem:[%s5996_s5 + $0x1] ss:$0 sm:$0xff] }
0x1514   : > { %3554 = vmatpush.msrb.mxu3 %v4681_v42  ;;  %v4710_v42 = vld [vmem:[%s5995_s3 + $0xc8] sm:$0xff] }
0x1516   : > { %3555 = vmatpush.msrb.mxu3 %v4680_v43 }
0x1517   : > { %4675 = vmatmul.msk.f32.vlgmr.msra.gmra.mxu3 %vm1291_vm2, %v5714_v5 }
0x151b   : > { %v3394_v8 = vpop.f32.mrf.mxu1 }
0x151c   : > { %v3395_v25 = vadd.f32 %v4878_v45, %v3394_v8 }
0x151e   : > { %4676 = vmatpush.xpose.msk.msrb.mxu2 %vm1682_vm9, %v3395_v25 }
0x1592   : > { %v3279_v30 = vpop.f32.mrf.mxu3 }
0x1593   : > { %4661 = vmatmul.msk.f32.vlgmr.msra.gmra.mxu2 %vm1682_vm9, %v3279_v30 }
0x1594   : > { %3582 = vmatpush.msra.mxu2 %v4689_v57 }
0x1596   : > { %3583 = vmatpush.msra.mxu2 %v4688_v59 }
0x1598   : > { %3584 = vmatpush.msra.mxu2 %v4687_v60 }
0x159a   : > { %v3424_v32 = vpop.f32.mrf.mxu3  ;;  %3585 = vmatpush.msra.mxu2 %v4686_v62 }
0x159b   : > { %v3425_v33 = vadd.f32 %v4879_v31, %v3424_v32  ;;  %v4706_v32 = vld [vmem:[%s5995_s3 + $0x58] sm:$0xff] }
0x159d   : > { %3497 = vmatpush.msrb.mxu0 %v3425_v33  ;;  %v4705_v33 = vld [vmem:[%s5995_s3 + $0x50] sm:$0xff] }
0x1616   : > { %v3304_v36 = vpop.f32.mrf.mxu2 }
0x1617   : > { %v3307_v51 = vadd.f32 %v3304_v36, %v5699_v34  ;;  %v4704_v36 = vld [vmem:[%s5995_s3 + $0x48] sm:$0xff] }
0x1619   : > { %v5736_v37 = vadd.f32 %v3307_v51, %v5548_v61  ;;  %v4703_v51 = vld [vmem:[%s5995_s3 + $0x40] sm:$0xff] }
0x161b   : > { %v3309_v38 = vmul.f32 %v5736_v37, %v5736_v37 }
0x161d   : > { %v3310_v39 = vsel %vm1291_vm2, %v3309_v38, 0.0  ;;  %v4712_v38 = vld [vmem:[%s5995_s3 + $0xd8] sm:$0xff] }
0x161e   : > { %3311 = vadd.xlane.f32.xlu0 %v3310_v39 }
0x1691   : > { %v3312_v44 = vpop.xlane.xlu0 %3311 }
0x1692   : > { %v3313_v34 = vmul.f32 %v3312_v44, %v5412_v35  ;;  %v4884_v44 = vld [vmem:[%s5996_s5 + $0x9] ss:$0 sm:$0xff] }
0x1694   : > { %v3314_v61 = vadd.f32 1e-06, %v3313_v34  ;;  %v4709_v34 = vld [vmem:[%s5995_s3 + $0xc0] sm:$0xff] }
0x1696   : > { %4939 = vrsqrt.f32 %v3314_v61  ;;  %vm3321_vm0 = vweird.f32 %v3314_v61 }
0x169c   : > { %v4940_v46 = vpop.eup %4939 }
0x169d   : > { %v3316_v47 = vmul.f32 %v4940_v46, %v3314_v61  ;;  %vm3322_vm15 = vweird.f32 %v4940_v46 }
0x169e   : > { %vm3323_vm1 = vmor %vm3321_vm0, %vm3322_vm15 }
0x169f   : > { %v3317_v48 = vmul.f32 %v4940_v46, %v3316_v47 }
0x16a1   : > { %v3318_v58 = vmul.f32 0.5, %v3317_v48  ;;  %v4701_v48 = vld [vmem:[%s5997_s6 + $0x8] sm:$0xff] }
0x16a3   : > { %v3319_v54 = vsub.f32 1.5, %v3318_v58 }
0x16a5   : > { %v3320_v52 = vmul.f32 %v4940_v46, %v3319_v54 }
0x16a7   : > { %v3324_v53 = vsel %vm3323_vm1, %v4940_v46, %v3320_v52 }
0x16a8   : > { %v3325_v55 = vmul.f32 %v3324_v53, %v5736_v37 }
0x16aa   : > { %v5748_v56 = vmul.f32 %v4880_v19, %v3325_v55  ;;  %v4887_v55 = vld [vmem:[%s5996_s5 + $0x6] ss:$0 sm:$0xff] }
0x16ac   : > { %4663 = vmatmul.msk.f32.vlgmr.msra.gmra.mxu0 %vm1291_vm2, %v5748_v56  ;;  %4685 = vmatmul.msk.f32.vlgmr.msrb.gmra.mxu3 %vm1291_vm2, %v5748_v56 }
0x16ad   : > { %3612 = vmatpush.msra.mxu0 %v4695_v18 }
0x16af   : > { %3613 = vmatpush.msra.mxu0 %v4694_v20 }
0x16b1   : > { %3614 = vmatpush.msra.mxu0 %v4693_v50 }
0x16b3   : > { %3615 = vmatpush.msra.mxu0 %v4692_v21  ;;  %v4729_v21 = vld [vmem:[%s5995_s3 + $0x78] sm:$0xff] }
0x1729   : > { %v3361_v12 = vpop.f32.mrf.mxu0 }
0x172a   : > { %v3362_v0 = vadd.f32 %v4881_v63, %v3361_v12 }
0x172c   : > { %4677 = vmatmul.msk.f32.vlgmr.msrb.gmra.mxu2 %vm1682_vm9, %v3362_v0 }
0x172d   : > { %3715 = vmatpush.msrb.mxu2 %v4701_v48 }
0x172f   : > { %v3557_v43 = vpop.f32.mrf.mxu3 }
0x1730   : > { %v3558_v61 = vadd.f32 %v4882_v41, %v3557_v43 }
0x1734   : > { %4691 = vmatmul.msk.f32.vlgmr.msra.gmra.mxu2 %vm1291_vm2, %v5714_v5 }
0x17af   : > { %v3450_v2 = vpop.f32.mrf.mxu2 }
0x17b0   : > { %v3453_v3 = vmul.f32 0.35355338, %v3450_v2  ;;  %v4717_v2 = vld [vmem:[%s5995_s3 + $0x150] sm:$0xff] }
0x17b2   : > { %v3454_v4 = vadd.f32 %v3453_v3, %v5449_v10  ;;  %v4716_v3 = vld [vmem:[%s5995_s3 + $0x148] sm:$0xff] }
0x17b4   : > { %v3455_v6 = vsel %vm1682_vm9, %v3454_v4, -inf }
0x17b5   : > { %3456 = vmax.xlane.f32.xlu2 %v3455_v6 }
0x17b7   : > { %v3587_v9 = vpop.f32.mrf.mxu2 }
0x17b8   : > { %v3588_v11 = vadd.f32 %v4883_v7, %v3587_v9 }
0x17ba   : > { %4698 = vmatpush.xpose.msk.msra.mxu1 %vm1682_vm9, %v3588_v11 }
0x1828   : > { %v3457_v13 = vpop.xlane.xlu2 %3456 }
0x1829   : > { %v3458_v14 = vsub.f32 %v3454_v4, %v3457_v13  ;;  %v4715_v4 = vld [vmem:[%s5995_s3 + $0x140] sm:$0xff] }
0x182b   : > { %v3459_v15 = vmul.f32 1.442695, %v3458_v14 }
0x182d   : > { %4941 = vpow2.f32 %v3459_v15 }
0x1833   : > { %v4942_v16 = vpop.eup %4941 }
0x1834   : > { %v3461_v17 = vsel %vm1682_vm9, %v4942_v16, 0.0 }
0x1835   : > { %3462 = vadd.xlane.f32.xlu0 %v3461_v17 }
0x18a8   : > { %v3463_v22 = vpop.xlane.xlu0 %3462 }
0x18a9   : > { %4943 = vrcp.f32 %v3463_v22  ;;  %v3475_v8 = vand.u32 2147483648, %v3463_v22  ;;  %v3473_v26 = vand.u32 2147483647, %v3463_v22  ;;  %vm3469_vm4 = vweird.f32 %v3463_v22 }
0x18ab   : > { %v3476_v28 = vor.u32 1.1754944e-38, %v3475_v8  ;;  %vm3474_vm6 = vcmp.eq.f32.partialorder %v3473_v26, 8.507059e+37  ;;  %v4885_v26 = vld [vmem:[%s5996_s5 + $0x2] ss:$0 sm:$0xff] }
0x18af   : > { %v4944_v23 = vpop.eup %4943 }
0x18b0   : > { %v3465_v24 = vmul.f32 %v4944_v23, %v3463_v22  ;;  %vm3470_vm3 = vweird.f32 %v4944_v23  ;;  %v4728_v22 = vld [vmem:[%s5995_s3 + $0x70] sm:$0xff] }
0x18b1   : > { %vm3471_vm5 = vmor %vm3469_vm4, %vm3470_vm3 }
0x18b2   : > { %v3466_v45 = vsub.f32 1.0, %v3465_v24  ;;  %v4726_v24 = vld [vmem:[%s5995_s3 + $0x60] sm:$0xff] }
0x18b4   : > { %v3467_v25 = vmul.f32 %v4944_v23, %v3466_v45  ;;  %v4735_v45 = vld [vmem:[%s5995_s3 + $0xf8] sm:$0xff] }
0x18b6   : > { %v3468_v27 = vadd.f32 %v4944_v23, %v3467_v25  ;;  %v4734_v25 = vld [vmem:[%s5995_s3 + $0xf0] sm:$0xff] }
0x18b8   : > { %v3472_v29 = vsel %vm3471_vm5, %v4944_v23, %v3468_v27  ;;  %v4727_v23 = vld [vmem:[%s5995_s3 + $0x68] sm:$0xff] }
0x18b9   : > { %v3477_v30 = vsel %vm3474_vm6, %v3476_v28, %v3472_v29  ;;  %v4733_v27 = vld [vmem:[%s5995_s3 + $0xe8] sm:$0xff] }
0x18ba   : > { %v3478_v31 = vmul.f32 %v4942_v16, %v3477_v30  ;;  %v4888_v29 = vld [vmem:[%s5996_s5 + $0xa] ss:$0 sm:$0xff]  ;;  %v4732_v30 = vld [vmem:[%s5995_s3 + $0xe0] sm:$0xff] }
0x18bc   : > { %4678 = vmatmul.msk.f32.vlgmr.msrb.gmra.mxu0 %vm1682_vm9, %v3478_v31 }
0x18bd   : > { %3743 = vmatpush.msrb.mxu0 %v4706_v32 }
0x18bf   : > { %3744 = vmatpush.msrb.mxu0 %v4705_v33  ;;  %v4724_v33 = vld [vmem:[%s5997_s6 + $0x10] sm:$0xff] }
0x18c1   : > { %3745 = vmatpush.msrb.mxu0 %v4704_v36  ;;  %v4886_v36 = vld [vmem:[%s5998_s8] ss:$0 sm:$0xff]  ;;  %s5999_s8 = sld [smem:[#allocation31_spill]] }
0x18c3   : > { %3746 = vmatpush.msrb.mxu0 %v4703_v51 }
0x18c4   : > { %4697 = vmatmul.msk.f32.vlgmr.msra.gmra.mxu0 %vm1291_vm2, %v5714_v5 }
0x18cc   : > { %4708 = vmatmul.msk.f32.vlgmr.msrb.gmra.mxu0 %vm1291_vm2, %v5748_v56 }
0x1939   : > { %v3499_v39 = vpop.f32.mrf.mxu0 }
0x193a   : > { %4679 = vmatmul.msk.f32.vlgmr.msrb.gmra.mxu1 %vm1682_vm9, %v3499_v39 }
0x193b   : > { %3773 = vmatpush.msrb.mxu1 %v4712_v38 }
0x193d   : > { %3774 = vmatpush.msrb.mxu1 %v4711_v40 }
0x193f   : > { %3775 = vmatpush.msrb.mxu1 %v4710_v42 }
0x1941   : > { %v3617_v46 = vpop.f32.mrf.mxu0  ;;  %3776 = vmatpush.msrb.mxu1 %v4709_v34 }
0x1942   : > { %v3618_v47 = vadd.f32 %v4884_v44, %v3617_v46  ;;  %4699 = vmatmul.msk.f32.vlgmr.msra.gmra.mxu1 %vm1682_vm9, %v3558_v61  ;;  %v4890_v44 = vld [vmem:[%s5996_s5 + $0x7] ss:$0 sm:$0xff] }
0x1943   : > { %3906 = vmatpush.msra.mxu1 %v4724_v33 }
0x1944   : > { %3690 = vmatpush.msra.mxu3 %v3618_v47 }
0x1946   : > { %3803 = vmatpush.msrb.mxu3 %v4718_v1 }
0x1948   : > { %3804 = vmatpush.msrb.mxu3 %v4717_v2 }
0x1949   : > { %v3748_v28 = vpop.f32.mrf.mxu0 }
0x194a   : > { %4714 = vmatmul.msk.f32.vlgmr.msrb.gmra.mxu1 %vm1291_vm2, %v5714_v5  ;;  %3805 = vmatpush.msrb.mxu3 %v4716_v3  ;;  %v3749_v31 = vadd.f32 %v4885_v26, %v3748_v28 }
0x194c   : > { %3806 = vmatpush.msrb.mxu3 %v4715_v4 }
0x19b7   : > { %v5792_v58 = vpop.f32.mrf.mxu1 }
0x19b8   : > { %v3529_v51 = vadd.f32 %v4886_v36, %v5792_v58 }
0x19bf   : > { %v3643_v54 = vpop.f32.mrf.mxu1 }
0x19c0   : > { %v3646_v52 = vmul.f32 0.35355338, %v3643_v54 }
0x19c2   : > { %v3647_v19 = vadd.f32 %v3646_v52, %v5449_v10  ;;  %v4741_v52 = vld [vmem:[%s5995_s3 + $0x178] sm:$0xff] }
0x19c4   : > { %v3648_v53 = vsel %vm1682_vm9, %v3647_v19, -inf }
0x19c5   : > { %3649 = vmax.xlane.f32.xlu2 %v3648_v53  ;;  %v4739_v53 = vld [vmem:[%s5995_s3 + $0x168] sm:$0xff] }
0x19c7   : > { %v3778_v57 = vpop.f32.mrf.mxu1 }
0x19c8   : > { %v3779_v59 = vadd.f32 %v4887_v55, %v3778_v57  ;;  %v4738_v55 = vld [vmem:[%s5995_s3 + $0x160] sm:$0xff] }
0x19ca   : > { %4721 = vmatpush.xpose.msk.msra.mxu2 %vm1682_vm9, %v3779_v59 }
0x1a38   : > { %v3650_v60 = vpop.xlane.xlu2 %3649 }
0x1a39   : > { %v3651_v62 = vsub.f32 %v3647_v19, %v3650_v60  ;;  %v4740_v19 = vld [vmem:[%s5995_s3 + $0x170] sm:$0xff]  ;;  %s6000_s3 = sld [smem:[#allocation33_spill]] }
0x1a3b   : > { %v3652_v63 = vmul.f32 1.442695, %v3651_v62 }
0x1a3d   : > { %4945 = vpow2.f32 %v3652_v63 }
0x1a43   : > { %v4946_v12 = vpop.eup %4945 }
0x1a44   : > { %v3654_v0 = vsel %vm1682_vm9, %v4946_v12, 0.0 }
0x1a45   : > { %3655 = vadd.xlane.f32.xlu0 %v3654_v0 }
0x1ab8   : > { %v3656_v6 = vpop.xlane.xlu0 %3655 }
0x1ab9   : > { %4947 = vrcp.f32 %v3656_v6  ;;  %v3668_v13 = vand.u32 2147483648, %v3656_v6  ;;  %v3666_v15 = vand.u32 2147483647, %v3656_v6  ;;  %vm3662_vm8 = vweird.f32 %v3656_v6 }
0x1abb   : > { %v3669_v17 = vor.u32 1.1754944e-38, %v3668_v13  ;;  %vm3667_vm11 = vcmp.eq.f32.partialorder %v3666_v15, 8.507059e+37  ;;  %v4891_v13 = vld [vmem:[%s5996_s5 + $0xb] ss:$0 sm:$0xff] }
0x1abf   : > { %v4948_v7 = vpop.eup %4947 }
0x1ac0   : > { %v3658_v9 = vmul.f32 %v4948_v7, %v3656_v6  ;;  %vm3663_vm7 = vweird.f32 %v4948_v7 }
0x1ac1   : > { %vm3664_vm10 = vmor %vm3662_vm8, %vm3663_vm7 }
0x1ac2   : > { %v3659_v11 = vsub.f32 1.0, %v3658_v9  ;;  %v4889_v9 = vld [vmem:[%s5996_s5 + $0x3] ss:$0 sm:$0xff]  ;;  %s6001_s5 = sld [smem:[#allocation32_spill]] }
0x1ac4   : > { %v3660_v14 = vmul.f32 %v4948_v7, %v3659_v11 }
0x1ac6   : > { %v3661_v16 = vadd.f32 %v4948_v7, %v3660_v14 }
0x1ac8   : > { %v3665_v18 = vsel %vm3664_vm10, %v4948_v7, %v3661_v16 }
0x1ac9   : > { %v3670_v20 = vsel %vm3667_vm11, %v3669_v17, %v3665_v18 }
0x1aca   : > { %v3671_v50 = vmul.f32 %v4946_v12, %v3670_v20 }
0x1acc   : > { %4700 = vmatmul.msk.f32.vlgmr.msra.gmra.mxu3 %vm1682_vm9, %v3671_v50 }
0x1acd   : > { %3934 = vmatpush.msra.mxu3 %v4729_v21 }
0x1acf   : > { %3935 = vmatpush.msra.mxu3 %v4728_v22 }
0x1ad1   : > { %3936 = vmatpush.msra.mxu3 %v4727_v23 }
0x1ad3   : > { %3937 = vmatpush.msra.mxu3 %v4726_v24 }
0x1ad4   : > { %4720 = vmatmul.msk.f32.vlgmr.msrb.gmra.mxu3 %vm1291_vm2, %v5714_v5 }
0x1adc   : > { %4731 = vmatmul.msk.f32.vlgmr.msra.gmra.mxu3 %vm1291_vm2, %v5748_v56 }
0x1b4f   : > { %v3692_v8 = vpop.f32.mrf.mxu3 }
0x1b50   : > { %4702 = vmatmul.msk.f32.vlgmr.msrb.gmra.mxu2 %vm1682_vm9, %v3692_v8 }
0x1b51   : > { %3964 = vmatpush.msrb.mxu2 %v4735_v45 }
0x1b53   : > { %3965 = vmatpush.msrb.mxu2 %v4734_v25 }
0x1b55   : > { %3966 = vmatpush.msrb.mxu2 %v4733_v27 }
0x1b57   : > { %v3808_v32 = vpop.f32.mrf.mxu3  ;;  %3967 = vmatpush.msrb.mxu2 %v4732_v30 }
0x1b58   : > { %v3809_v56 = vadd.f32 %v4888_v29, %v3808_v32  ;;  %4722 = vmatmul.msk.f32.vlgmr.msra.gmra.mxu2 %vm1682_vm9, %v3749_v31 }
0x1b5a   : > { %3881 = vmatpush.msra.mxu0 %v3809_v56 }
0x1b5c   : > { %3994 = vmatpush.msrb.mxu0 %v4741_v52 }
0x1b5e   : > { %3995 = vmatpush.msrb.mxu0 %v4740_v19  ;;  %v4162_v19 = vld [vmem:[%s6000_s3 + $0x18] sm:$0xff] }
0x1b5f   : > { %v3939_v11 = vpop.f32.mrf.mxu3 }
0x1b60   : > { %4737 = vmatmul.msk.f32.vlgmr.msrb.gmra.mxu2 %vm1291_vm2, %v5714_v5  ;;  %3996 = vmatpush.msrb.mxu0 %v4739_v53  ;;  %v3940_v14 = vadd.f32 %v4889_v9, %v3939_v11 }
0x1b62   : > { %3997 = vmatpush.msrb.mxu0 %v4738_v55 }
0x1bd3   : > { %v3717_v38 = vpop.f32.mrf.mxu2 }
0x1bd4   : > { %v3720_v39 = vadd.f32 %v3717_v38, %v3529_v51  ;;  %v4747_v51 = vld [vmem:[%s5997_s6 + $0x18] sm:$0xff]  ;;  %s6002_s6 = sld [smem:[#allocation34_spill]] }
0x1bd5   : > { %4097 = vmatpush.msra.mxu2 %v4747_v51  ;;  %v4266_v51 = vpop.permute.xlu1 %4265 }
0x1bdb   : > { %v3834_v40 = vpop.f32.mrf.mxu2 }
0x1bdc   : > { %v3837_v41 = vmul.f32 0.35355338, %v3834_v40 }
0x1bde   : > { %v3838_v42 = vadd.f32 %v3837_v41, %v5449_v10 }
0x1be0   : > { %v3839_v43 = vsel %vm1682_vm9, %v3838_v42, -inf }
0x1be1   : > { %3840 = vmax.xlane.f32.xlu2 %v3839_v43 }
0x1be3   : > { %v3969_v34 = vpop.f32.mrf.mxu2 }
0x1be4   : > { %v3970_v61 = vadd.f32 %v4890_v44, %v3969_v34  ;;  %v4130_v44 = vld [vmem:[%s5999_s8 + $0x18] sm:$0xff]  ;;  %v4129_v34 = vld [vmem:[%s5999_s8 + $0x10] sm:$0xff] }
0x1be6   : > { %4744 = vmatpush.xpose.msk.msrb.mxu1 %vm1682_vm9, %v3970_v61  ;;  %v4128_v61 = vld [vmem:[%s5999_s8 + $0x8] sm:$0xff] }
0x1c54   : > { %v3841_v46 = vpop.xlane.xlu2 %3840 }
0x1c55   : > { %v3842_v47 = vsub.f32 %v3838_v42, %v3841_v46  ;;  %v4127_v46 = vld [vmem:[%s5999_s8] sm:$0xff] }
0x1c57   : > { %v3843_v48 = vmul.f32 1.442695, %v3842_v47  ;;  %v4166_v47 = vld [vmem:[%s6000_s3 + $0x38] sm:$0xff] }
0x1c59   : > { %4949 = vpow2.f32 %v3843_v48  ;;  %v4165_v48 = vld [vmem:[%s6000_s3 + $0x30] sm:$0xff] }
0x1c5f   : > { %v4950_v58 = vpop.eup %4949 }
0x1c60   : > { %v3845_v54 = vsel %vm1682_vm9, %v4950_v58, 0.0 }
0x1c61   : > { %3846 = vadd.xlane.f32.xlu0 %v3845_v54 }
0x1cd4   : > { %v3847_v57 = vpop.xlane.xlu0 %3846 }
0x1cd5   : > { %4951 = vrcp.f32 %v3847_v57  ;;  %v3859_v63 = vand.u32 2147483648, %v3847_v57  ;;  %v3857_v0 = vand.u32 2147483647, %v3847_v57  ;;  %vm3853_vm13 = vweird.f32 %v3847_v57 }
0x1cd7   : > { %v3860_v2 = vor.u32 1.1754944e-38, %v3859_v63  ;;  %vm3858_vm0 = vcmp.eq.f32.partialorder %v3857_v0, 8.507059e+37 }
0x1cdb   : > { %v4952_v59 = vpop.eup %4951 }
0x1cdc   : > { %v3849_v60 = vmul.f32 %v4952_v59, %v3847_v57  ;;  %vm3854_vm12 = vweird.f32 %v4952_v59 }
0x1cdd   : > { %vm3855_vm15 = vmor %vm3853_vm13, %vm3854_vm12  ;;  %vm4267_vm12 = vcmp.eq.s32.totalorder %v5535_v49, %v4266_v51 }
0x1cde   : > { %v3850_v62 = vsub.f32 1.0, %v3849_v60 }
0x1ce0   : > { %v3851_v12 = vmul.f32 %v4952_v59, %v3850_v62 }
0x1ce2   : > { %v3852_v1 = vadd.f32 %v4952_v59, %v3851_v12  ;;  %v4892_v12 = vld [vmem:[%s5156_s20 + $0x5] ss:$0 sm:$0xff] }
0x1ce4   : > { %v3856_v3 = vsel %vm3855_vm15, %v4952_v59, %v3852_v1 }
0x1ce5   : > { %v3861_v4 = vsel %vm3858_vm0, %v3860_v2, %v3856_v3  ;;  %v4161_v3 = vld [vmem:[%s6000_s3 + $0x10] sm:$0xff] }
0x1ce6   : > { %v3862_v6 = vmul.f32 %v4950_v58, %v3861_v4  ;;  %v4164_v58 = vld [vmem:[%s6000_s3 + $0x28] sm:$0xff] }
0x1ce7   : > { %v4160_v4 = vld [vmem:[%s6000_s3 + $0x8] sm:$0xff] }
0x1ce8   : > { %4723 = vmatmul.msk.f32.vlgmr.msra.gmra.mxu0 %vm1682_vm9, %v3862_v6  ;;  %v4159_v6 = vld [vmem:[%s6000_s3] sm:$0xff] }
0x1ce9   : > { %4150 = vmatpush.msra.mxu0 %v4130_v44 }
0x1ceb   : > { %4151 = vmatpush.msra.mxu0 %v4129_v34 }
0x1ced   : > { %4152 = vmatpush.msra.mxu0 %v4128_v61 }
0x1cef   : > { %4153 = vmatpush.msra.mxu0 %v4127_v46 }
0x1cf0   : > { %4743 = vmatmul.msk.f32.vlgmr.msrb.gmra.mxu0 %vm1291_vm2, %v5714_v5 }
0x1d65   : > { %v3883_v7 = vpop.f32.mrf.mxu0 }
0x1d66   : > { %4725 = vmatmul.msk.f32.vlgmr.msra.gmra.mxu1 %vm1682_vm9, %v3883_v7  ;;  %v4893_v7 = vld [vmem:[%s6001_s5] ss:$0 sm:$0xff] }
0x1d67   : > { %4178 = vmatpush.msra.mxu1 %v4166_v47 }
0x1d69   : > { %4179 = vmatpush.msra.mxu1 %v4165_v48 }
0x1d6b   : > { %4180 = vmatpush.msra.mxu1 %v4164_v58 }
0x1d6d   : > { %v3999_v15 = vpop.f32.mrf.mxu0 }
0x1d6e   : > { %v4000_v16 = vadd.f32 %v4891_v13, %v3999_v15  ;;  %4745 = vmatmul.msk.f32.vlgmr.msrb.gmra.mxu1 %vm1682_vm9, %v3940_v14  ;;  %v4894_v14 = vld [vmem:[%s6002_s6] ss:$0 sm:$0xff]  ;;  %s1250_s6 = sand.u32 1, %s5019_s1  }
0x1d6f   : > { %s4470_s5 = sshll.u32 %s1250_s6, 3  ;;  %s4276_s10 = scalar_lea.sflag [#allocation3], %s1250_s6 }
0x1d70   : > { %4072 = vmatpush.msrb.mxu3 %v4000_v16 }
0x1de3   : > { %v3908_v17 = vpop.f32.mrf.mxu1 }
0x1de4   : > { %v3911_v18 = vadd.f32 %v3908_v17, %v3720_v39 }
0x1deb   : > { %v4025_v20 = vpop.f32.mrf.mxu1 }
0x1dec   : > { %v4028_v50 = vmul.f32 0.35355338, %v4025_v20 }
0x1dee   : > { %v4029_v21 = vadd.f32 %v4028_v50, %v5449_v10  ;;  %v4222_v50 = vld [vmem:[%s5971_s4 + $0x18] sm:$0xff] }
0x1def   : > { %4242 = vmatpush.msra.mxu3 %v4222_v50 }
0x1df0   : > { %v4030_v5 = vsel %vm1682_vm9, %v4029_v21, -inf }
0x1df1   : > { %4031 = vmax.xlane.f32.xlu2 %v4030_v5  ;;  %v4220_v5 = vld [vmem:[%s5971_s4 + $0x8] sm:$0xff] }
0x1e64   : > { %v4032_v22 = vpop.xlane.xlu2 %4031 }
0x1e65   : > { %v4033_v23 = vsub.f32 %v4029_v21, %v4032_v22  ;;  %v4221_v21 = vld [vmem:[%s5971_s4 + $0x10] sm:$0xff]  ;;  %v4219_v22 = vld [vmem:[%s5971_s4] sm:$0xff]  ;;  %s4755_s4 = sshll.u32 %s5304_s0, 3 }
0x1e66   : > { %4243 = vmatpush.msra.mxu3 %v4221_v21 }
0x1e67   : > { %v4034_v24 = vmul.f32 1.442695, %v4033_v23 }
0x1e68   : > { %4244 = vmatpush.msra.mxu3 %v4220_v5 }
0x1e69   : > { %4953 = vpow2.f32 %v4034_v24 }
0x1e6a   : > { %4245 = vmatpush.msra.mxu3 %v4219_v22 }
0x1e6f   : > { %v4954_v45 = vpop.eup %4953 }
0x1e70   : > { %v4036_v8 = vsel %vm1682_vm9, %v4954_v45, 0.0 }
0x1e71   : > { %4037 = vadd.xlane.f32.xlu0 %v4036_v8 }
0x1ee4   : > { %v4038_v25 = vpop.xlane.xlu0 %4037 }
0x1ee5   : > { %4955 = vrcp.f32 %v4038_v25  ;;  %v4050_v29 = vand.u32 2147483648, %v4038_v25  ;;  %v4048_v10 = vand.u32 2147483647, %v4038_v25  ;;  %vm4044_vm3 = vweird.f32 %v4038_v25 }
0x1ee7   : > { %v4051_v32 = vor.u32 1.1754944e-38, %v4050_v29  ;;  %vm4049_vm5 = vcmp.eq.f32.partialorder %v4048_v10, 8.507059e+37 }
0x1eeb   : > { %v4956_v26 = vpop.eup %4955 }
0x1eec   : > { %v4040_v27 = vmul.f32 %v4956_v26, %v4038_v25  ;;  %vm4045_vm1 = vweird.f32 %v4956_v26 }
0x1eed   : > { %vm4046_vm4 = vmor %vm4044_vm3, %vm4045_vm1 }
0x1eee   : > { %v4041_v28 = vsub.f32 1.0, %v4040_v27 }
0x1ef0   : > { %v4042_v30 = vmul.f32 %v4956_v26, %v4041_v28 }
0x1ef2   : > { %v4043_v31 = vadd.f32 %v4956_v26, %v4042_v30  ;;  %v4895_v30 = vld [vmem:[%s5156_s20 + $0x6] ss:$0 sm:$0xff] }
0x1ef4   : > { %v4047_v56 = vsel %vm4046_vm4, %v4956_v26, %v4043_v31 }
0x1ef5   : > { %v4052_v33 = vsel %vm4049_vm5, %v4051_v32, %v4047_v56 }
0x1ef6   : > { %v4053_v36 = vmul.f32 %v4954_v45, %v4052_v33 }
0x1ef8   : > { %4746 = vmatmul.msk.f32.vlgmr.msrb.gmra.mxu3 %vm1682_vm9, %v4053_v36 }
0x1f7b   : > { %v4074_v38 = vpop.f32.mrf.mxu3 }
0x1f7c   : > { %4748 = vmatmul.msk.f32.vlgmr.msra.gmra.mxu2 %vm1682_vm9, %v4074_v38 }
0x1fff   : > { %v4099_v39 = vpop.f32.mrf.mxu2 }
0x2000   : > { %v4102_v40 = vadd.f32 %v4099_v39, %v3911_v18 }
0x2002   : > { %v4103_v41 = vadd.f32 %v4102_v40, %v5736_v37  ;;  %v4163_v37 = vld [vmem:[%s6000_s3 + $0x20] sm:$0xff]  ;;  %s1252_s3 = scalar_lea.vmem [#allocation2], %s4470_s5  ;;  %s4290_s5 = scalar_lea.hbm %s5276_s17, %s4755_s4 }
0x2003   : > { %4181 = vmatpush.msra.mxu1 %v4163_v37  ;;  %s4292_s8 = sshll.u32 %s1252_s3, 4  ;;  %s4294_s9 = sshll.u32 %s4290_s5, 4  ;;  %s4293_s8 = int_to_ptr.vmem [resolvable:$true] %s4292_s8  ;;  %s4295_s9 = int_to_ptr.hbm [resolvable:$true] %s4294_s9 }
0x2004   : > { %v4106_v42 = vmul.f32 %v4103_v41, %v4103_v41  ;;  %s4979_s12 = sshra.s32 %s4295_s9, 4  ;;  %s4980_s12 = int_to_ptr.hbm [resolvable:$true] %s4979_s12 }
0x2005   : > { %4182 = vmatpush.msra.mxu1 %v4162_v19  ;;  %s4981_s14 = scalar_lea.hbm %s4980_s12, 8  ;;  %p4986_p0 = scmp.lt.s32.totalorder %s4980_s12, %s5276_s17 }
0x2006   : > { %v4107_v43 = vsel %vm1291_vm2, %v4106_v42, 0.0  ;;  %p4982_p11 = scmp.ne.s32.totalorder %s4980_s12, %s4981_s14  ;;  %p4987_p1 = scmp.lt.s32.totalorder %s4985_s15, %s4981_s14 }
0x2007   : > { %4108 = vadd.xlane.f32.xlu2 %v4107_v43  ;;  %4183 = vmatpush.msra.mxu1 %v4161_v3 }
0x2008   : > { %p4983_p12 = pnand %p4982_p11, %p5321_p5  ;;  %p4988_p2 = por %p4987_p1, %p4986_p0 }
0x2009   : > { %4184 = vmatpush.msra.mxu1 %v4160_v4 }
0x200a   : > { %p4984_p13 = pneg %p4983_p12 }
0x200b   : > { %4185 = vmatpush.msra.mxu1 %v4159_v6 }
0x200c   : > { %p4989_p3 = pnand %p4988_p2, %p4984_p13 }
0x207a   : > { %v4109_v54 = vpop.xlane.xlu2 %4108 }
0x207b   : > { %v4110_v52 = vmul.f32 %v4109_v54, %v5412_v35 }
0x207d   : > { %v4111_v53 = vadd.f32 1e-06, %v4110_v52 }
0x207f   : > { %4957 = vrsqrt.f32 %v4111_v53  ;;  %vm4118_vm6 = vweird.f32 %v4111_v53 }
0x2085   : > { %v4958_v55 = vpop.eup %4957 }
0x2086   : > { %v4113_v57 = vmul.f32 %v4958_v55, %v4111_v53  ;;  %vm4119_vm9 = vweird.f32 %v4958_v55 }
0x2087   : > { %vm4120_vm7 = vmor %vm4118_vm6, %vm4119_vm9 }
0x2088   : > { %v4114_v59 = vmul.f32 %v4958_v55, %v4113_v57 }
0x208a   : > { %v4115_v60 = vmul.f32 0.5, %v4114_v59 }
0x208c   : > { %v4116_v62 = vsub.f32 1.5, %v4115_v60 }
0x208e   : > { %v4117_v63 = vmul.f32 %v4958_v55, %v4116_v62 }
0x2090   : > { %v4121_v0 = vsel %vm4120_vm7, %v4958_v55, %v4117_v63 }
0x2091   : > { %v4122_v1 = vmul.f32 %v4121_v0, %v4103_v41 }
0x2093   : > { %v4126_v2 = vmul.f32 %v4892_v12, %v4122_v1 }
0x2095   : > { %4750 = vmatmul.msk.f32.vlgmr.msra.gmra.mxu0 %vm1291_vm2, %v4126_v2 }
0x2112   : > { %v4155_v9 = vpop.f32.mrf.mxu0 }
0x2113   : > { %v4156_v11 = vadd.f32 %v4893_v7, %v4155_v9 }
0x2115   : > { %v4158_v13 = vmax.f32 %v4156_v11, 0.0 }
0x2117   : > { %4751 = vmatmul.msk.f32.vlgmr.msra.gmra.mxu1 %vm2426_vm14, %v4158_v13 }
0x2194   : > { %v4187_v15 = vpop.f32.mrf.mxu1 }
0x2195   : > { %v4190_v16 = vadd.f32 %v4187_v15, %v4103_v41 }
0x2197   : > { %v4195_v17 = vadd.f32 %v4894_v14, %v4190_v16 }
0x2199   : > { %v4196_v18 = vmul.f32 %v4195_v17, %v4195_v17 }
0x219b   : > { %v4197_v20 = vsel %vm1291_vm2, %v4196_v18, 0.0 }
0x219c   : > { %4198 = vadd.xlane.f32.xlu0 %v4197_v20 }
0x220f   : > { %v4199_v23 = vpop.xlane.xlu0 %4198 }
0x2210   : > { %v4200_v24 = vmul.f32 %v4199_v23, %v5412_v35  ;;  %v4896_v35 = vld [vmem:[%s5271_s21] ss:$0 sm:$0xff] }
0x2212   : > { %v4201_v45 = vadd.f32 1e-06, %v4200_v24 }
0x2214   : > { %4959 = vrsqrt.f32 %v4201_v45  ;;  %vm4208_vm10 = vweird.f32 %v4201_v45 }
0x221a   : > { %v4960_v8 = vpop.eup %4959 }
0x221b   : > { %v4203_v25 = vmul.f32 %v4960_v8, %v4201_v45  ;;  %vm4209_vm8 = vweird.f32 %v4960_v8 }
0x221c   : > { %vm4210_vm11 = vmor %vm4208_vm10, %vm4209_vm8 }
0x221d   : > { %v4204_v26 = vmul.f32 %v4960_v8, %v4203_v25 }
0x221f   : > { %v4205_v27 = vmul.f32 0.5, %v4204_v26 }
0x2221   : > { %v4206_v28 = vsub.f32 1.5, %v4205_v27 }
0x2223   : > { %v4207_v29 = vmul.f32 %v4960_v8, %v4206_v28 }
0x2225   : > { %v4211_v10 = vsel %vm4210_vm11, %v4960_v8, %v4207_v29 }
0x2226   : > { %v4212_v31 = vmul.f32 %v4211_v10, %v4195_v17 }
0x2228   : > { %v4218_v32 = vmul.f32 %v4895_v30, %v4212_v31 }
0x222a   : > { %4753 = vmatmul.msk.f32.vlgmr.msra.gmra.mxu3 %vm1291_vm2, %v4218_v32 }
0x22ad   : > { %v4247_v56 = vpop.f32.mrf.mxu3 }
0x22ae   : > { %v4248_v33 = vadd.f32 %v4896_v35, %v4247_v56 }
0x22b0   : > { %v4251_v36 = vsel %vm2426_vm14, %v4248_v33, -inf  ;;  %4250 = vst.msk [vmem:[%s1252_s3] sm:$0xff] %vm2426_vm14, %v4248_v33  ;;  %v4268_v38 = vsel %vm4267_vm12, %v4248_v33, 0.0 }
0x22b1   : > { %4252 = vmax.xlane.f32.xlu2 %v4251_v36  ;;  %v4269_v39 = vsel %vm2426_vm14, %v4268_v38, 0.0 }
0x22b9   : > { %4270 = vadd.xlane.f32.xlu2 %v4269_v39 }
0x2324   : > { %v4253_v40 = vpop.xlane.xlu2 %4252 }
0x2325   : > { %v4254_v41 = vsub.f32 %v4248_v33, %v4253_v40 }
0x2327   : > { %v4255_v42 = vmul.f32 1.442695, %v4254_v41 }
0x2329   : > { %4961 = vpow2.f32 %v4255_v42 }
0x232f   : > { %v4962_v43 = vpop.eup %4961 }
0x2330   : > { %v4257_v44 = vsel %vm2426_vm14, %v4962_v43, 0.0 }
0x2331   : > { %4258 = vadd.xlane.f32.xlu0 %v4257_v44 }
0x2332   : > { %4992 = shalt.err (!%p4989_p3)
}
0x2333   : > { %4758 = dma.vmem_to_hbm [thread:$0]  (%p5321_p5), %s4293_s8, 128, %s4295_s9, %s4276_s10   ;;  %v4271_v47 = vpop.xlane.xlu2 %4270  ;;  %vm4273_vm2 = vcmask 7168  }
0x2334   : > { %s1281_s4 = scalar_lea.vmem %s5281_s13, %s5377_s16 }
0x23a4   : > { %v4259_v49 = vpop.xlane.xlu0 %4258 }
0x23a5   : > { %4963 = vlog2.f32 %v4259_v49 }
0x23ab   : > { %v4964_v34 = vpop.eup %4963 }
0x23ac   : > { %v4261_v61 = vmul.f32 0.6931472, %v4964_v34 }
0x23ae   : > { %v4262_v46 = vadd.f32 %v4261_v61, %v4253_v40 }
0x23b0   : > { %v4272_v48 = vsub.f32 %v4262_v46, %v4271_v47 }
0x23b2   : > { %4274 = vst.msk [vmem:[%s1281_s4] sm:$0xff] %vm4273_vm2, %v4272_v48 }
0x23b3 PF: > { %p4764_p4 = scmp.ge.s32.totalorder %s5027_s7, 2  ;;  %s4309_s14 = sand.u32 1, %s5015_s28  }
0x23b4   : > { %s4310_s9 = scalar_lea.sflag [#allocation3], %s4309_s14 }
0x23b5   : > { %p4761_p7 = pnand %p4764_p4, %p5325_p6 }
0x23b7   : > { %p4762_p8 = pneg %p4761_p7 }
0x23b9   : > { %5010 = dma.done.wait (%p4762_p8), %s4310_s9, 128  }
0x23ba   : > { %5012 = vsyncadd (%p4762_p8), %s4310_s9, 4294967168  ;;  %p92_p5 = scmp.ge.s32.totalorder %s5308_s11, 4   ;;  %s6003_s28 = smov %s5019_s1 }
0x23bb   : > { %s6004_s1 = smov %s5023_s2  ;;  %s6005_s2 = smov %s5319_s18 }
0x23bc   : > { %s6006_s7 = smov %s5308_s11  ;;  %94 = sbr.rel (!%p92_p5) target bundleno = 76 (0x4c), region = 356 }
0x23c1   :  { %4323 = vsyncpa [#allocation3], 1 }
0x23c2   :  { %4325 = vsyncpa [#allocation3 + $0x1], 1 }

</bundles_post_ra>
